<compile_context>
chip_gen: v6e
topology: v6e:2x2x1
jax: 0.10.0
libtpu: 0.0.40
codegen_flags: <defaults>
</compile_context>

<pallas_src>
import jax
import jax.numpy as jnp
from jax import lax
from jax.experimental import pallas as pl
from jax.experimental.pallas import tpu as pltpu

EPS = 1e-5  # nn.InstanceNorm2d default eps


# ------------------------- sizing helpers (host side) -----------------------
def _round_up(x, m):
    return (x + m - 1) // m * m


def _vmem_capacity_bytes():
    try:
        return int(pltpu.get_tpu_info().vmem_capacity_bytes)
    except Exception:
        return 64 * 1024 * 1024  # conservative fallback (v7x physical VMEM)


def _pick_strip(H, W, C, itemsize, vmem_cap_bytes):
    # Bound the per-strip im2col slab (9*strip*W*C): ~2 MiB on small-VMEM chips
    # (v7x: 64 MiB) and ~6 MiB on v5e/v6e (128 MiB). Bigger strips => larger M
    # per matmul and fewer per-strip overheads, where VMEM allows it.
    slab_budget = (2 if vmem_cap_bytes <= 80 * 2**20 else 6) * 2**20
    per_row = 9 * W * C * itemsize
    target = min(H, max(8, slab_budget // max(per_row, 1)))
    best = 1
    for d in range(1, H + 1):          # largest divisor of H not above target
        if H % d == 0 and d <= target:
            best = d
    return best


# ------------------------------ kernel helpers ------------------------------
def _conv3x3_strip(slab, w_mat, strip):
    # slab: (strip+2, W, C) operand dtype, already reflection-padded along H.
    # w_mat: (9*C, C) operand dtype.  Returns (strip, W, C) float32 (MXU acc).
    _, W, _ = slab.shape
    # Width-shifted views via XLU roll (no sublane-misaligned slices), then fix
    # the single reflected boundary column with a cheap VPU select.
    left = pltpu.roll(slab, shift=1, axis=1)        # left[:, j]  = slab[:, j-1]
    right = pltpu.roll(slab, shift=W - 1, axis=1)   # right[:, j] = slab[:, j+1]
    col = lax.broadcasted_iota(jnp.int32, (1, W, 1), 1)
    left = jnp.where(col == 0, slab[:, 1:2, :], left)              # col -1 -> 1
    right = jnp.where(col == W - 1, slab[:, W - 2:W - 1, :], right)  # col W -> W-2

    parts = []
    for dy in range(3):   # tap order (dy, dx) matches the packed weight rows
        parts += [left[dy:dy + strip], slab[dy:dy + strip], right[dy:dy + strip]]
    patches = jnp.concatenate(parts, axis=-1)       # (strip, W, 9*C)
    return jnp.einsum("swk,ko->swo", patches, w_mat,
                      preferred_element_type=jnp.float32)


def _make_resblock_kernel(H, W, C, strip, op_dtype):
    n_strips = H // strip
    inv_n = 1.0 / float(H * W)

    def kernel(x_ref, w1_ref, w2_ref, o_ref, xpad_ref, h_ref, ssum_ref, ssq_ref):
        # ---- reflection-pad the input along H once (W handled via rolls) ----
        x = x_ref[0]                                   # (H, W, C) operand dtype
        xpad_ref[pl.ds(1, H)] = x
        xpad_ref[0] = x[1]
        xpad_ref[H + 1] = x[H - 2]

        # ------------------ conv1: per-strip matmul + stats ------------------
        ssum_ref[...] = jnp.zeros_like(ssum_ref)
        ssq_ref[...] = jnp.zeros_like(ssq_ref)

        @pl.loop(0, n_strips)
        def _conv1(s):
            r0 = s * strip
            slab = xpad_ref[pl.ds(r0, strip + 2)]
            y = _conv3x3_strip(slab, w1_ref[...], strip)      # (strip, W, C) f32
            h_ref[pl.ds(r0 + 1, strip)] = y                   # image row r -> pad row r+1
            ssum_ref[...] += jnp.sum(y, axis=(0, 1), keepdims=True)
            ssq_ref[...] += jnp.sum(y * y, axis=(0, 1), keepdims=True)

        # InstanceNorm (conv bias folded away: cancelled by mean subtraction)
        # + ReLU, in place; refresh the reflected pad rows so h_ref is a ready
        # padded input for conv2.
        mean = ssum_ref[...] * inv_n
        var = jnp.maximum(ssq_ref[...] * inv_n - mean * mean, 0.0)
        scale = lax.rsqrt(var + EPS)                          # EUP slot
        off = mean * scale
        h_ref[pl.ds(1, H)] = jnp.maximum(h_ref[pl.ds(1, H)] * scale - off, 0.0)
        h_ref[0] = h_ref[2]
        h_ref[H + 1] = h_ref[H - 1]

        # ------------------ conv2: per-strip matmul + stats ------------------
        ssum_ref[...] = jnp.zeros_like(ssum_ref)
        ssq_ref[...] = jnp.zeros_like(ssq_ref)

        @pl.loop(0, n_strips)
        def _conv2(s):
            r0 = s * strip
            slab = h_ref[pl.ds(r0, strip + 2)].astype(op_dtype)
            y = _conv3x3_strip(slab, w2_ref[...], strip)
            # Write one row below the read window: rows [r0, r0+strip) are
            # never read by later strips, so the same scratch is safely reused.
            h_ref[pl.ds(r0, strip)] = y
            ssum_ref[...] += jnp.sum(y, axis=(0, 1), keepdims=True)
            ssq_ref[...] += jnp.sum(y * y, axis=(0, 1), keepdims=True)

        mean2 = ssum_ref[...] * inv_n
        var2 = jnp.maximum(ssq_ref[...] * inv_n - mean2 * mean2, 0.0)
        scale2 = lax.rsqrt(var2 + EPS)
        off2 = mean2 * scale2
        # Fused InstanceNorm + residual add: single store in the output dtype.
        o_ref[0] = (x_ref[0].astype(jnp.float32)
                    + h_ref[pl.ds(0, H)] * scale2 - off2).astype(o_ref.dtype)

    return kernel


# ------------------------------- pallas entry --------------------------------
def resblock_nhwc(x, w1_mat, w2_mat):
    # x: (N, H, W, C) lane-dense (C multiple of 128, padded lanes MUST be zero:
    # zero channels stay exactly zero through IN since mean=var=0 there).
    # w*_mat: (9*C, C) in x.dtype.  Use directly for chained ResBlocks.
    N, H, W, C = x.shape
    K = w1_mat.shape[0]
    assert w1_mat.dtype == x.dtype and w2_mat.dtype == x.dtype, \
        "prepared weights must be in the activation dtype (bf16 MXU fast path)"

    vmem_cap = _vmem_capacity_bytes()
    strip = _pick_strip(H, W, C, x.dtype.itemsize, vmem_cap)
    vmem_limit = min(max(vmem_cap * 3 // 4, 32 * 1024 * 1024), 100 * 1024 * 1024)

    kernel = _make_resblock_kernel(H, W, C, strip, x.dtype)
    return pl.pallas_call(
        kernel,
        out_shape=jax.ShapeDtypeStruct((N, H, W, C), x.dtype),
        grid=(N,),
        in_specs=[
            pl.BlockSpec((1, H, W, C), lambda n: (n, 0, 0, 0)),
            pl.BlockSpec((K, C), lambda n: (0, 0)),
            pl.BlockSpec((K, C), lambda n: (0, 0)),
        ],
        out_specs=pl.BlockSpec((1, H, W, C), lambda n: (n, 0, 0, 0)),
        scratch_shapes=[
            pltpu.VMEM((H + 2, W, C), x.dtype),       # reflection-padded input
            pltpu.VMEM((H + 2, W, C), jnp.float32),   # conv scratch / padded intermediate
            pltpu.VMEM((1, 1, C), jnp.float32),       # per-channel sum
            pltpu.VMEM((1, 1, C), jnp.float32),       # per-channel sum of squares
        ],
        compiler_params=pltpu.CompilerParams(
            dimension_semantics=("parallel",),
            vmem_limit_bytes=int(vmem_limit),
        ),
    )(x, w1_mat, w2_mat)


# --------------------------- one-time weight prep ----------------------------
def prepare_resblock_params(w1_oihw, b1, w2_oihw, b2,
                            activation_dtype=jnp.float32):
    # Done once at model-load time (hoisted out of the hot path).
    # Biases are accepted for API fidelity but folded away: a per-channel
    # constant before InstanceNorm(affine=False) is exactly cancelled.
    del b1, b2
    C = w1_oihw.shape[0]
    c_pad = max(128, _round_up(C, 128))               # lane-dense channels

    def prep(w):
        w = jnp.pad(w, ((0, c_pad - C), (0, c_pad - C), (0, 0), (0, 0)))
        w = jnp.transpose(w, (2, 3, 1, 0))            # (kh, kw, Cin, Cout)
        # Row order (dy*3 + dx)*Cin + cin matches the kernel's patch order.
        return w.reshape(9 * c_pad, c_pad).astype(activation_dtype)

    return prep(w1_oihw), prep(w2_oihw), c_pad


def resblock(x_nchw, params):
    # Public entry mirroring the PyTorch module (NCHW in, NCHW out).
    w1_mat, w2_mat, c_pad = params
    N, C, H, W = x_nchw.shape
    x = jnp.transpose(x_nchw, (0, 2, 3, 1)).astype(w1_mat.dtype)   # NHWC
    if c_pad != C:
        # Padded channels must be exactly zero (IN would amplify garbage).
        x = jnp.pad(x, ((0, 0), (0, 0), (0, 0), (0, c_pad - C)))
    out = resblock_nhwc(x, w1_mat, w2_mat)
    if c_pad != C:
        out = out[..., :C]
    return jnp.transpose(out, (0, 3, 1, 2))


# ------------------ pure-JAX reference (for verification) --------------------
def _ref_conv_in(x, w_oihw, b):
    xp = jnp.pad(x, ((0, 0), (0, 0), (1, 1), (1, 1)), mode="reflect")
    y = lax.conv_general_dilated(
        xp, w_oihw, window_strides=(1, 1), padding="VALID",
        dimension_numbers=("NCHW", "OIHW", "NCHW")) + b[None, :, None, None]
    mean = y.mean(axis=(2, 3), keepdims=True)
    var = ((y - mean) ** 2).mean(axis=(2, 3), keepdims=True)
    return (y - mean) / jnp.sqrt(var + EPS)


def resblock_ref(x, w1, b1, w2, b2):
    h = jnp.maximum(_ref_conv_in(x, w1, b1), 0.0)
    return x + _ref_conv_in(h, w2, b2)


if __name__ == "__main__":
    N, C, H, W = 2, 4, 16, 16
    key = jax.random.PRNGKey(0)
    kx, k1, k2, k3, k4 = jax.random.split(key, 5)

    x = jax.random.normal(kx, (N, C, H, W), dtype=jnp.float32)
    w1 = 0.1 * jax.random.normal(k1, (C, C, 3, 3), dtype=jnp.float32)
    b1 = 0.1 * jax.random.normal(k2, (C,), dtype=jnp.float32)
    w2 = 0.1 * jax.random.normal(k3, (C, C, 3, 3), dtype=jnp.float32)
    b2 = 0.1 * jax.random.normal(k4, (C,), dtype=jnp.float32)

    params = prepare_resblock_params(w1, b1, w2, b2,
                                     activation_dtype=x.dtype)
    out = jax.block_until_ready(resblock(x, params))
    ref = jax.block_until_ready(resblock_ref(x, w1, b1, w2, b2))

    assert out.shape == (N, C, H, W)
    assert float(jnp.max(jnp.abs(out - ref))) < 1e-3, "mismatch vs reference"
    print("KERNEL_OK")
</pallas_src>

<mosaic_0001>
module attributes {stable_mosaic.version = 11 : i64} {
  func.func @kernel(%arg0: i32, %arg1: memref<1x16x16x128xf32, #tpu.memory_space<vmem>>, %arg2: memref<1152x128xf32, #tpu.memory_space<vmem>>, %arg3: memref<1152x128xf32, #tpu.memory_space<vmem>>, %arg4: memref<1x16x16x128xf32, #tpu.memory_space<vmem>>, %arg5: memref<18x16x128xf32, #tpu.memory_space<vmem>>, %arg6: memref<18x16x128xf32, #tpu.memory_space<vmem>>, %arg7: memref<1x1x128xf32, #tpu.memory_space<vmem>>, %arg8: memref<1x1x128xf32, #tpu.memory_space<vmem>>) attributes {dimension_semantics = [#tpu.dimension_semantics<parallel>], iteration_bounds = array<i64: 2>, scalar_prefetch = 0 : i64, scratch_operands = 4 : i64, tpu.core_type = #tpu.core_type<tc>, window_params = [{transform_indices = @transform_0, window_bounds = array<i64: 1, 16, 16, 128>}, {pipeline_mode = #tpu.pipeline_mode<synchronous>, transform_indices = @transform_1, window_bounds = array<i64: 1152, 128>}, {pipeline_mode = #tpu.pipeline_mode<synchronous>, transform_indices = @transform_2, window_bounds = array<i64: 1152, 128>}, {transform_indices = @transform_3, window_bounds = array<i64: 1, 16, 16, 128>}]} {
    %c0 = arith.constant 0 : index
    %c0_0 = arith.constant 0 : index
    %c0_1 = arith.constant 0 : index
    %c0_2 = arith.constant 0 : index
    %0 = vector.load %arg1[%c0, %c0_0, %c0_1, %c0_2] : memref<1x16x16x128xf32, #tpu.memory_space<vmem>>, vector<1x16x16x128xf32>
    %1 = vector.shape_cast %0 : vector<1x16x16x128xf32> to vector<16x16x128xf32>
    %c1 = arith.constant 1 : index
    %c0_3 = arith.constant 0 : index
    %c0_4 = arith.constant 0 : index
    %2 = vector.load %arg5[%c1, %c0_3, %c0_4] : memref<18x16x128xf32, #tpu.memory_space<vmem>>, vector<16x16x128xf32>
    tpu.vector_store %arg5[%c1, %c0_3, %c0_4], %1 {strides = array<i32>} : memref<18x16x128xf32, #tpu.memory_space<vmem>>, vector<16x16x128xf32>,
    %3 = vector.extract_strided_slice %1 {offsets = [1, 0, 0], sizes = [1, 16, 128], strides = [1, 1, 1]} : vector<16x16x128xf32> to vector<1x16x128xf32>
    %4 = vector.shape_cast %3 : vector<1x16x128xf32> to vector<16x128xf32>
    %c0_5 = arith.constant 0 : index
    %c0_6 = arith.constant 0 : index
    %c0_7 = arith.constant 0 : index
    %5 = vector.load %arg5[%c0_5, %c0_6, %c0_7] : memref<18x16x128xf32, #tpu.memory_space<vmem>>, vector<1x16x128xf32>
    %6 = vector.shape_cast %5 : vector<1x16x128xf32> to vector<16x128xf32>
    %7 = vector.shape_cast %4 : vector<16x128xf32> to vector<1x16x128xf32>
    tpu.vector_store %arg5[%c0_5, %c0_6, %c0_7], %7 {strides = array<i32>} : memref<18x16x128xf32, #tpu.memory_space<vmem>>, vector<1x16x128xf32>,
    %8 = vector.extract_strided_slice %1 {offsets = [14, 0, 0], sizes = [1, 16, 128], strides = [1, 1, 1]} : vector<16x16x128xf32> to vector<1x16x128xf32>
    %9 = vector.shape_cast %8 : vector<1x16x128xf32> to vector<16x128xf32>
    %c17 = arith.constant 17 : index
    %c0_8 = arith.constant 0 : index
    %c0_9 = arith.constant 0 : index
    %10 = vector.load %arg5[%c17, %c0_8, %c0_9] : memref<18x16x128xf32, #tpu.memory_space<vmem>>, vector<1x16x128xf32>
    %11 = vector.shape_cast %10 : vector<1x16x128xf32> to vector<16x128xf32>
    %12 = vector.shape_cast %9 : vector<16x128xf32> to vector<1x16x128xf32>
    tpu.vector_store %arg5[%c17, %c0_8, %c0_9], %12 {strides = array<i32>} : memref<18x16x128xf32, #tpu.memory_space<vmem>>, vector<1x16x128xf32>,
    %cst = arith.constant 0.000000e+00 : f32
    %13 = vector.broadcast %cst : f32 to vector<1x1x128xf32>
    %c0_10 = arith.constant 0 : index
    %c0_11 = arith.constant 0 : index
    %c0_12 = arith.constant 0 : index
    %14 = vector.load %arg7[%c0_10, %c0_11, %c0_12] : memref<1x1x128xf32, #tpu.memory_space<vmem>>, vector<1x1x128xf32>
    tpu.vector_store %arg7[%c0_10, %c0_11, %c0_12], %13 {strides = array<i32>} : memref<1x1x128xf32, #tpu.memory_space<vmem>>, vector<1x1x128xf32>,
    %cst_13 = arith.constant 0.000000e+00 : f32
    %15 = vector.broadcast %cst_13 : f32 to vector<1x1x128xf32>
    %c0_14 = arith.constant 0 : index
    %c0_15 = arith.constant 0 : index
    %c0_16 = arith.constant 0 : index
    %16 = vector.load %arg8[%c0_14, %c0_15, %c0_16] : memref<1x1x128xf32, #tpu.memory_space<vmem>>, vector<1x1x128xf32>
    tpu.vector_store %arg8[%c0_14, %c0_15, %c0_16], %15 {strides = array<i32>} : memref<1x1x128xf32, #tpu.memory_space<vmem>>, vector<1x1x128xf32>,
    %c0_i32 = arith.constant 0 : i32
    %c1_i32 = arith.constant 1 : i32
    %17 = arith.muli %c0_i32, %c1_i32 : i32
    %c0_i32_17 = arith.constant 0 : i32
    %18 = arith.addi %c0_i32_17, %17 : i32
    %c16_i32 = arith.constant 16 : i32
    %19 = arith.muli %18, %c16_i32 : i32
    %20 = arith.index_cast %19 : i32 to index
    %c0_18 = arith.constant 0 : index
    %c0_19 = arith.constant 0 : index
    %21 = vector.load %arg5[%20, %c0_18, %c0_19] : memref<18x16x128xf32, #tpu.memory_space<vmem>>, vector<18x16x128xf32>
    %c0_20 = arith.constant 0 : index
    %c0_21 = arith.constant 0 : index
    %22 = vector.load %arg2[%c0_20, %c0_21] : memref<1152x128xf32, #tpu.memory_space<vmem>>, vector<1152x128xf32>
    %c1_i32_22 = arith.constant 1 : i32
    %23 = tpu.dynamic_rotate %21 by %c1_i32_22 dim 1 : vector<18x16x128xf32>, i32 -> vector<18x16x128xf32>
    %c15_i32 = arith.constant 15 : i32
    %24 = tpu.dynamic_rotate %21 by %c15_i32 dim 1 : vector<18x16x128xf32>, i32 -> vector<18x16x128xf32>
    %25 = tpu.iota {dimensions = array<i32: 1>} : vector<1x16x1xi32>
    %c0_i32_23 = arith.constant 0 : i32
    %26 = vector.broadcast %c0_i32_23 : i32 to vector<1x16x1xi32>
    %27 = arith.cmpi eq, %25, %26 : vector<1x16x1xi32>
    %28 = vector.extract_strided_slice %21 {offsets = [0, 1, 0], sizes = [18, 1, 128], strides = [1, 1, 1]} : vector<18x16x128xf32> to vector<18x1x128xf32>
    %29 = vector.shape_cast %27 : vector<1x16x1xi1> to vector<1x16x1xi1>
    %30 = vector.broadcast %29 : vector<1x16x1xi1> to vector<18x16x128xi1>
    %31 = vector.shape_cast %28 : vector<18x1x128xf32> to vector<18x1x128xf32>
    %32 = vector.broadcast %31 : vector<18x1x128xf32> to vector<18x16x128xf32>
    %33 = arith.select %30, %32, %23 : vector<18x16x128xi1>, vector<18x16x128xf32>
    %c15_i32_24 = arith.constant 15 : i32
    %34 = vector.broadcast %c15_i32_24 : i32 to vector<1x16x1xi32>
    %35 = arith.cmpi eq, %25, %34 : vector<1x16x1xi32>
    %36 = vector.extract_strided_slice %21 {offsets = [0, 14, 0], sizes = [18, 1, 128], strides = [1, 1, 1]} : vector<18x16x128xf32> to vector<18x1x128xf32>
    %37 = vector.shape_cast %35 : vector<1x16x1xi1> to vector<1x16x1xi1>
    %38 = vector.broadcast %37 : vector<1x16x1xi1> to vector<18x16x128xi1>
    %39 = vector.shape_cast %36 : vector<18x1x128xf32> to vector<18x1x128xf32>
    %40 = vector.broadcast %39 : vector<18x1x128xf32> to vector<18x16x128xf32>
    %41 = arith.select %38, %40, %24 : vector<18x16x128xi1>, vector<18x16x128xf32>
    %42 = vector.extract_strided_slice %33 {offsets = [0, 0, 0], sizes = [16, 16, 128], strides = [1, 1, 1]} : vector<18x16x128xf32> to vector<16x16x128xf32>
    %43 = vector.extract_strided_slice %21 {offsets = [0, 0, 0], sizes = [16, 16, 128], strides = [1, 1, 1]} : vector<18x16x128xf32> to vector<16x16x128xf32>
    %44 = vector.extract_strided_slice %41 {offsets = [0, 0, 0], sizes = [16, 16, 128], strides = [1, 1, 1]} : vector<18x16x128xf32> to vector<16x16x128xf32>
    %45 = vector.extract_strided_slice %33 {offsets = [1, 0, 0], sizes = [16, 16, 128], strides = [1, 1, 1]} : vector<18x16x128xf32> to vector<16x16x128xf32>
    %46 = vector.extract_strided_slice %21 {offsets = [1, 0, 0], sizes = [16, 16, 128], strides = [1, 1, 1]} : vector<18x16x128xf32> to vector<16x16x128xf32>
    %47 = vector.extract_strided_slice %41 {offsets = [1, 0, 0], sizes = [16, 16, 128], strides = [1, 1, 1]} : vector<18x16x128xf32> to vector<16x16x128xf32>
    %48 = vector.extract_strided_slice %33 {offsets = [2, 0, 0], sizes = [16, 16, 128], strides = [1, 1, 1]} : vector<18x16x128xf32> to vector<16x16x128xf32>
    %49 = vector.extract_strided_slice %21 {offsets = [2, 0, 0], sizes = [16, 16, 128], strides = [1, 1, 1]} : vector<18x16x128xf32> to vector<16x16x128xf32>
    %50 = vector.extract_strided_slice %41 {offsets = [2, 0, 0], sizes = [16, 16, 128], strides = [1, 1, 1]} : vector<18x16x128xf32> to vector<16x16x128xf32>
    %51 = tpu.concatenate %42, %43, %44, %45, %46, %47, %48, %49, %50 in 2 : vector<16x16x128xf32>, vector<16x16x128xf32>, vector<16x16x128xf32>, vector<16x16x128xf32>, vector<16x16x128xf32>, vector<16x16x128xf32>, vector<16x16x128xf32>, vector<16x16x128xf32>, vector<16x16x128xf32> -> vector<16x16x1152xf32>
    "tpu.trace_start"() <{level = 10 : i32, message = "swk,ko->swo"}> : () -> ()
    %cst_25 = arith.constant dense<0.000000e+00> : vector<16x16x128xf32>
    %52 = tpu.matmul %51, %22, %cst_25 {dimension_numbers = #tpu.dot_dimension_numbers<[2], [0], [0, 1], [1], [0, 0, 0, 1, 1, 1], [], []>} : vector<16x16x1152xf32>, vector<1152x128xf32>, vector<16x16x128xf32> -> vector<16x16x128xf32>
    "tpu.trace_stop"() : () -> ()
    %c1_i32_26 = arith.constant 1 : i32
    %53 = arith.addi %19, %c1_i32_26 : i32
    %54 = arith.index_cast %53 : i32 to index
    %c0_27 = arith.constant 0 : index
    %c0_28 = arith.constant 0 : index
    %55 = vector.load %arg6[%54, %c0_27, %c0_28] : memref<18x16x128xf32, #tpu.memory_space<vmem>>, vector<16x16x128xf32>
    tpu.vector_store %arg6[%54, %c0_27, %c0_28], %52 {strides = array<i32>} : memref<18x16x128xf32, #tpu.memory_space<vmem>>, vector<16x16x128xf32>,
    %c0_29 = arith.constant 0 : index
    %c0_30 = arith.constant 0 : index
    %c0_31 = arith.constant 0 : index
    %56 = vector.load %arg7[%c0_29, %c0_30, %c0_31] : memref<1x1x128xf32, #tpu.memory_space<vmem>>, vector<1x1x128xf32>
    %cst_32 = arith.constant dense<0.000000e+00> : vector<128xf32>
    %57 = vector.multi_reduction <add>, %52, %cst_32 [0, 1] : vector<16x16x128xf32> to vector<128xf32>
    %58 = vector.shape_cast %57 : vector<128xf32> to vector<1x1x128xf32>
    %59 = arith.addf %56, %58 : vector<1x1x128xf32>
    %c0_33 = arith.constant 0 : index
    %c0_34 = arith.constant 0 : index
    %c0_35 = arith.constant 0 : index
    %60 = vector.load %arg7[%c0_33, %c0_34, %c0_35] : memref<1x1x128xf32, #tpu.memory_space<vmem>>, vector<1x1x128xf32>
    tpu.vector_store %arg7[%c0_33, %c0_34, %c0_35], %59 {strides = array<i32>} : memref<1x1x128xf32, #tpu.memory_space<vmem>>, vector<1x1x128xf32>,
    %c0_36 = arith.constant 0 : index
    %c0_37 = arith.constant 0 : index
    %c0_38 = arith.constant 0 : index
    %61 = vector.load %arg8[%c0_36, %c0_37, %c0_38] : memref<1x1x128xf32, #tpu.memory_space<vmem>>, vector<1x1x128xf32>
    %62 = arith.mulf %52, %52 : vector<16x16x128xf32>
    %cst_39 = arith.constant dense<0.000000e+00> : vector<128xf32>
    %63 = vector.multi_reduction <add>, %62, %cst_39 [0, 1] : vector<16x16x128xf32> to vector<128xf32>
    %64 = vector.shape_cast %63 : vector<128xf32> to vector<1x1x128xf32>
    %65 = arith.addf %61, %64 : vector<1x1x128xf32>
    %c0_40 = arith.constant 0 : index
    %c0_41 = arith.constant 0 : index
    %c0_42 = arith.constant 0 : index
    %66 = vector.load %arg8[%c0_40, %c0_41, %c0_42] : memref<1x1x128xf32, #tpu.memory_space<vmem>>, vector<1x1x128xf32>
    tpu.vector_store %arg8[%c0_40, %c0_41, %c0_42], %65 {strides = array<i32>} : memref<1x1x128xf32, #tpu.memory_space<vmem>>, vector<1x1x128xf32>,
    %c1_i32_43 = arith.constant 1 : i32
    %c0_44 = arith.constant 0 : index
    %c0_45 = arith.constant 0 : index
    %c0_46 = arith.constant 0 : index
    %67 = vector.load %arg7[%c0_44, %c0_45, %c0_46] : memref<1x1x128xf32, #tpu.memory_space<vmem>>, vector<1x1x128xf32>
    %cst_47 = arith.constant 3.906250e-03 : f32
    %68 = vector.broadcast %cst_47 : f32 to vector<1x1x128xf32>
    %69 = arith.mulf %67, %68 : vector<1x1x128xf32>
    %c0_48 = arith.constant 0 : index
    %c0_49 = arith.constant 0 : index
    %c0_50 = arith.constant 0 : index
    %70 = vector.load %arg8[%c0_48, %c0_49, %c0_50] : memref<1x1x128xf32, #tpu.memory_space<vmem>>, vector<1x1x128xf32>
    %cst_51 = arith.constant 3.906250e-03 : f32
    %71 = vector.broadcast %cst_51 : f32 to vector<1x1x128xf32>
    %72 = arith.mulf %70, %71 : vector<1x1x128xf32>
    %73 = arith.mulf %69, %69 : vector<1x1x128xf32>
    %74 = arith.subf %72, %73 : vector<1x1x128xf32>
    %cst_52 = arith.constant 0.000000e+00 : f32
    %75 = vector.broadcast %cst_52 : f32 to vector<1x1x128xf32>
    %76 = arith.maximumf %74, %75 : vector<1x1x128xf32>
    %cst_53 = arith.constant 9.99999974E-6 : f32
    %77 = vector.broadcast %cst_53 : f32 to vector<1x1x128xf32>
    %78 = arith.addf %76, %77 : vector<1x1x128xf32>
    %79 = math.rsqrt %78 : vector<1x1x128xf32>
    %80 = arith.mulf %69, %79 : vector<1x1x128xf32>
    %c1_54 = arith.constant 1 : index
    %c0_55 = arith.constant 0 : index
    %c0_56 = arith.constant 0 : index
    %81 = vector.load %arg6[%c1_54, %c0_55, %c0_56] : memref<18x16x128xf32, #tpu.memory_space<vmem>>, vector<16x16x128xf32>
    %82 = vector.broadcast %79 : vector<1x1x128xf32> to vector<16x16x128xf32>
    %83 = arith.mulf %81, %82 : vector<16x16x128xf32>
    %84 = vector.broadcast %80 : vector<1x1x128xf32> to vector<16x16x128xf32>
    %85 = arith.subf %83, %84 : vector<16x16x128xf32>
    %cst_57 = arith.constant 0.000000e+00 : f32
    %86 = vector.broadcast %cst_57 : f32 to vector<16x16x128xf32>
    %87 = arith.maximumf %85, %86 : vector<16x16x128xf32>
    %c1_58 = arith.constant 1 : index
    %c0_59 = arith.constant 0 : index
    %c0_60 = arith.constant 0 : index
    %88 = vector.load %arg6[%c1_58, %c0_59, %c0_60] : memref<18x16x128xf32, #tpu.memory_space<vmem>>, vector<16x16x128xf32>
    tpu.vector_store %arg6[%c1_58, %c0_59, %c0_60], %87 {strides = array<i32>} : memref<18x16x128xf32, #tpu.memory_space<vmem>>, vector<16x16x128xf32>,
    %c2 = arith.constant 2 : index
    %c0_61 = arith.constant 0 : index
    %c0_62 = arith.constant 0 : index
    %89 = vector.load %arg6[%c2, %c0_61, %c0_62] : memref<18x16x128xf32, #tpu.memory_space<vmem>>, vector<1x16x128xf32>
    %90 = vector.shape_cast %89 : vector<1x16x128xf32> to vector<16x128xf32>
    %c0_63 = arith.constant 0 : index
    %c0_64 = arith.constant 0 : index
    %c0_65 = arith.constant 0 : index
    %91 = vector.load %arg6[%c0_63, %c0_64, %c0_65] : memref<18x16x128xf32, #tpu.memory_space<vmem>>, vector<1x16x128xf32>
    %92 = vector.shape_cast %91 : vector<1x16x128xf32> to vector<16x128xf32>
    %93 = vector.shape_cast %90 : vector<16x128xf32> to vector<1x16x128xf32>
    tpu.vector_store %arg6[%c0_63, %c0_64, %c0_65], %93 {strides = array<i32>} : memref<18x16x128xf32, #tpu.memory_space<vmem>>, vector<1x16x128xf32>,
    %c15 = arith.constant 15 : index
    %c0_66 = arith.constant 0 : index
    %c0_67 = arith.constant 0 : index
    %94 = vector.load %arg6[%c15, %c0_66, %c0_67] : memref<18x16x128xf32, #tpu.memory_space<vmem>>, vector<1x16x128xf32>
    %95 = vector.shape_cast %94 : vector<1x16x128xf32> to vector<16x128xf32>
    %c17_68 = arith.constant 17 : index
    %c0_69 = arith.constant 0 : index
    %c0_70 = arith.constant 0 : index
    %96 = vector.load %arg6[%c17_68, %c0_69, %c0_70] : memref<18x16x128xf32, #tpu.memory_space<vmem>>, vector<1x16x128xf32>
    %97 = vector.shape_cast %96 : vector<1x16x128xf32> to vector<16x128xf32>
    %98 = vector.shape_cast %95 : vector<16x128xf32> to vector<1x16x128xf32>
    tpu.vector_store %arg6[%c17_68, %c0_69, %c0_70], %98 {strides = array<i32>} : memref<18x16x128xf32, #tpu.memory_space<vmem>>, vector<1x16x128xf32>,
    %cst_71 = arith.constant 0.000000e+00 : f32
    %99 = vector.broadcast %cst_71 : f32 to vector<1x1x128xf32>
    %c0_72 = arith.constant 0 : index
    %c0_73 = arith.constant 0 : index
    %c0_74 = arith.constant 0 : index
    %100 = vector.load %arg7[%c0_72, %c0_73, %c0_74] : memref<1x1x128xf32, #tpu.memory_space<vmem>>, vector<1x1x128xf32>
    tpu.vector_store %arg7[%c0_72, %c0_73, %c0_74], %99 {strides = array<i32>} : memref<1x1x128xf32, #tpu.memory_space<vmem>>, vector<1x1x128xf32>,
    %cst_75 = arith.constant 0.000000e+00 : f32
    %101 = vector.broadcast %cst_75 : f32 to vector<1x1x128xf32>
    %c0_76 = arith.constant 0 : index
    %c0_77 = arith.constant 0 : index
    %c0_78 = arith.constant 0 : index
    %102 = vector.load %arg8[%c0_76, %c0_77, %c0_78] : memref<1x1x128xf32, #tpu.memory_space<vmem>>, vector<1x1x128xf32>
    tpu.vector_store %arg8[%c0_76, %c0_77, %c0_78], %101 {strides = array<i32>} : memref<1x1x128xf32, #tpu.memory_space<vmem>>, vector<1x1x128xf32>,
    %c0_i32_79 = arith.constant 0 : i32
    %c1_i32_80 = arith.constant 1 : i32
    %103 = arith.muli %c0_i32_79, %c1_i32_80 : i32
    %c0_i32_81 = arith.constant 0 : i32
    %104 = arith.addi %c0_i32_81, %103 : i32
    %c16_i32_82 = arith.constant 16 : i32
    %105 = arith.muli %104, %c16_i32_82 : i32
    %106 = arith.index_cast %105 : i32 to index
    %c0_83 = arith.constant 0 : index
    %c0_84 = arith.constant 0 : index
    %107 = vector.load %arg6[%106, %c0_83, %c0_84] : memref<18x16x128xf32, #tpu.memory_space<vmem>>, vector<18x16x128xf32>
    %c0_85 = arith.constant 0 : index
    %c0_86 = arith.constant 0 : index
    %108 = vector.load %arg3[%c0_85, %c0_86] : memref<1152x128xf32, #tpu.memory_space<vmem>>, vector<1152x128xf32>
    %c1_i32_87 = arith.constant 1 : i32
    %109 = tpu.dynamic_rotate %107 by %c1_i32_87 dim 1 : vector<18x16x128xf32>, i32 -> vector<18x16x128xf32>
    %c15_i32_88 = arith.constant 15 : i32
    %110 = tpu.dynamic_rotate %107 by %c15_i32_88 dim 1 : vector<18x16x128xf32>, i32 -> vector<18x16x128xf32>
    %111 = tpu.iota {dimensions = array<i32: 1>} : vector<1x16x1xi32>
    %c0_i32_89 = arith.constant 0 : i32
    %112 = vector.broadcast %c0_i32_89 : i32 to vector<1x16x1xi32>
    %113 = arith.cmpi eq, %111, %112 : vector<1x16x1xi32>
    %114 = vector.extract_strided_slice %107 {offsets = [0, 1, 0], sizes = [18, 1, 128], strides = [1, 1, 1]} : vector<18x16x128xf32> to vector<18x1x128xf32>
    %115 = vector.shape_cast %113 : vector<1x16x1xi1> to vector<1x16x1xi1>
    %116 = vector.broadcast %115 : vector<1x16x1xi1> to vector<18x16x128xi1>
    %117 = vector.shape_cast %114 : vector<18x1x128xf32> to vector<18x1x128xf32>
    %118 = vector.broadcast %117 : vector<18x1x128xf32> to vector<18x16x128xf32>
    %119 = arith.select %116, %118, %109 : vector<18x16x128xi1>, vector<18x16x128xf32>
    %c15_i32_90 = arith.constant 15 : i32
    %120 = vector.broadcast %c15_i32_90 : i32 to vector<1x16x1xi32>
    %121 = arith.cmpi eq, %111, %120 : vector<1x16x1xi32>
    %122 = vector.extract_strided_slice %107 {offsets = [0, 14, 0], sizes = [18, 1, 128], strides = [1, 1, 1]} : vector<18x16x128xf32> to vector<18x1x128xf32>
    %123 = vector.shape_cast %121 : vector<1x16x1xi1> to vector<1x16x1xi1>
    %124 = vector.broadcast %123 : vector<1x16x1xi1> to vector<18x16x128xi1>
    %125 = vector.shape_cast %122 : vector<18x1x128xf32> to vector<18x1x128xf32>
    %126 = vector.broadcast %125 : vector<18x1x128xf32> to vector<18x16x128xf32>
    %127 = arith.select %124, %126, %110 : vector<18x16x128xi1>, vector<18x16x128xf32>
    %128 = vector.extract_strided_slice %119 {offsets = [0, 0, 0], sizes = [16, 16, 128], strides = [1, 1, 1]} : vector<18x16x128xf32> to vector<16x16x128xf32>
    %129 = vector.extract_strided_slice %107 {offsets = [0, 0, 0], sizes = [16, 16, 128], strides = [1, 1, 1]} : vector<18x16x128xf32> to vector<16x16x128xf32>
    %130 = vector.extract_strided_slice %127 {offsets = [0, 0, 0], sizes = [16, 16, 128], strides = [1, 1, 1]} : vector<18x16x128xf32> to vector<16x16x128xf32>
    %131 = vector.extract_strided_slice %119 {offsets = [1, 0, 0], sizes = [16, 16, 128], strides = [1, 1, 1]} : vector<18x16x128xf32> to vector<16x16x128xf32>
    %132 = vector.extract_strided_slice %107 {offsets = [1, 0, 0], sizes = [16, 16, 128], strides = [1, 1, 1]} : vector<18x16x128xf32> to vector<16x16x128xf32>
    %133 = vector.extract_strided_slice %127 {offsets = [1, 0, 0], sizes = [16, 16, 128], strides = [1, 1, 1]} : vector<18x16x128xf32> to vector<16x16x128xf32>
    %134 = vector.extract_strided_slice %119 {offsets = [2, 0, 0], sizes = [16, 16, 128], strides = [1, 1, 1]} : vector<18x16x128xf32> to vector<16x16x128xf32>
    %135 = vector.extract_strided_slice %107 {offsets = [2, 0, 0], sizes = [16, 16, 128], strides = [1, 1, 1]} : vector<18x16x128xf32> to vector<16x16x128xf32>
    %136 = vector.extract_strided_slice %127 {offsets = [2, 0, 0], sizes = [16, 16, 128], strides = [1, 1, 1]} : vector<18x16x128xf32> to vector<16x16x128xf32>
    %137 = tpu.concatenate %128, %129, %130, %131, %132, %133, %134, %135, %136 in 2 : vector<16x16x128xf32>, vector<16x16x128xf32>, vector<16x16x128xf32>, vector<16x16x128xf32>, vector<16x16x128xf32>, vector<16x16x128xf32>, vector<16x16x128xf32>, vector<16x16x128xf32>, vector<16x16x128xf32> -> vector<16x16x1152xf32>
    "tpu.trace_start"() <{level = 10 : i32, message = "swk,ko->swo"}> : () -> ()
    %cst_91 = arith.constant dense<0.000000e+00> : vector<16x16x128xf32>
    %138 = tpu.matmul %137, %108, %cst_91 {dimension_numbers = #tpu.dot_dimension_numbers<[2], [0], [0, 1], [1], [0, 0, 0, 1, 1, 1], [], []>} : vector<16x16x1152xf32>, vector<1152x128xf32>, vector<16x16x128xf32> -> vector<16x16x128xf32>
    "tpu.trace_stop"() : () -> ()
    %139 = arith.index_cast %105 : i32 to index
    %c0_92 = arith.constant 0 : index
    %c0_93 = arith.constant 0 : index
    %140 = vector.load %arg6[%139, %c0_92, %c0_93] : memref<18x16x128xf32, #tpu.memory_space<vmem>>, vector<16x16x128xf32>
    tpu.vector_store %arg6[%139, %c0_92, %c0_93], %138 {strides = array<i32>} : memref<18x16x128xf32, #tpu.memory_space<vmem>>, vector<16x16x128xf32>,
    %c0_94 = arith.constant 0 : index
    %c0_95 = arith.constant 0 : index
    %c0_96 = arith.constant 0 : index
    %141 = vector.load %arg7[%c0_94, %c0_95, %c0_96] : memref<1x1x128xf32, #tpu.memory_space<vmem>>, vector<1x1x128xf32>
    %cst_97 = arith.constant dense<0.000000e+00> : vector<128xf32>
    %142 = vector.multi_reduction <add>, %138, %cst_97 [0, 1] : vector<16x16x128xf32> to vector<128xf32>
    %143 = vector.shape_cast %142 : vector<128xf32> to vector<1x1x128xf32>
    %144 = arith.addf %141, %143 : vector<1x1x128xf32>
    %c0_98 = arith.constant 0 : index
    %c0_99 = arith.constant 0 : index
    %c0_100 = arith.constant 0 : index
    %145 = vector.load %arg7[%c0_98, %c0_99, %c0_100] : memref<1x1x128xf32, #tpu.memory_space<vmem>>, vector<1x1x128xf32>
    tpu.vector_store %arg7[%c0_98, %c0_99, %c0_100], %144 {strides = array<i32>} : memref<1x1x128xf32, #tpu.memory_space<vmem>>, vector<1x1x128xf32>,
    %c0_101 = arith.constant 0 : index
    %c0_102 = arith.constant 0 : index
    %c0_103 = arith.constant 0 : index
    %146 = vector.load %arg8[%c0_101, %c0_102, %c0_103] : memref<1x1x128xf32, #tpu.memory_space<vmem>>, vector<1x1x128xf32>
    %147 = arith.mulf %138, %138 : vector<16x16x128xf32>
    %cst_104 = arith.constant dense<0.000000e+00> : vector<128xf32>
    %148 = vector.multi_reduction <add>, %147, %cst_104 [0, 1] : vector<16x16x128xf32> to vector<128xf32>
    %149 = vector.shape_cast %148 : vector<128xf32> to vector<1x1x128xf32>
    %150 = arith.addf %146, %149 : vector<1x1x128xf32>
    %c0_105 = arith.constant 0 : index
    %c0_106 = arith.constant 0 : index
    %c0_107 = arith.constant 0 : index
    %151 = vector.load %arg8[%c0_105, %c0_106, %c0_107] : memref<1x1x128xf32, #tpu.memory_space<vmem>>, vector<1x1x128xf32>
    tpu.vector_store %arg8[%c0_105, %c0_106, %c0_107], %150 {strides = array<i32>} : memref<1x1x128xf32, #tpu.memory_space<vmem>>, vector<1x1x128xf32>,
    %c1_i32_108 = arith.constant 1 : i32
    %c0_109 = arith.constant 0 : index
    %c0_110 = arith.constant 0 : index
    %c0_111 = arith.constant 0 : index
    %152 = vector.load %arg7[%c0_109, %c0_110, %c0_111] : memref<1x1x128xf32, #tpu.memory_space<vmem>>, vector<1x1x128xf32>
    %cst_112 = arith.constant 3.906250e-03 : f32
    %153 = vector.broadcast %cst_112 : f32 to vector<1x1x128xf32>
    %154 = arith.mulf %152, %153 : vector<1x1x128xf32>
    %c0_113 = arith.constant 0 : index
    %c0_114 = arith.constant 0 : index
    %c0_115 = arith.constant 0 : index
    %155 = vector.load %arg8[%c0_113, %c0_114, %c0_115] : memref<1x1x128xf32, #tpu.memory_space<vmem>>, vector<1x1x128xf32>
    %cst_116 = arith.constant 3.906250e-03 : f32
    %156 = vector.broadcast %cst_116 : f32 to vector<1x1x128xf32>
    %157 = arith.mulf %155, %156 : vector<1x1x128xf32>
    %158 = arith.mulf %154, %154 : vector<1x1x128xf32>
    %159 = arith.subf %157, %158 : vector<1x1x128xf32>
    %cst_117 = arith.constant 0.000000e+00 : f32
    %160 = vector.broadcast %cst_117 : f32 to vector<1x1x128xf32>
    %161 = arith.maximumf %159, %160 : vector<1x1x128xf32>
    %cst_118 = arith.constant 9.99999974E-6 : f32
    %162 = vector.broadcast %cst_118 : f32 to vector<1x1x128xf32>
    %163 = arith.addf %161, %162 : vector<1x1x128xf32>
    %164 = math.rsqrt %163 : vector<1x1x128xf32>
    %165 = arith.mulf %154, %164 : vector<1x1x128xf32>
    %c0_119 = arith.constant 0 : index
    %c0_120 = arith.constant 0 : index
    %c0_121 = arith.constant 0 : index
    %c0_122 = arith.constant 0 : index
    %166 = vector.load %arg1[%c0_119, %c0_120, %c0_121, %c0_122] : memref<1x16x16x128xf32, #tpu.memory_space<vmem>>, vector<1x16x16x128xf32>
    %167 = vector.shape_cast %166 : vector<1x16x16x128xf32> to vector<16x16x128xf32>
    %c0_123 = arith.constant 0 : index
    %c0_124 = arith.constant 0 : index
    %c0_125 = arith.constant 0 : index
    %168 = vector.load %arg6[%c0_123, %c0_124, %c0_125] : memref<18x16x128xf32, #tpu.memory_space<vmem>>, vector<16x16x128xf32>
    %169 = vector.broadcast %164 : vector<1x1x128xf32> to vector<16x16x128xf32>
    %170 = arith.mulf %168, %169 : vector<16x16x128xf32>
    %171 = arith.addf %167, %170 : vector<16x16x128xf32>
    %172 = vector.broadcast %165 : vector<1x1x128xf32> to vector<16x16x128xf32>
    %173 = arith.subf %171, %172 : vector<16x16x128xf32>
    %c0_126 = arith.constant 0 : index
    %c0_127 = arith.constant 0 : index
    %c0_128 = arith.constant 0 : index
    %c0_129 = arith.constant 0 : index
    %174 = vector.load %arg4[%c0_126, %c0_127, %c0_128, %c0_129] : memref<1x16x16x128xf32, #tpu.memory_space<vmem>>, vector<1x16x16x128xf32>
    %175 = vector.shape_cast %174 : vector<1x16x16x128xf32> to vector<16x16x128xf32>
    %176 = vector.shape_cast %173 : vector<16x16x128xf32> to vector<1x16x16x128xf32>
    tpu.vector_store %arg4[%c0_126, %c0_127, %c0_128, %c0_129], %176 {strides = array<i32>} : memref<1x16x16x128xf32, #tpu.memory_space<vmem>>, vector<1x16x16x128xf32>,
    return
  }
  func.func @transform_0(%arg0: i32) -> (i32, i32, i32, i32) {
    %c0_i32 = arith.constant 0 : i32
    %c0_i32_0 = arith.constant 0 : i32
    %c0_i32_1 = arith.constant 0 : i32
    %c0_i32_2 = arith.constant 0 : i32
    return %arg0, %c0_i32, %c0_i32_0, %c0_i32_1 : i32, i32, i32, i32
  }
  func.func @transform_1(%arg0: i32) -> (i32, i32) {
    %c0_i32 = arith.constant 0 : i32
    %c0_i32_0 = arith.constant 0 : i32
    %c0_i32_1 = arith.constant 0 : i32
    return %c0_i32, %c0_i32_0 : i32, i32
  }
  func.func @transform_2(%arg0: i32) -> (i32, i32) {
    %c0_i32 = arith.constant 0 : i32
    %c0_i32_0 = arith.constant 0 : i32
    %c0_i32_1 = arith.constant 0 : i32
    return %c0_i32, %c0_i32_0 : i32, i32
  }
  func.func @transform_3(%arg0: i32) -> (i32, i32, i32, i32) {
    %c0_i32 = arith.constant 0 : i32
    %c0_i32_0 = arith.constant 0 : i32
    %c0_i32_1 = arith.constant 0 : i32
    %c0_i32_2 = arith.constant 0 : i32
    return %arg0, %c0_i32, %c0_i32_0, %c0_i32_1 : i32, i32, i32, i32
  }
}

</mosaic_0001>

<bundles_post_ra>
// kernel: tpu_custom_call.1
= control target key start
LH: loop header
LB: loop body
LE: loop exit
PB: predicated region body
PF: predicated region fallthrough
CT: control target
= control target key end

     0   :  { %8 = vsyncpa [#allocation7], 0  ;;  %s8125_s0 = inlined_call_operand.hbm [shape: f32[2,16,16,128], index: 0, kind: input, shape index: {}]   ;;  %s8126_s1 = inlined_call_operand.hbm [shape: f32[1152,128], index: 1, kind: input, shape index: {}]   ;;  %s8127_s2 = inlined_call_operand.hbm [shape: f32[1152,128], index: 2, kind: input, shape index: {}]   ;;  %s8128_s3 = inlined_call_operand.hbm [shape: f32[2,16,16,128], index: 3, kind: output, shape index: {}]  }
   0x1   :  { %10 = vsyncpa [#allocation7 + $0x1], 0 }
   0x2   :  { %11 = vsyncpa [#allocation10], 0 }
   0x3   :  { %12 = vsyncpa [#allocation8], 0 }
   0x4   :  { %14 = vsyncpa [#allocation8 + $0x1], 0  ;;  %s4983_s12 = smov 0   ;;  %s4985_s13 = smov 0  }
   0x5   :  { %s4987_s14 = smov 0   ;;  %s4989_s15 = smov 0  }
   0x6 LB: > { %s5004_s16 = sadd.s32 4294967295, %s4952_s15   ;;  %s4441_s17 = sadd.s32 4294967294, %s4952_s15   ;;  %s4952_s15 = sphi %s4989_s15, %s8451_s15   ;;  %s4948_s14 = sphi %s4987_s14, %s8450_s14   ;;  %s4944_s13 = sphi %s4985_s13, %s8449_s13   ;;  %s4940_s12 = sphi %s4983_s12, %s8448_s12  }
   0x7   : > { %p40_p0 = scmp.ne.s32.totalorder %s4944_s13, %s4940_s12  ;;  %p8129_p1 = scmp.eq.s32.totalorder %s5004_s16, 0 }
   0x8   : > { %p106_p2 = scmp.eq.s32.totalorder %s5004_s16, 1  ;;  %p112_p3 = scmp.eq.s32.totalorder %s4441_s17, 1 }
   0x9   : > { %p5013_p4 = por %p8129_p1, %p40_p0  ;;  %p4442_p5 = scmp.ge.s32.totalorder %s4952_s15, 1 }
   0xa   : > { %p5018_p6 = por %p112_p3, %p40_p0  ;;  %p119_p7 = scmp.lt.s32.totalorder %s4952_s15, 3 }
   0xb   : > { %s8265_s18 = scalar_select %p5013_p4, 1, 0 }
   0xc   : > { %s8266_s19 = scalar_select %p5018_p6, 1, 0 }
   0xd   : > { %p5023_p8 = pnand %p4442_p5, %p119_p7  ;;  %s4954_s21 = smov [#allocation9]  }
   0xe   : > { %s131_s22 = sshll.u32 %s4954_s21, 4  ;;  %s4955_s24 = smov [#allocation11]   ;;  %s132_s22 = int_to_ptr.vmem [resolvable:$true] %s131_s22 }
   0xf   : > { %s8267_s20 = scalar_select %p5023_p8, 1, 0 }
  0x10   : > { %p4729_p9 = pneg %p5023_p8  ;;  %s144_s25 = sshll.u32 %s4955_s24, 4  ;;  %s145_s25 = int_to_ptr.vmem [resolvable:$true] %s144_s25 }
  0x11   : > { %s4815_s26 = scalar_lea.vmem %s132_s22, 18432  ;;  %p4823_p5 = scmp.lt.s32.totalorder %s132_s22, %s132_s22 }
  0x12   : > { %p5032_p11 = pnand %p4729_p9, %p8129_p1  ;;  %p4816_p13 = scmp.ne.s32.totalorder %s132_s22, %s4815_s26 }
  0x13   : > { %p4824_p7 = scmp.lt.s32.totalorder %s4815_s26, %s4815_s26 }
  0x14   : > { %p4806_p12 = pneg %p5032_p11 }
  0x15   : > { %p4825_p10 = por %p4824_p7, %p4823_p5 }
  0x16   : > { %p4818_p0 = pnand %p4816_p13, %p4806_p12 }
  0x18   : > { %p4819_p3 = pneg %p4818_p0 }
  0x1a   : > { %p4826_p9 = pnand %p4825_p10, %p4819_p3 }
  0x1c   : > { %4829 = shalt.err (!%p4826_p9)
}
  0x1d   : > { %s4956_s27 = smov 128   ;;  %s4957_s28 = smov 8  }
  0x1e   : > { %4732 = dma.hbm_to_vmem [thread:$0]  (!%p5032_p11), %s8126_s1, 18432, %s132_s22, [#allocation10], %s4956_s27, %s4956_s27, %s4957_s28  }
  0x1f   : > { %s4841_s4 = scalar_lea.vmem %s145_s25, 18432  ;;  %p4849_p10 = scmp.lt.s32.totalorder %s145_s25, %s145_s25 }
  0x20   : > { %p4842_p13 = scmp.ne.s32.totalorder %s145_s25, %s4841_s4  ;;  %p4850_p3 = scmp.lt.s32.totalorder %s4841_s4, %s4841_s4 }
  0x22   : > { %p4844_p0 = pnand %p4842_p13, %p4806_p12  ;;  %p4851_p7 = por %p4850_p3, %p4849_p10 }
  0x24   : > { %p4845_p5 = pneg %p4844_p0 }
  0x26   : > { %p4852_p9 = pnand %p4851_p7, %p4845_p5 }
  0x28   : > { %4855 = shalt.err (!%p4852_p9)
}
  0x29   : > { %4735 = dma.hbm_to_vmem [thread:$0]  (!%p5032_p11), %s8127_s2, 18432, %s145_s25, [#allocation10], %s4956_s27, %s4956_s27, %s4957_s28  }
  0x2a   : > { %s5061_s7 = sadd.s32 1, %s4952_s15   ;;  %s27_s8 = sadd.s32 1, %s4948_s14 }
  0x2b   : > { %s24_s9 = ssub.s32 %s4952_s15, %s5061_s7  ;;  %p34_p12 = scmp.ne.s32.totalorder %s4948_s14, %s4944_s13 }
  0x2c   : > { %p25_p13 = scmp.eq.s32.totalorder %s24_s9, 0  ;;  %p35_p0 = scmp.eq.s32.totalorder %s4952_s15, 0 }
  0x2d   : > { %p5071_p5 = por %p106_p2, %p34_p12  ;;  %p4746_p10 = scmp.lt.s32.totalorder %s4952_s15, 2 }
  0x2e   : > { %s5077_s11 = scalar_select %p25_p13, %s4948_s14, %s27_s8  }
  0x2f   : > { %s8269_s10 = scalar_select %p5071_p5, 1, 0 }
  0x30   : > { %p36_p3 = por %p35_p0, %p34_p12  ;;  %s158_s17 = sand.u32 1, %s4948_s14  }
  0x31   : > { %s4446_s21 = sshll.u32 %s158_s17, 8  ;;  %s4459_s22 = sshll.u32 %s4952_s15, 12 }
  0x32   : > { %s5084_s25 = scalar_lea.hbm %s8125_s0, %s4459_s22  ;;  %s162_s26 = scalar_lea.vmem [#allocation6], %s4446_s21 }
  0x33   : > { %s169_s29 = sshll.u32 %s162_s26, 4  ;;  %p5088_p2 = pnand %p4746_p10, %p36_p3  ;;  %s5086_s29 = int_to_ptr.vmem [resolvable:$true] %s169_s29 }
  0x34   : > { %s5092_s4 = scalar_lea.sflag [#allocation7], %s158_s17  ;;  %s4856_s5 = scalar_lea.hbm %s5084_s25, 4096 }
  0x35   : > { %p4857_p11 = scmp.ne.s32.totalorder %s5084_s25, %s4856_s5  ;;  %p4858_p7 = pneg %p5088_p2 }
  0x36   : > { %s4861_s9 = scalar_lea.hbm %s8125_s0, 8192  ;;  %p4862_p13 = scmp.lt.s32.totalorder %s5084_s25, %s8125_s0 }
  0x37   : > { %p4859_p9 = pnand %p4858_p7, %p4857_p11  ;;  %p4863_p0 = scmp.lt.s32.totalorder %s4861_s9, %s4856_s5 }
  0x39   : > { %p4860_p12 = pneg %p4859_p9  ;;  %p4864_p10 = por %p4863_p0, %p4862_p13 }
  0x3b   : > { %p4865_p3 = pnand %p4864_p10, %p4860_p12 }
  0x3d   : > { %4868 = shalt.err (!%p4865_p3)
}
  0x3e   : > { %s4869_s17 = scalar_lea.vmem %s5086_s29, 4096  ;;  %s4958_s23 = smov [#allocation6]  }
  0x3f   : > { %p4870_p1 = scmp.ne.s32.totalorder %s5086_s29, %s4869_s17  ;;  %s4874_s24 = sshll.u32 %s4958_s23, 4  ;;  %s4875_s24 = int_to_ptr.vmem [resolvable:$false] %s4874_s24 }
  0x40   : > { %s4876_s26 = scalar_lea.vmem %s4875_s24, 8192  ;;  %p4877_p9 = scmp.lt.s32.totalorder %s5086_s29, %s4875_s24 }
  0x41   : > { %p4872_p6 = pnand %p4870_p1, %p4858_p7  ;;  %p4878_p5 = scmp.lt.s32.totalorder %s4876_s26, %s4869_s17 }
  0x43   : > { %p4873_p11 = pneg %p4872_p6  ;;  %p4879_p4 = por %p4878_p5, %p4877_p9 }
  0x45   : > { %p4880_p8 = pnand %p4879_p4, %p4873_p11 }
  0x47   : > { %4883 = shalt.err (!%p4880_p8)
}
  0x48   : > { %4739 = dma.hbm_to_vmem [thread:$0]  (!%p5088_p2), %s5084_s25, 4096, %s5086_s29, %s5092_s4, %s4956_s27, %s4956_s27, %s4957_s28  }
  0x49   : > { %p8271_p1 = scmp.ne.s32.totalorder %s8267_s20, 0 }
  0x4b   : > { %181 = sbr.rel (%p8271_p1) target bundleno = 1344 (0x540), region = 32 }
  0x50   : > { %s5119_s5 = sand.u32 1, %s4944_s13   ;;  %p8272_p4 = scmp.ne.s32.totalorder %s8265_s18, 0 }
  0x51   : > { %s4450_s6 = sshll.u32 %s5119_s5, 8  ;;  %s184_s8 = scalar_lea.sflag [#allocation7], %s5119_s5 }
  0x52   : > { %s5125_s30 = scalar_lea.vmem [#allocation6], %s4450_s6 }
  0x53   : > { %4927 = dma.done.wait (%p8272_p4), %s184_s8, 4096  }
  0x54   : > { %4929 = vsyncadd (%p8272_p4), %s184_s8, 4294963200  ;;  %p8273_p6 = scmp.eq.s32.totalorder %s5004_s16, 0 }
  0x56   : > { %4931 = dma.done.wait (%p8273_p6), [#allocation10], 36864   ;;  %p8274_p8 = pmov %p8273_p6 }
  0x57   : > { %v8142_v0 = vmov 0.0   ;;  %v341_v1 = vld [vmem:[#allocation9 + $0x78] sm:$0xff]  ;;  %v340_v3 = vld [vmem:[#allocation9 + $0x70] sm:$0xff]  ;;  %v339_v5 = vld [vmem:[#allocation9 + $0x68] sm:$0xff]  ;;  %v506_v49 = vlaneseq  ;;  %s7940_s18 = scalar_lea.vmem [#allocation12], %s4450_s6  ;;  %s4460_s20 = sshll.u32 %s5004_s16, 12 }
  0x58   : > { %4933 = vsyncadd (%p8274_p8), [#allocation10], 4294930432  ;;  %847 = vmatprep.subr.mxu0 %v8142_v0  ;;  %288 = vst [vmem:[#allocation4] sm:$0x1] %v8142_v0  ;;  %1072 = vmatprep.subr.mxu1 %v8142_v0  ;;  %v373_v2 = vld [vmem:[#allocation9 + $0x178] sm:$0xff]  ;;  %v372_v4 = vld [vmem:[#allocation9 + $0x170] sm:$0xff]  ;;  %s8069_s25 = scalar_lea.hbm %s8128_s3, %s4460_s20 }
  0x59   : > { %289 = vst [vmem:[#allocation5] sm:$0x1] %v8142_v0  ;;  %848 = vmatpush1.msra.mxu0 %v341_v1  ;;  %1073 = vmatpush1.msra.mxu1 %v373_v2  ;;  %v371_v6 = vld [vmem:[#allocation9 + $0x168] sm:$0xff]  ;;  %v338_v7 = vld [vmem:[#allocation9 + $0x60] sm:$0xff]  ;;  %v337_v9 = vld [vmem:[#allocation9 + $0x58] sm:$0xff]  ;;  %v5187_v54 = vshrl.u32 %v506_v49, 7 }
  0x5a   : > { %849 = vmatprep.subr.mxu0 %v8142_v0  ;;  %1074 = vmatprep.subr.mxu1 %v8142_v0  ;;  %v370_v8 = vld [vmem:[#allocation9 + $0x160] sm:$0xff]  ;;  %v369_v10 = vld [vmem:[#allocation9 + $0x158] sm:$0xff]  ;;  %v336_v11 = vld [vmem:[#allocation9 + $0x50] sm:$0xff]  ;;  %s4349_s27 = sshll.u32 %s7940_s18, 4  ;;  %s4336_s29 = scalar_lea.sflag [#allocation8], %s5119_s5  ;;  %s8071_s27 = int_to_ptr.vmem [resolvable:$true] %s4349_s27 }
  0x5b   : > { %850 = vmatpush1.msra.mxu0 %v340_v3  ;;  %1075 = vmatpush1.msra.mxu1 %v372_v4  ;;  %v368_v12 = vld [vmem:[#allocation9 + $0x150] sm:$0xff]  ;;  %v335_v13 = vld [vmem:[#allocation9 + $0x48] sm:$0xff]  ;;  %v334_v15 = vld [vmem:[#allocation9 + $0x40] sm:$0xff]  ;;  %v5206_v63 = vsub.s32 1, %v5187_v54  ;;  %vm508_vm0 = vcmp.lt.s32.totalorder %v5187_v54, 1  ;;  %vm619_vm1 = vcmp.eq.s32.totalorder %v5187_v54, 0 }
  0x5c   : > { %851 = vmatprep.subr.mxu0 %v8142_v0  ;;  %1076 = vmatprep.subr.mxu1 %v8142_v0  ;;  %v367_v14 = vld [vmem:[#allocation9 + $0x148] sm:$0xff]  ;;  %v366_v16 = vld [vmem:[#allocation9 + $0x140] sm:$0xff]  ;;  %v333_v17 = vld [vmem:[#allocation9 + $0x38] sm:$0xff]  ;;  %vm581_vm2 = vcmp.lt.s32.totalorder %v5187_v54, 7  ;;  %s4884_s4 = scalar_lea.vmem %s8071_s27, 4096  ;;  %p8445_p2 = scmp.ne.s32.totalorder %s8269_s10, 0 }
  0x5d   : > { %852 = vmatpush1.msra.mxu0 %v339_v5  ;;  %1077 = vmatpush1.msra.mxu1 %v371_v6  ;;  %v365_v18 = vld [vmem:[#allocation9 + $0x138] sm:$0xff]  ;;  %v332_v19 = vld [vmem:[#allocation9 + $0x30] sm:$0xff]  ;;  %v331_v21 = vld [vmem:[#allocation9 + $0x28] sm:$0xff]  ;;  %p4885_p5 = scmp.ne.s32.totalorder %s8071_s27, %s4884_s4  ;;  %s4960_s9 = smov [#allocation12]  }
  0x5e   : > { %853 = vmatprep.subr.mxu0 %v8142_v0  ;;  %1078 = vmatprep.subr.mxu1 %v8142_v0  ;;  %v364_v20 = vld [vmem:[#allocation9 + $0x130] sm:$0xff]  ;;  %v363_v22 = vld [vmem:[#allocation9 + $0x128] sm:$0xff]  ;;  %v330_v23 = vld [vmem:[#allocation9 + $0x20] sm:$0xff]  ;;  %s4888_s21 = sshll.u32 %s4960_s9, 4  ;;  %s4889_s21 = int_to_ptr.vmem [resolvable:$false] %s4888_s21 }
  0x5f   : > { %854 = vmatpush1.msra.mxu0 %v338_v7  ;;  %1079 = vmatpush1.msra.mxu1 %v370_v8  ;;  %v362_v24 = vld [vmem:[#allocation9 + $0x120] sm:$0xff]  ;;  %v329_v25 = vld [vmem:[#allocation9 + $0x18] sm:$0xff]  ;;  %v328_v27 = vld [vmem:[#allocation9 + $0x10] sm:$0xff]  ;;  %p4886_p7 = pnand %p4885_p5, %p8445_p2  ;;  %s4890_s22 = scalar_lea.vmem %s4889_s21, 8192 }
  0x60   : > { %855 = vmatprep.subr.mxu0 %v8142_v0  ;;  %1080 = vmatprep.subr.mxu1 %v8142_v0  ;;  %v361_v26 = vld [vmem:[#allocation9 + $0x118] sm:$0xff]  ;;  %v360_v28 = vld [vmem:[#allocation9 + $0x110] sm:$0xff]  ;;  %v327_v29 = vld [vmem:[#allocation9 + $0x8] sm:$0xff]  ;;  %p4891_p13 = scmp.lt.s32.totalorder %s8071_s27, %s4889_s21  ;;  %p4892_p0 = scmp.lt.s32.totalorder %s4890_s22, %s4884_s4 }
  0x61   : > { %856 = vmatpush1.msra.mxu0 %v337_v9  ;;  %1081 = vmatpush1.msra.mxu1 %v369_v10  ;;  %v359_v30 = vld [vmem:[#allocation9 + $0x108] sm:$0xff]  ;;  %v326_v31 = vld [vmem:[#allocation9] sm:$0xff]  ;;  %v357_v33 = vld [vmem:[#allocation9 + $0xf8] sm:$0xff]  ;;  %p4887_p12 = pneg %p4886_p7 }
  0x62   : > { %857 = vmatprep.subr.mxu0 %v8142_v0  ;;  %1082 = vmatprep.subr.mxu1 %v8142_v0  ;;  %v358_v32 = vld [vmem:[#allocation9 + $0x100] sm:$0xff]  ;;  %v389_v34 = vld [vmem:[#allocation9 + $0x1f8] sm:$0xff]  ;;  %v356_v35 = vld [vmem:[#allocation9 + $0xf0] sm:$0xff]  ;;  %p4893_p10 = por %p4892_p0, %p4891_p13 }
  0x63   : > { %858 = vmatpush1.msra.mxu0 %v336_v11  ;;  %1083 = vmatpush1.msra.mxu1 %v368_v12  ;;  %v388_v36 = vld [vmem:[#allocation9 + $0x1f0] sm:$0xff]  ;;  %v355_v37 = vld [vmem:[#allocation9 + $0xe8] sm:$0xff]  ;;  %v354_v39 = vld [vmem:[#allocation9 + $0xe0] sm:$0xff] }
  0x64   : > { %859 = vmatprep.subr.mxu0 %v8142_v0  ;;  %1084 = vmatprep.subr.mxu1 %v8142_v0  ;;  %v387_v38 = vld [vmem:[#allocation9 + $0x1e8] sm:$0xff]  ;;  %v386_v40 = vld [vmem:[#allocation9 + $0x1e0] sm:$0xff]  ;;  %v353_v41 = vld [vmem:[#allocation9 + $0xd8] sm:$0xff]  ;;  %p4894_p3 = pnand %p4893_p10, %p4887_p12 }
  0x65   : > { %860 = vmatpush1.msra.mxu0 %v335_v13  ;;  %1085 = vmatpush1.msra.mxu1 %v367_v14  ;;  %v385_v42 = vld [vmem:[#allocation9 + $0x1d8] sm:$0xff]  ;;  %v352_v43 = vld [vmem:[#allocation9 + $0xd0] sm:$0xff]  ;;  %v351_v45 = vld [vmem:[#allocation9 + $0xc8] sm:$0xff]  ;;  %v5227_v14 = vsub.s32 6, %v5187_v54 }
  0x66   : > { %861 = vmatprep.subr.mxu0 %v8142_v0  ;;  %1086 = vmatprep.subr.mxu1 %v8142_v0  ;;  %v384_v44 = vld [vmem:[#allocation9 + $0x1d0] sm:$0xff]  ;;  %v383_v46 = vld [vmem:[#allocation9 + $0x1c8] sm:$0xff]  ;;  %v350_v47 = vld [vmem:[#allocation9 + $0xc0] sm:$0xff] }
  0x67   : > { %862 = vmatpush1.msra.mxu0 %v334_v15  ;;  %1087 = vmatpush1.msra.mxu1 %v366_v16  ;;  %v382_v48 = vld [vmem:[#allocation9 + $0x1c0] sm:$0xff]  ;;  %v349_v50 = vld [vmem:[#allocation9 + $0xb8] sm:$0xff]  ;;  %v348_v52 = vld [vmem:[#allocation9 + $0xb0] sm:$0xff]  ;;  %8275 = vst [vmem:[#allocation16_spill] sm:$0xff] %v5227_v14 }
  0x68   : > { %863 = vmatprep.subr.mxu0 %v8142_v0  ;;  %1088 = vmatprep.subr.mxu1 %v8142_v0  ;;  %v381_v51 = vld [vmem:[#allocation9 + $0x1b8] sm:$0xff]  ;;  %v380_v53 = vld [vmem:[#allocation9 + $0x1b0] sm:$0xff]  ;;  %v347_v55 = vld [vmem:[#allocation9 + $0xa8] sm:$0xff] }
  0x69   : > { %864 = vmatpush1.msra.mxu0 %v333_v17  ;;  %1089 = vmatpush1.msra.mxu1 %v365_v18  ;;  %v379_v56 = vld [vmem:[#allocation9 + $0x1a8] sm:$0xff]  ;;  %v346_v57 = vld [vmem:[#allocation9 + $0xa0] sm:$0xff]  ;;  %v5192_v58 = vld [vmem:[%s5125_s30 + $0x10] sm:$0xff] }
  0x6a   : > { %865 = vmatprep.subr.mxu0 %v8142_v0  ;;  %1090 = vmatprep.subr.mxu1 %v8142_v0  ;;  %v5195_v59 = vld [vmem:[%s5125_s30 + $0x18] sm:$0xff]  ;;  %v378_v60 = vld [vmem:[#allocation9 + $0x1a0] sm:$0xff]  ;;  %v5203_v62 = vld [vmem:[%s5125_s30 + $0x8] sm:$0xff]  ;;  %v470_v3 = vrot.slane %v5192_v58, 7  ;;  %v628_v9 = vrot.slane %v5192_v58, %v5206_v63  ;;  %v545_v16 = vrot.slane %v5192_v58, 1 }
  0x6b   : > { %866 = vmatpush1.msra.mxu0 %v332_v19  ;;  %1091 = vmatpush1.msra.mxu1 %v364_v20  ;;  %v5200_v61 = vld [vmem:[%s5125_s30] sm:$0xff]  ;;  %v345_v1 = vld [vmem:[#allocation9 + $0x98] sm:$0xff]  ;;  %v488_v4 = vrot.slane %v5195_v59, 7  ;;  %v489_v6 = vrot.slane %v5203_v62, 7  ;;  %v344_v7 = vld [vmem:[#allocation9 + $0x90] sm:$0xff]  ;;  %v563_v17 = vrot.slane %v5195_v59, 1 }
  0x6c   : > { %867 = vmatprep.subr.mxu0 %v8142_v0  ;;  %1092 = vmatprep.subr.mxu1 %v8142_v0  ;;  %v377_v2 = vld [vmem:[#allocation9 + $0x198] sm:$0xff]  ;;  %v471_v5 = vrot.slane %v5200_v61, 7  ;;  %v376_v8 = vld [vmem:[#allocation9 + $0x190] sm:$0xff]  ;;  %v343_v10 = vld [vmem:[#allocation9 + $0x88] sm:$0xff]  ;;  %v632_v13 = vrot.slane %v5200_v61, %v5206_v63  ;;  %v5237_v19 = vadd.s32 8, %v5187_v54 }
  0x6d   : > { %868 = vmatpush1.msra.mxu0 %v331_v21  ;;  %1093 = vmatpush1.msra.mxu1 %v363_v22  ;;  %v375_v11 = vld [vmem:[#allocation9 + $0x188] sm:$0xff]  ;;  %v527_v12 = vsel %vm508_vm0, %v488_v4, %v470_v3  ;;  %v342_v18 = vld [vmem:[#allocation9 + $0x80] sm:$0xff] }
  0x6e   : > { %869 = vmatprep.subr.mxu0 %v8142_v0  ;;  %1094 = vmatprep.subr.mxu1 %v8142_v0  ;;  %v528_v15 = vsel %vm508_vm0, %v489_v6, %v471_v5  ;;  %v5241_v20 = vsel %vm619_vm1, %v628_v9, %v527_v12  ;;  %v374_v21 = vld [vmem:[#allocation9 + $0x180] sm:$0xff]  ;;  %vm734_vm3 = vcmp.eq.s32.totalorder %v5237_v19, 15  ;;  %v393_v12 = vld [vmem:[#allocation9 + $0x218] sm:$0xff] }
  0x6f   : > { %870 = vmatpush1.msra.mxu0 %v330_v23  ;;  %1095 = vmatpush1.msra.mxu1 %v362_v24  ;;  %v699_v22 = vsel %vm619_vm1, %v632_v13, %v528_v15  ;;  %v5250_v23 = vsel %vm581_vm2, %v545_v16, %v563_v17  ;;  %v405_v24 = vld [vmem:[#allocation9 + $0x278] sm:$0xff]  ;;  %v5380_v15 = vld [vmem:[%s5125_s30 + $0x50] sm:$0xff] }
  0x70   : > { %871 = vmatprep.subr.mxu0 %v8142_v0  ;;  %1096 = vmatprep.subr.mxu1 %v8142_v0 }
  0x71   : > { %872 = vmatpush1.msra.mxu0 %v329_v25  ;;  %1097 = vmatpush1.msra.mxu1 %v361_v26  ;;  %v742_v25 = vrot.slane %v5195_v59, %v5227_v14  ;;  %v510_v26 = vsel %vm508_vm0, %v471_v5, %v489_v6  ;;  %v394_v6 = vld [vmem:[#allocation9 + $0x220] sm:$0xff] }
  0x72   : > { %873 = vmatprep.subr.mxu0 %v8142_v0  ;;  %1098 = vmatprep.subr.mxu1 %v8142_v0 }
  0x73   : > { %874 = vmatpush1.msra.mxu0 %v328_v27  ;;  %1099 = vmatpush1.msra.mxu1 %v360_v28  ;;  %v600_v27 = vsel %vm581_vm2, %v563_v17, %v545_v16  ;;  %v5263_v28 = vsel %vm508_vm0, %v470_v3, %v488_v4  ;;  %v395_v3 = vld [vmem:[#allocation9 + $0x228] sm:$0xff]  ;;  %v5383_v16 = vld [vmem:[%s5125_s30 + $0x58] sm:$0xff]  ;;  %v392_v17 = vld [vmem:[#allocation9 + $0x210] sm:$0xff] }
  0x74   : > { %875 = vmatprep.subr.mxu0 %v8142_v0  ;;  %1100 = vmatprep.subr.mxu1 %v8142_v0 }
  0x75   : > { %876 = vmatpush1.msra.mxu0 %v327_v29  ;;  %1101 = vmatpush1.msra.mxu1 %v359_v30  ;;  %v404_v29 = vld [vmem:[#allocation9 + $0x270] sm:$0xff]  ;;  %v5267_v30 = vld [vmem:[%s5125_s30 + $0x20] sm:$0xff] }
  0x76   : > { %877 = vmatprep.subr.mxu0 %v8142_v0  ;;  %1102 = vmatprep.subr.mxu1 %v8142_v0 }
  0x77   : > { %878 = vmatpush1.msra.mxu0 %v326_v31  ;;  %1103 = vmatpush1.msra.mxu1 %v358_v32  ;;  %v5270_v31 = vld [vmem:[%s5125_s30 + $0x28] sm:$0xff]  ;;  %v5275_v32 = vsel %vm734_vm3, %v742_v25, %v600_v27  ;;  %v494_v27 = vrot.slane %v5383_v16, 7 }
  0x78   : > { %879 = vmatprep.subr.mxu0 %v8142_v0  ;;  %1104 = vmatprep.subr.mxu1 %v8142_v0  ;;  %v391_v25 = vld [vmem:[#allocation9 + $0x208] sm:$0xff] }
  0x79   : > { %880 = vmatpush2.msra.mxu0 %v357_v33  ;;  %1105 = vmatpush2.msra.mxu1 %v389_v34  ;;  %v546_v33 = vrot.slane %v5200_v61, 1  ;;  %v564_v34 = vrot.slane %v5203_v62, 1 }
  0x7a   : > { %881 = vmatprep.subr.mxu0 %v8142_v0  ;;  %1106 = vmatprep.subr.mxu1 %v8142_v0 }
  0x7b   : > { %882 = vmatpush2.msra.mxu0 %v356_v35  ;;  %1107 = vmatpush2.msra.mxu1 %v388_v36  ;;  %v403_v35 = vld [vmem:[#allocation9 + $0x268] sm:$0xff]  ;;  %v473_v36 = vrot.slane %v5267_v30, 7 }
  0x7c   : > { %883 = vmatprep.subr.mxu0 %v8142_v0  ;;  %1108 = vmatprep.subr.mxu1 %v8142_v0 }
  0x7d   : > { %884 = vmatpush2.msra.mxu0 %v355_v37  ;;  %1109 = vmatpush2.msra.mxu1 %v387_v38  ;;  %v491_v37 = vrot.slane %v5270_v31, 7  ;;  %v402_v38 = vld [vmem:[#allocation9 + $0x260] sm:$0xff] }
  0x7e   : > { %885 = vmatprep.subr.mxu0 %v8142_v0  ;;  %1110 = vmatprep.subr.mxu1 %v8142_v0 }
  0x7f   : > { %886 = vmatpush2.msra.mxu0 %v354_v39  ;;  %1111 = vmatpush2.msra.mxu1 %v386_v40  ;;  %v5289_v39 = vsel %vm581_vm2, %v546_v33, %v564_v34  ;;  %v746_v40 = vrot.slane %v5203_v62, %v5227_v14 }
  0x80   : > { %887 = vmatprep.subr.mxu0 %v8142_v0  ;;  %1112 = vmatprep.subr.mxu1 %v8142_v0 }
  0x81   : > { %888 = vmatpush2.msra.mxu0 %v353_v41  ;;  %1113 = vmatpush2.msra.mxu1 %v385_v42  ;;  %v601_v41 = vsel %vm581_vm2, %v564_v34, %v546_v33  ;;  %v640_v42 = vrot.slane %v5267_v30, %v5206_v63 }
  0x82   : > { %889 = vmatprep.subr.mxu0 %v8142_v0  ;;  %1114 = vmatprep.subr.mxu1 %v8142_v0 }
  0x83   : > { %890 = vmatpush2.msra.mxu0 %v352_v43  ;;  %1115 = vmatpush2.msra.mxu1 %v384_v44  ;;  %v401_v43 = vld [vmem:[#allocation9 + $0x258] sm:$0xff]  ;;  %v530_v44 = vsel %vm508_vm0, %v491_v37, %v473_v36 }
  0x84   : > { %891 = vmatprep.subr.mxu0 %v8142_v0  ;;  %1116 = vmatprep.subr.mxu1 %v8142_v0  ;;  %v5316_v49 = vsel %vm619_vm1, %v640_v42, %v530_v44 }
  0x85   : > { %892 = vmatpush2.msra.mxu0 %v351_v45  ;;  %1117 = vmatpush2.msra.mxu1 %v383_v46  ;;  %v400_v45 = vld [vmem:[#allocation9 + $0x250] sm:$0xff] }
  0x86   : > { %893 = vmatprep.subr.mxu0 %v8142_v0  ;;  %1118 = vmatprep.subr.mxu1 %v8142_v0  ;;  %v5304_v46 = vld [vmem:[%s5125_s30 + $0x30] sm:$0xff] }
  0x87   : > { %894 = vmatpush2.msra.mxu0 %v350_v47  ;;  %1119 = vmatpush2.msra.mxu1 %v382_v48  ;;  %v5307_v47 = vld [vmem:[%s5125_s30 + $0x38] sm:$0xff]  ;;  %v5312_v48 = vsel %vm734_vm3, %v746_v40, %v601_v41  ;;  %v5429_v40 = vld [vmem:[%s5125_s30 + $0x68] sm:$0xff] }
  0x88   : > { %895 = vmatprep.subr.mxu0 %v8142_v0  ;;  %1120 = vmatprep.subr.mxu1 %v8142_v0  ;;  %v437_v41 = vld [vmem:[#allocation9 + $0x378] sm:$0xff] }
  0x89   : > { %896 = vmatpush2.msra.mxu0 %v349_v50  ;;  %1121 = vmatpush2.msra.mxu1 %v381_v51  ;;  %v399_v50 = vld [vmem:[#allocation9 + $0x248] sm:$0xff]  ;;  %v474_v51 = vrot.slane %v5304_v46, 7 }
  0x8a   : > { %897 = vmatprep.subr.mxu0 %v8142_v0  ;;  %1122 = vmatprep.subr.mxu1 %v8142_v0 }
  0x8b   : > { %898 = vmatpush2.msra.mxu0 %v348_v52  ;;  %1123 = vmatpush2.msra.mxu1 %v380_v53  ;;  %v492_v52 = vrot.slane %v5307_v47, 7  ;;  %v398_v53 = vld [vmem:[#allocation9 + $0x240] sm:$0xff] }
  0x8c   : > { %899 = vmatprep.subr.mxu0 %v8142_v0  ;;  %1124 = vmatprep.subr.mxu1 %v8142_v0 }
  0x8d   : > { %900 = vmatpush2.msra.mxu0 %v347_v55  ;;  %1125 = vmatpush2.msra.mxu1 %v379_v56  ;;  %v5328_v55 = vsel %vm508_vm0, %v473_v36, %v491_v37  ;;  %v644_v56 = vrot.slane %v5304_v46, %v5206_v63  ;;  %v5368_v9 = vsel %vm508_vm0, %v474_v51, %v492_v52  ;;  %v421_v36 = vld [vmem:[#allocation9 + $0x2f8] sm:$0xff] }
  0x8e   : > { %901 = vmatprep.subr.mxu0 %v8142_v0  ;;  %1126 = vmatprep.subr.mxu1 %v8142_v0 }
  0x8f   : > { %902 = vmatpush2.msra.mxu0 %v346_v57  ;;  %1127 = vmatpush2.msra.mxu1 %v378_v60  ;;  %v397_v57 = vld [vmem:[#allocation9 + $0x238] sm:$0xff]  ;;  %v5338_v60 = vld [vmem:[%s5125_s30 + $0x40] sm:$0xff] }
  0x90   : > { %903 = vmatprep.subr.mxu0 %v8142_v0  ;;  %1128 = vmatprep.subr.mxu1 %v8142_v0  ;;  %v475_v4 = vrot.slane %v5338_v60, 7 }
  0x91   : > { %904 = vmatpush2.msra.mxu0 %v345_v1  ;;  %1129 = vmatpush2.msra.mxu1 %v377_v2  ;;  %v548_v1 = vrot.slane %v5267_v30, 1  ;;  %v566_v2 = vrot.slane %v5270_v31, 1 }
  0x92   : > { %905 = vmatprep.subr.mxu0 %v8142_v0  ;;  %1130 = vmatprep.subr.mxu1 %v8142_v0 }
  0x93   : > { %906 = vmatpush2.msra.mxu0 %v344_v7  ;;  %1131 = vmatpush2.msra.mxu1 %v376_v8  ;;  %v5361_v7 = vsel %vm581_vm2, %v548_v1, %v566_v2  ;;  %v754_v8 = vrot.slane %v5270_v31, %v5227_v14 }
  0x94   : > { %907 = vmatprep.subr.mxu0 %v8142_v0  ;;  %1132 = vmatprep.subr.mxu1 %v8142_v0 }
  0x95   : > { %908 = vmatpush2.msra.mxu0 %v343_v10  ;;  %1133 = vmatpush2.msra.mxu1 %v375_v11  ;;  %v603_v10 = vsel %vm581_vm2, %v566_v2, %v548_v1  ;;  %v648_v11 = vrot.slane %v5338_v60, %v5206_v63  ;;  %v5472_v2 = vld [vmem:[%s5125_s30 + $0x70] sm:$0xff] }
  0x96   : > { %909 = vmatprep.subr.mxu0 %v8142_v0  ;;  %911 = vmatprep.mubr.f32.mxu0 %v5192_v58 }
  0x97   : > { %910 = vmatpush2.msra.mxu0 %v342_v18  ;;  %1134 = vmatprep.subr.mxu1 %v8142_v0  ;;  %v5389_v18 = vsel %vm734_vm3, %v754_v8, %v603_v10  ;;  %v434_v10 = vld [vmem:[#allocation9 + $0x360] sm:$0xff] }
  0x98   : > { %912 = vmatmul.mubr.f32.vlgmr.msra.gmra.mxu0 %v5241_v20  ;;  %1135 = vmatpush2.msra.mxu1 %v374_v21  ;;  %v549_v21 = vrot.slane %v5304_v46, 1 }
  0x99   : > { %1136 = vmatprep.mubr.f32.mxu1 %v699_v22  ;;  %1297 = vmatprep.subr.mxu0 %v8142_v0 }
  0x9a   : > { %1137 = vmatmul.mubr.f32.vlgmr.msra.gmra.mxu1 %v5250_v23  ;;  %1298 = vmatpush1.msra.mxu0 %v405_v24 }
  0x9b   : > { %916 = vmatprep.mubr.f32.mxu0 %v5195_v59  ;;  %1141 = vmatprep.mubr.f32.mxu1 %v510_v26 }
  0x9c   : > { %917 = vmatmul.mubr.f32.gmra.mxu0 %v5263_v28  ;;  %1299 = vmatprep.subr.mxu0 %v8142_v0 }
  0x9d   : > { %1300 = vmatpush1.msra.mxu0 %v404_v29  ;;  %921 = vmatprep.mubr.f32.mxu0 %v5200_v61  ;;  %v5341_v61 = vld [vmem:[%s5125_s30 + $0x48] sm:$0xff]  ;;  %v390_v29 = vld [vmem:[#allocation9 + $0x200] sm:$0xff] }
  0x9e   : > { %1142 = vmatmul.mubr.f32.gmra.mxu1 %v5275_v32  ;;  %1301 = vmatprep.subr.mxu0 %v8142_v0  ;;  %v493_v5 = vrot.slane %v5341_v61, 7  ;;  %v568_v44 = vrot.slane %v5341_v61, 1 }
  0x9f   : > { %1146 = vmatprep.mubr.f32.mxu1 %v5241_v20  ;;  %1302 = vmatpush1.msra.mxu0 %v403_v35  ;;  %v652_v35 = vrot.slane %v5380_v15, %v5206_v63 }
  0xa0   : > { %922 = vmatmul.mubr.f32.gmra.mxu0 %v699_v22  ;;  %1303 = vmatprep.subr.mxu0 %v8142_v0  ;;  %v532_v13 = vsel %vm508_vm0, %v493_v5, %v475_v4  ;;  %v567_v22 = vrot.slane %v5307_v47, 1  ;;  %v5414_v33 = vsel %vm508_vm0, %v475_v4, %v493_v5  ;;  %v569_v5 = vrot.slane %v5383_v16, 1 }
  0xa1   : > { %926 = vmatprep.mubr.f32.mxu0 %v5203_v62  ;;  %1304 = vmatpush1.msra.mxu0 %v402_v38  ;;  %v396_v62 = vld [vmem:[#allocation9 + $0x230] sm:$0xff]  ;;  %v5396_v24 = vsel %vm619_vm1, %v648_v11, %v532_v13  ;;  %v5426_v38 = vld [vmem:[%s5125_s30 + $0x60] sm:$0xff]  ;;  %v478_v11 = vrot.slane %v5472_v2, 7  ;;  %v433_v13 = vld [vmem:[#allocation9 + $0x358] sm:$0xff] }
  0xa2   : > { %1147 = vmatmul.mubr.f32.gmra.mxu1 %v5289_v39  ;;  %1305 = vmatprep.subr.mxu0 %v8142_v0  ;;  %v604_v34 = vsel %vm581_vm2, %v567_v22, %v549_v21 }
  0xa3   : > { %1151 = vmatprep.mubr.f32.mxu1 %v5263_v28  ;;  %1306 = vmatpush1.msra.mxu0 %v401_v43  ;;  %v550_v43 = vrot.slane %v5338_v60, 1 }
  0xa4   : > { %927 = vmatmul.mubr.f32.gmra.mxu0 %v510_v26  ;;  %1307 = vmatprep.subr.mxu0 %v8142_v0  ;;  %v476_v26 = vrot.slane %v5380_v15, 7 }
  0xa5   : > { %931 = vmatprep.mubr.f32.mxu0 %v5192_v58  ;;  %1308 = vmatpush1.msra.mxu0 %v400_v45  ;;  %v531_v58 = vsel %vm508_vm0, %v492_v52, %v474_v51  ;;  %v420_v51 = vld [vmem:[#allocation9 + $0x2f0] sm:$0xff]  ;;  %v5453_v52 = vsel %vm581_vm2, %v550_v43, %v568_v44 }
  0xa6   : > { %1152 = vmatmul.mubr.f32.gmra.mxu1 %v5312_v48  ;;  %1309 = vmatprep.subr.mxu0 %v8142_v0  ;;  %v533_v37 = vsel %vm508_vm0, %v494_v27, %v476_v26 }
  0xa7   : > { %1156 = vmatprep.mubr.f32.mxu1 %v5316_v49  ;;  %1310 = vmatpush1.msra.mxu0 %v399_v50  ;;  %v5442_v45 = vsel %vm619_vm1, %v652_v35, %v533_v37  ;;  %v436_v50 = vld [vmem:[#allocation9 + $0x370] sm:$0xff]  ;;  %v418_v35 = vld [vmem:[#allocation9 + $0x2e0] sm:$0xff]  ;;  %v552_v37 = vrot.slane %v5426_v38, 1 }
  0xa8   : > { %932 = vmatmul.mubr.f32.gmra.mxu0 %v5241_v20  ;;  %1311 = vmatprep.subr.mxu0 %v8142_v0 }
  0xa9   : > { %936 = vmatprep.mubr.f32.mxu0 %v5195_v59  ;;  %1312 = vmatpush1.msra.mxu0 %v398_v53  ;;  %v5350_v59 = vsel %vm619_vm1, %v644_v56, %v531_v58  ;;  %v762_v53 = vrot.slane %v5341_v61, %v5227_v14  ;;  %v5461_v56 = vsel %vm508_vm0, %v476_v26, %v494_v27 }
  0xaa   : > { %1157 = vmatmul.mubr.f32.gmra.mxu1 %v5250_v23  ;;  %1313 = vmatprep.subr.mxu0 %v8142_v0  ;;  %v656_v58 = vrot.slane %v5426_v38, %v5206_v63  ;;  %v660_v26 = vrot.slane %v5472_v2, %v5206_v63 }
  0xab   : > { %1161 = vmatprep.mubr.f32.mxu1 %v5328_v55  ;;  %1314 = vmatpush1.msra.mxu0 %v397_v57  ;;  %v605_v57 = vsel %vm581_vm2, %v568_v44, %v550_v43  ;;  %v431_v44 = vld [vmem:[#allocation9 + $0x348] sm:$0xff] }
  0xac   : > { %937 = vmatmul.mubr.f32.gmra.mxu0 %v5263_v28  ;;  %1315 = vmatprep.subr.mxu0 %v8142_v0  ;;  %v5481_v4 = vsel %vm734_vm3, %v762_v53, %v605_v57  ;;  %v417_v53 = vld [vmem:[#allocation9 + $0x2d8] sm:$0xff] }
  0xad   : > { %941 = vmatprep.mubr.f32.mxu0 %v5267_v30  ;;  %1316 = vmatpush1.msra.mxu0 %v396_v62  ;;  %v5407_v30 = vsel %vm581_vm2, %v549_v21, %v567_v22  ;;  %v435_v62 = vld [vmem:[#allocation9 + $0x368] sm:$0xff]  ;;  %v766_v21 = vrot.slane %v5383_v16, %v5227_v14 }
  0xae   : > { %1162 = vmatmul.mubr.f32.gmra.mxu1 %v5275_v32  ;;  %1317 = vmatprep.subr.mxu0 %v8142_v0 }
  0xaf   : > { %1166 = vmatprep.mubr.f32.mxu1 %v5350_v59  ;;  %1318 = vmatpush1.msra.mxu0 %v395_v3  ;;  %v5475_v3 = vld [vmem:[%s5125_s30 + $0x78] sm:$0xff] }
  0xb0   : > { %942 = vmatmul.mubr.f32.gmra.mxu0 %v5316_v49  ;;  %1319 = vmatprep.subr.mxu0 %v8142_v0 }
  0xb1   : > { %946 = vmatprep.mubr.f32.mxu0 %v5270_v31  ;;  %1320 = vmatpush1.msra.mxu0 %v394_v6  ;;  %v758_v31 = vrot.slane %v5307_v47, %v5227_v14  ;;  %v419_v6 = vld [vmem:[#allocation9 + $0x2e8] sm:$0xff] }
  0xb2   : > { %1167 = vmatmul.mubr.f32.gmra.mxu1 %v5361_v7  ;;  %1321 = vmatprep.subr.mxu0 %v8142_v0 }
  0xb3   : > { %1171 = vmatprep.mubr.f32.mxu1 %v5368_v9  ;;  %1322 = vmatpush1.msra.mxu0 %v393_v12  ;;  %v5435_v42 = vsel %vm734_vm3, %v758_v31, %v604_v34  ;;  %v496_v12 = vrot.slane %v5475_v3, 7  ;;  %v5518_v31 = vld [vmem:[%s5125_s30 + $0x80] sm:$0xff]  ;;  %v5521_v34 = vld [vmem:[%s5125_s30 + $0x88] sm:$0xff] }
  0xb4   : > { %947 = vmatmul.mubr.f32.gmra.mxu0 %v5328_v55  ;;  %1323 = vmatprep.subr.mxu0 %v8142_v0  ;;  %8276 = vst [vmem:[#allocation17_spill] sm:$0xff] %v5518_v31  ;;  %8277 = vst [vmem:[#allocation18_spill] sm:$0xff] %v5521_v34 }
  0xb5   : > { %951 = vmatprep.mubr.f32.mxu0 %v5304_v46  ;;  %1324 = vmatpush1.msra.mxu0 %v392_v17  ;;  %v477_v46 = vrot.slane %v5426_v38, 7  ;;  %v535_v27 = vsel %vm508_vm0, %v496_v12, %v478_v11  ;;  %v5552_v57 = vsel %vm508_vm0, %v478_v11, %v496_v12  ;;  %v553_v12 = vrot.slane %v5472_v2, 1 }
  0xb6   : > { %1172 = vmatmul.mubr.f32.gmra.mxu1 %v5389_v18  ;;  %1325 = vmatprep.subr.mxu0 %v8142_v0  ;;  %v5535_v43 = vsel %vm619_vm1, %v660_v26, %v535_v27  ;;  %v428_v27 = vld [vmem:[#allocation9 + $0x330] sm:$0xff] }
  0xb7   : > { %1176 = vmatprep.mubr.f32.mxu1 %v5396_v24  ;;  %1326 = vmatpush1.msra.mxu0 %v391_v25 }
  0xb8   : > { %952 = vmatmul.mubr.f32.gmra.mxu0 %v5350_v59  ;;  %1327 = vmatprep.subr.mxu0 %v8142_v0 }
  0xb9   : > { %956 = vmatprep.mubr.f32.mxu0 %v5307_v47  ;;  %1328 = vmatpush1.msra.mxu0 %v390_v29  ;;  %v495_v47 = vrot.slane %v5429_v40, 7  ;;  %v432_v29 = vld [vmem:[#allocation9 + $0x350] sm:$0xff] }
  0xba   : > { %1177 = vmatmul.mubr.f32.gmra.mxu1 %v5407_v30  ;;  %1329 = vmatprep.subr.mxu0 %v8142_v0 }
  0xbb   : > { %1181 = vmatprep.mubr.f32.mxu1 %v5414_v33  ;;  %1330 = vmatpush2.msra.mxu0 %v421_v36  ;;  %v534_v1 = vsel %vm508_vm0, %v495_v47, %v477_v46  ;;  %v5506_v22 = vsel %vm508_vm0, %v477_v46, %v495_v47  ;;  %v479_v46 = vrot.slane %v5518_v31, 7  ;;  %v497_v47 = vrot.slane %v5521_v34, 7 }
  0xbc   : > { %957 = vmatmul.mubr.f32.gmra.mxu0 %v5368_v9  ;;  %1522 = vmatprep.subr.mxu1 %v8142_v0  ;;  %v5488_v8 = vsel %vm619_vm1, %v656_v58, %v534_v1  ;;  %v430_v1 = vld [vmem:[#allocation9 + $0x340] sm:$0xff] }
  0xbd   : > { %961 = vmatprep.mubr.f32.mxu0 %v5338_v60  ;;  %1523 = vmatpush1.msra.mxu1 %v437_v41  ;;  %v570_v41 = vrot.slane %v5429_v40, 1 }
  0xbe   : > { %1182 = vmatmul.mubr.f32.gmra.mxu1 %v5435_v42  ;;  %1331 = vmatprep.subr.mxu0 %v8142_v0 }
  0xbf   : > { %1186 = vmatprep.mubr.f32.mxu1 %v5442_v45  ;;  %1524 = vmatprep.subr.mxu1 %v8142_v0  ;;  %v607_v58 = vsel %vm581_vm2, %v570_v41, %v552_v37 }
  0xc0   : > { %962 = vmatmul.mubr.f32.gmra.mxu0 %v5396_v24  ;;  %1525 = vmatpush1.msra.mxu1 %v436_v50  ;;  %v5545_v50 = vsel %vm581_vm2, %v552_v37, %v570_v41  ;;  %v774_v37 = vrot.slane %v5475_v3, %v5227_v14  ;;  %v5599_v41 = vsel %vm508_vm0, %v479_v46, %v497_v47 }
  0xc1   : > { %966 = vmatprep.mubr.f32.mxu0 %v5341_v61  ;;  %1332 = vmatpush2.msra.mxu0 %v420_v51  ;;  %v551_v61 = vrot.slane %v5380_v15, 1  ;;  %v770_v51 = vrot.slane %v5429_v40, %v5227_v14  ;;  %8281 = vst [vmem:[#allocation22_spill] sm:$0xff] %v5599_v41 }
  0xc2   : > { %1187 = vmatmul.mubr.f32.gmra.mxu1 %v5453_v52  ;;  %1526 = vmatprep.subr.mxu1 %v8142_v0 }
  0xc3   : > { %1191 = vmatprep.mubr.f32.mxu1 %v5461_v56  ;;  %1527 = vmatpush1.msra.mxu1 %v435_v62  ;;  %v5499_v17 = vsel %vm581_vm2, %v551_v61, %v569_v5  ;;  %v606_v25 = vsel %vm581_vm2, %v569_v5, %v551_v61  ;;  %v664_v62 = vrot.slane %v5518_v31, %v5206_v63  ;;  %v5565_v5 = vld [vmem:[%s5125_s30 + $0x90] sm:$0xff] }
  0xc4   : > { %967 = vmatmul.mubr.f32.gmra.mxu0 %v5414_v33  ;;  %1333 = vmatprep.subr.mxu0 %v8142_v0  ;;  %v5527_v36 = vsel %vm734_vm3, %v766_v21, %v606_v25  ;;  %v536_v61 = vsel %vm508_vm0, %v497_v47, %v479_v46  ;;  %8278 = vst [vmem:[#allocation19_spill] sm:$0xff] %v5565_v5  ;;  %v480_v25 = vrot.slane %v5565_v5, 7  ;;  %v5613_v46 = vld [vmem:[%s5125_s30 + $0xa8] sm:$0xff] }
  0xc5   : > { %971 = vmatprep.mubr.f32.mxu0 %v5380_v15  ;;  %1528 = vmatprep.subr.mxu1 %v8142_v0  ;;  %v5573_v11 = vsel %vm734_vm3, %v770_v51, %v607_v58  ;;  %v5580_v21 = vsel %vm619_vm1, %v664_v62, %v536_v61  ;;  %v668_v51 = vrot.slane %v5565_v5, %v5206_v63  ;;  %v5610_v62 = vld [vmem:[%s5125_s30 + $0xa0] sm:$0xff]  ;;  %v572_v61 = vrot.slane %v5521_v34, 1 }
  0xc6   : > { %1192 = vmatmul.mubr.f32.gmra.mxu1 %v5481_v4  ;;  %1334 = vmatpush2.msra.mxu0 %v419_v6  ;;  %v5568_v6 = vld [vmem:[%s5125_s30 + $0x98] sm:$0xff]  ;;  %8280 = vst [vmem:[#allocation21_spill] sm:$0xff] %v5580_v21  ;;  %8282 = vst [vmem:[#allocation23_spill] sm:$0xff] %v5610_v62 }
  0xc7   : > { %1196 = vmatprep.mubr.f32.mxu1 %v5488_v8  ;;  %1529 = vmatpush1.msra.mxu1 %v434_v10  ;;  %8279 = vst [vmem:[#allocation20_spill] sm:$0xff] %v5568_v6  ;;  %v429_v10 = vld [vmem:[#allocation9 + $0x338] sm:$0xff]  ;;  %v498_v26 = vrot.slane %v5568_v6, 7  ;;  %8283 = vst [vmem:[#allocation24_spill] sm:$0xff] %v5613_v46 }
  0xc8   : > { %972 = vmatmul.mubr.f32.gmra.mxu0 %v5442_v45  ;;  %1530 = vmatprep.subr.mxu1 %v8142_v0 }
  0xc9   : > { %976 = vmatprep.mubr.f32.mxu0 %v5383_v16  ;;  %1531 = vmatpush1.msra.mxu1 %v433_v13  ;;  %v571_v13 = vrot.slane %v5475_v3, 1  ;;  %v537_v58 = vsel %vm508_vm0, %v498_v26, %v480_v25 }
  0xca   : > { %1197 = vmatmul.mubr.f32.gmra.mxu1 %v5499_v17  ;;  %1335 = vmatprep.subr.mxu0 %v8142_v0 }
  0xcb   : > { %1201 = vmatprep.mubr.f32.mxu1 %v5506_v22  ;;  %1532 = vmatprep.subr.mxu1 %v8142_v0 }
  0xcc   : > { %977 = vmatmul.mubr.f32.gmra.mxu0 %v5461_v56  ;;  %1533 = vmatpush1.msra.mxu1 %v432_v29  ;;  %v416_v29 = vld [vmem:[#allocation9 + $0x2d0] sm:$0xff] }
  0xcd   : > { %981 = vmatprep.mubr.f32.mxu0 %v5426_v38  ;;  %1336 = vmatpush2.msra.mxu0 %v418_v35  ;;  %v5591_v35 = vsel %vm581_vm2, %v553_v12, %v571_v13 }
  0xce   : > { %1202 = vmatmul.mubr.f32.gmra.mxu1 %v5527_v36  ;;  %1534 = vmatprep.subr.mxu1 %v8142_v0 }
  0xcf   : > { %1206 = vmatprep.mubr.f32.mxu1 %v5535_v43  ;;  %1535 = vmatpush1.msra.mxu1 %v431_v44  ;;  %v608_v44 = vsel %vm581_vm2, %v571_v13, %v553_v12  ;;  %v5626_v12 = vsel %vm619_vm1, %v668_v51, %v537_v58  ;;  %v426_v13 = vld [vmem:[#allocation9 + $0x320] sm:$0xff]  ;;  %v778_v51 = vrot.slane %v5521_v34, %v5227_v14 }
  0xd0   : > { %982 = vmatmul.mubr.f32.gmra.mxu0 %v5488_v8  ;;  %1337 = vmatprep.subr.mxu0 %v8142_v0  ;;  %v5619_v47 = vsel %vm734_vm3, %v774_v37, %v608_v44  ;;  %8285 = vst [vmem:[#allocation26_spill] sm:$0xff] %v5626_v12  ;;  %v425_v37 = vld [vmem:[#allocation9 + $0x318] sm:$0xff] }
  0xd1   : > { %986 = vmatprep.mubr.f32.mxu0 %v5429_v40  ;;  %1536 = vmatprep.subr.mxu1 %v8142_v0  ;;  %8284 = vst [vmem:[#allocation25_spill] sm:$0xff] %v5619_v47 }
  0xd2   : > { %1207 = vmatmul.mubr.f32.gmra.mxu1 %v5545_v50  ;;  %1338 = vmatpush2.msra.mxu0 %v417_v53  ;;  %v427_v53 = vld [vmem:[#allocation9 + $0x328] sm:$0xff] }
  0xd3   : > { %1211 = vmatprep.mubr.f32.mxu1 %v5552_v57  ;;  %1537 = vmatpush1.msra.mxu1 %v430_v1  ;;  %v554_v1 = vrot.slane %v5518_v31, 1 }
  0xd4   : > { %987 = vmatmul.mubr.f32.gmra.mxu0 %v5506_v22  ;;  %1538 = vmatprep.subr.mxu1 %v8142_v0 }
  0xd5   : > { %991 = vmatprep.mubr.f32.mxu0 %v5472_v2  ;;  %1539 = vmatpush1.msra.mxu1 %v429_v10  ;;  %v415_v10 = vld [vmem:[#allocation9 + $0x2c8] sm:$0xff]  ;;  %v5637_v44 = vsel %vm581_vm2, %v554_v1, %v572_v61  ;;  %v609_v58 = vsel %vm581_vm2, %v572_v61, %v554_v1  ;;  %v555_v61 = vrot.slane %v5565_v5, 1 }
  0xd6   : > { %1212 = vmatmul.mubr.f32.gmra.mxu1 %v5573_v11  ;;  %1339 = vmatprep.subr.mxu0 %v8142_v0  ;;  %8286 = vst [vmem:[#allocation27_spill] sm:$0xff] %v5637_v44  ;;  %v5665_v1 = vsel %vm734_vm3, %v778_v51, %v609_v58  ;;  %v782_v58 = vrot.slane %v5568_v6, %v5227_v14 }
  0xd7   : > { %1216 = vmatprep.mubr.f32.mxu1 %v5580_v21  ;;  %1540 = vmatprep.subr.mxu1 %v8142_v0  ;;  %8290 = vst [vmem:[#allocation31_spill] sm:$0xff] %v5665_v1 }
  0xd8   : > { %992 = vmatmul.mubr.f32.gmra.mxu0 %v5535_v43  ;;  %1541 = vmatpush1.msra.mxu1 %v428_v27  ;;  %v481_v27 = vrot.slane %v5610_v62, 7 }
  0xd9   : > { %996 = vmatprep.mubr.f32.mxu0 %v5475_v3  ;;  %1340 = vmatpush2.msra.mxu0 %v416_v29  ;;  %v499_v29 = vrot.slane %v5613_v46, 7 }
  0xda   : > { %1217 = vmatmul.mubr.f32.gmra.mxu1 %v5591_v35  ;;  %1542 = vmatprep.subr.mxu1 %v8142_v0 }
  0xdb   : > { %1221 = vmatprep.mubr.f32.mxu1 %v5599_v41  ;;  %1543 = vmatpush1.msra.mxu1 %v427_v53  ;;  %v5644_v53 = vsel %vm508_vm0, %v480_v25, %v498_v26  ;;  %v5659_v25 = vld [vmem:[%s5125_s30 + $0xb8] sm:$0xff]  ;;  %v414_v26 = vld [vmem:[#allocation9 + $0x2c0] sm:$0xff] }
  0xdc   : > { %997 = vmatmul.mubr.f32.gmra.mxu0 %v5552_v57  ;;  %1341 = vmatprep.subr.mxu0 %v8142_v0  ;;  %8287 = vst [vmem:[#allocation28_spill] sm:$0xff] %v5644_v53  ;;  %8289 = vst [vmem:[#allocation30_spill] sm:$0xff] %v5659_v25  ;;  %v500_v51 = vrot.slane %v5659_v25, 7 }
  0xdd   : > { %1001 = vmatprep.mubr.f32.mxu0 %v5518_v31  ;;  %1544 = vmatprep.subr.mxu1 %v8142_v0 }
  0xde   : > { %1222 = vmatmul.mubr.f32.gmra.mxu1 %v5619_v47  ;;  %1342 = vmatpush2.msra.mxu0 %v415_v10  ;;  %v672_v10 = vrot.slane %v5610_v62, %v5206_v63  ;;  %v538_v47 = vsel %vm508_vm0, %v499_v29, %v481_v27 }
  0xdf   : > { %1226 = vmatprep.mubr.f32.mxu1 %v5626_v12  ;;  %1545 = vmatpush1.msra.mxu1 %v426_v13  ;;  %v424_v13 = vld [vmem:[#allocation9 + $0x310] sm:$0xff] }
  0xe0   : > { %1002 = vmatmul.mubr.f32.gmra.mxu0 %v5580_v21  ;;  %1546 = vmatprep.subr.mxu1 %v8142_v0  ;;  %v5656_v21 = vld [vmem:[%s5125_s30 + $0xb0] sm:$0xff] }
  0xe1   : > { %1006 = vmatprep.mubr.f32.mxu0 %v5521_v34  ;;  %1547 = vmatpush1.msra.mxu1 %v425_v37  ;;  %8288 = vst [vmem:[#allocation29_spill] sm:$0xff] %v5656_v21  ;;  %v573_v37 = vrot.slane %v5568_v6, 1  ;;  %v423_v34 = vld [vmem:[#allocation9 + $0x308] sm:$0xff]  ;;  %v482_v31 = vrot.slane %v5656_v21, 7 }
  0xe2   : > { %1227 = vmatmul.mubr.f32.gmra.mxu1 %v5637_v44  ;;  %1343 = vmatprep.subr.mxu0 %v8142_v0  ;;  %v5673_v44 = vsel %vm619_vm1, %v672_v10, %v538_v47  ;;  %v413_v10 = vld [vmem:[#allocation9 + $0x2b8] sm:$0xff] }
  0xe3   : > { %1231 = vmatprep.mubr.f32.mxu1 %v5644_v53  ;;  %1548 = vmatprep.subr.mxu1 %v8142_v0  ;;  %v5683_v47 = vsel %vm581_vm2, %v555_v61, %v573_v37 }
  0xe4   : > { %1007 = vmatmul.mubr.f32.gmra.mxu0 %v5599_v41  ;;  %1549 = vmatpush1.msra.mxu1 %v424_v13  ;;  %8291 = vst [vmem:[#allocation32_spill] sm:$0xff] %v5683_v47  ;;  %v5690_v13 = vsel %vm508_vm0, %v481_v27, %v499_v29  ;;  %v5703_v27 = vld [vmem:[%s5125_s30 + $0xc0] sm:$0xff]  ;;  %v5706_v29 = vld [vmem:[%s5125_s30 + $0xc8] sm:$0xff] }
  0xe5   : > { %1011 = vmatprep.mubr.f32.mxu0 %v5565_v5  ;;  %1344 = vmatpush2.msra.mxu0 %v414_v26  ;;  %8292 = vst [vmem:[#allocation33_spill] sm:$0xff] %v5690_v13  ;;  %v610_v26 = vsel %vm581_vm2, %v573_v37, %v555_v61  ;;  %v422_v5 = vld [vmem:[#allocation9 + $0x300] sm:$0xff]  ;;  %8294 = vst [vmem:[#allocation34_spill] sm:$0xff] %v5703_v27  ;;  %v453_v61 = vld [vmem:[#allocation9 + $0x3f8] sm:$0xff] }
  0xe6   : > { %1232 = vmatmul.mubr.f32.gmra.mxu1 %v5665_v1  ;;  %1550 = vmatprep.subr.mxu1 %v8142_v0  ;;  %v676_v0 = vrot.slane %v5656_v21, %v5206_v63  ;;  %v8293_v1 = vmov 0.0   ;;  %8295 = vst [vmem:[#allocation35_spill] sm:$0xff] %v5706_v29  ;;  %v5711_v37 = vsel %vm734_vm3, %v782_v58, %v610_v26  ;;  %v501_v58 = vrot.slane %v5706_v29, 7  ;;  %v452_v26 = vld [vmem:[#allocation9 + $0x3f0] sm:$0xff] }
  0xe7   : > { %1236 = vmatprep.mubr.f32.mxu1 %v5673_v44  ;;  %1551 = vmatpush1.msra.mxu1 %v423_v34  ;;  %v539_v34 = vsel %vm508_vm0, %v500_v51, %v482_v31  ;;  %8296 = vst [vmem:[#allocation36_spill] sm:$0xff] %v5711_v37 }
  0xe8   : > { %1012 = vmatmul.mubr.f32.gmra.mxu0 %v5626_v12  ;;  %1345 = vmatprep.subr.mxu0 %v8293_v1  ;;  %v574_v12 = vrot.slane %v5613_v46, 1 }
  0xe9   : > { %1016 = vmatprep.mubr.f32.mxu0 %v5568_v6  ;;  %1552 = vmatprep.subr.mxu1 %v8293_v1  ;;  %v556_v6 = vrot.slane %v5610_v62, 1 }
  0xea   : > { %1237 = vmatmul.mubr.f32.gmra.mxu1 %v5683_v47  ;;  %1346 = vmatpush2.msra.mxu0 %v413_v10  ;;  %v5718_v47 = vsel %vm619_vm1, %v676_v0, %v539_v34  ;;  %v483_v10 = vrot.slane %v5703_v27, 7  ;;  %v786_v34 = vrot.slane %v5613_v46, %v5227_v14 }
  0xeb   : > { %1241 = vmatprep.mubr.f32.mxu1 %v5690_v13  ;;  %1553 = vmatpush1.msra.mxu1 %v422_v5  ;;  %8297 = vst [vmem:[#allocation37_spill] sm:$0xff] %v5718_v47  ;;  %v412_v5 = vld [vmem:[#allocation9 + $0x2b0] sm:$0xff]  ;;  %v5729_v0 = vsel %vm581_vm2, %v556_v6, %v574_v12 }
  0xec   : > { %1017 = vmatmul.mubr.f32.gmra.mxu0 %v5644_v53  ;;  %1554 = vmatprep.subr.mxu1 %v8293_v1  ;;  %8298 = vst [vmem:[#allocation38_spill] sm:$0xff] %v5729_v0  ;;  %v451_v53 = vld [vmem:[#allocation9 + $0x3e8] sm:$0xff]  ;;  %v540_v41 = vsel %vm508_vm0, %v501_v58, %v483_v10 }
  0xed   : > { %1021 = vmatprep.mubr.f32.mxu0 %v5610_v62  ;;  %1555 = vmatpush2.msra.mxu1 %v453_v61  ;;  %v5737_v61 = vsel %vm508_vm0, %v482_v31, %v500_v51  ;;  %v680_v62 = vrot.slane %v5703_v27, %v5206_v63  ;;  %v5749_v31 = vld [vmem:[%s5125_s30 + $0xd0] sm:$0xff]  ;;  %v5752_v51 = vld [vmem:[%s5125_s30 + $0xd8] sm:$0xff] }
  0xee   : > { %1242 = vmatmul.mubr.f32.gmra.mxu1 %v5711_v37  ;;  %1347 = vmatprep.subr.mxu0 %v8293_v1  ;;  %8299 = vst [vmem:[#allocation39_spill] sm:$0xff] %v5737_v61  ;;  %v611_v37 = vsel %vm581_vm2, %v574_v12, %v556_v6  ;;  %8300 = vst [vmem:[#allocation40_spill] sm:$0xff] %v5749_v31  ;;  %v557_v12 = vrot.slane %v5656_v21, 1 }
  0xef   : > { %1246 = vmatprep.mubr.f32.mxu1 %v5718_v47  ;;  %1556 = vmatprep.subr.mxu1 %v8293_v1  ;;  %v5757_v6 = vsel %vm734_vm3, %v786_v34, %v611_v37  ;;  %v484_v37 = vrot.slane %v5749_v31, 7  ;;  %v502_v34 = vrot.slane %v5752_v51, 7 }
  0xf0   : > { %1022 = vmatmul.mubr.f32.gmra.mxu0 %v5673_v44  ;;  %1557 = vmatpush2.msra.mxu1 %v452_v26  ;;  %8301 = vst [vmem:[#allocation41_spill] sm:$0xff] %v5757_v6  ;;  %v575_v26 = vrot.slane %v5659_v25, 1 }
  0xf1   : > { %1026 = vmatprep.mubr.f32.mxu0 %v5613_v46  ;;  %1348 = vmatpush2.msra.mxu0 %v412_v5  ;;  %v411_v5 = vld [vmem:[#allocation9 + $0x2a8] sm:$0xff]  ;;  %v450_v46 = vld [vmem:[#allocation9 + $0x3e0] sm:$0xff] }
  0xf2   : > { %1247 = vmatmul.mubr.f32.gmra.mxu1 %v5729_v0  ;;  %1558 = vmatprep.subr.mxu1 %v8293_v1  ;;  %v5764_v0 = vsel %vm619_vm1, %v680_v62, %v540_v41  ;;  %v5775_v41 = vsel %vm581_vm2, %v557_v12, %v575_v26  ;;  %v790_v62 = vrot.slane %v5659_v25, %v5227_v14 }
  0xf3   : > { %1251 = vmatprep.mubr.f32.mxu1 %v5737_v61  ;;  %1559 = vmatpush2.msra.mxu1 %v451_v53  ;;  %8302 = vst [vmem:[#allocation42_spill] sm:$0xff] %v5764_v0  ;;  %v449_v53 = vld [vmem:[#allocation9 + $0x3d8] sm:$0xff]  ;;  %8303 = vst [vmem:[#allocation43_spill] sm:$0xff] %v5775_v41 }
  0xf4   : > { %1027 = vmatmul.mubr.f32.gmra.mxu0 %v5690_v13  ;;  %1349 = vmatprep.subr.mxu0 %v8293_v1  ;;  %v541_v13 = vsel %vm508_vm0, %v502_v34, %v484_v37 }
  0xf5   : > { %1031 = vmatprep.mubr.f32.mxu0 %v5656_v21  ;;  %1560 = vmatprep.subr.mxu1 %v8293_v1  ;;  %v5782_v21 = vsel %vm508_vm0, %v483_v10, %v501_v58  ;;  %v410_v10 = vld [vmem:[#allocation9 + $0x2a0] sm:$0xff] }
  0xf6   : > { %1252 = vmatmul.mubr.f32.gmra.mxu1 %v5757_v6  ;;  %1350 = vmatpush2.msra.mxu0 %v411_v5  ;;  %8304 = vst [vmem:[#allocation44_spill] sm:$0xff] %v5782_v21  ;;  %v612_v5 = vsel %vm581_vm2, %v575_v26, %v557_v12  ;;  %v684_v6 = vrot.slane %v5749_v31, %v5206_v63  ;;  %v5795_v58 = vld [vmem:[%s5125_s30 + $0xe0] sm:$0xff]  ;;  %v5798_v12 = vld [vmem:[%s5125_s30 + $0xe8] sm:$0xff] }
  0xf7   : > { %1256 = vmatprep.mubr.f32.mxu1 %v5764_v0  ;;  %1561 = vmatpush2.msra.mxu1 %v450_v46  ;;  %v448_v46 = vld [vmem:[#allocation9 + $0x3d0] sm:$0xff]  ;;  %v5803_v26 = vsel %vm734_vm3, %v790_v62, %v612_v5  ;;  %v485_v62 = vrot.slane %v5795_v58, 7  ;;  %v503_v5 = vrot.slane %v5798_v12, 7 }
  0xf8   : > { %1032 = vmatmul.mubr.f32.gmra.mxu0 %v5718_v47  ;;  %1562 = vmatprep.subr.mxu1 %v8293_v1  ;;  %8305 = vst [vmem:[#allocation45_spill] sm:$0xff] %v5803_v26  ;;  %v447_v47 = vld [vmem:[#allocation9 + $0x3c8] sm:$0xff] }
  0xf9   : > { %1036 = vmatprep.mubr.f32.mxu0 %v5659_v25  ;;  %1563 = vmatpush2.msra.mxu1 %v449_v53  ;;  %v558_v25 = vrot.slane %v5703_v27, 1  ;;  %v576_v53 = vrot.slane %v5706_v29, 1 }
  0xfa   : > { %1257 = vmatmul.mubr.f32.gmra.mxu1 %v5775_v41  ;;  %1351 = vmatprep.subr.mxu0 %v8293_v1  ;;  %v5811_v41 = vsel %vm619_vm1, %v684_v6, %v541_v13  ;;  %v794_v13 = vrot.slane %v5706_v29, %v5227_v14  ;;  %v409_v6 = vld [vmem:[#allocation9 + $0x298] sm:$0xff] }
  0xfb   : > { %1261 = vmatprep.mubr.f32.mxu1 %v5782_v21  ;;  %1564 = vmatprep.subr.mxu1 %v8293_v1 }
  0xfc   : > { %1037 = vmatmul.mubr.f32.gmra.mxu0 %v5737_v61  ;;  %1565 = vmatpush2.msra.mxu1 %v448_v46  ;;  %v5821_v61 = vsel %vm581_vm2, %v558_v25, %v576_v53  ;;  %v5828_v46 = vsel %vm508_vm0, %v484_v37, %v502_v34  ;;  %v445_v37 = vld [vmem:[#allocation9 + $0x3b8] sm:$0xff]  ;;  %v5841_v34 = vld [vmem:[%s5125_s30 + $0xf0] sm:$0xff] }
  0xfd   : > { %1041 = vmatprep.mubr.f32.mxu0 %v5703_v27  ;;  %1352 = vmatpush2.msra.mxu0 %v410_v10  ;;  %8306 = vst [vmem:[#allocation46_spill] sm:$0xff] %v5821_v61  ;;  %v613_v10 = vsel %vm581_vm2, %v576_v53, %v558_v25  ;;  %v446_v27 = vld [vmem:[#allocation9 + $0x3c0] sm:$0xff]  ;;  %v5844_v25 = vld [vmem:[%s5125_s30 + $0xf8] sm:$0xff] }
  0xfe   : > { %1262 = vmatmul.mubr.f32.gmra.mxu1 %v5803_v26  ;;  %1566 = vmatprep.subr.mxu1 %v8293_v1  ;;  %v688_v26 = vrot.slane %v5795_v58, %v5206_v63  ;;  %8307 = vst [vmem:[#allocation47_spill] sm:$0xff] %v5844_v25  ;;  %v5849_v53 = vsel %vm734_vm3, %v794_v13, %v613_v10  ;;  %v486_v13 = vrot.slane %v5841_v34, 7  ;;  %v504_v10 = vrot.slane %v5844_v25, 7 }
  0xff   : > { %1266 = vmatprep.mubr.f32.mxu1 %v5811_v41  ;;  %1567 = vmatpush2.msra.mxu1 %v447_v47  ;;  %v542_v47 = vsel %vm508_vm0, %v503_v5, %v485_v62  ;;  %8308 = vst [vmem:[#allocation48_spill] sm:$0xff] %v5849_v53 }
 0x100   : > { %1042 = vmatmul.mubr.f32.gmra.mxu0 %v5764_v0  ;;  %1353 = vmatprep.subr.mxu0 %v8293_v1  ;;  %v577_v0 = vrot.slane %v5752_v51, 1 }
 0x101   : > { %1046 = vmatprep.mubr.f32.mxu0 %v5706_v29  ;;  %1568 = vmatprep.subr.mxu1 %v8293_v1  ;;  %v559_v29 = vrot.slane %v5749_v31, 1 }
 0x102   : > { %1267 = vmatmul.mubr.f32.gmra.mxu1 %v5821_v61  ;;  %1354 = vmatpush2.msra.mxu0 %v409_v6  ;;  %v5856_v6 = vsel %vm619_vm1, %v688_v26, %v542_v47  ;;  %v444_v61 = vld [vmem:[#allocation9 + $0x3b0] sm:$0xff]  ;;  %v798_v47 = vrot.slane %v5752_v51, %v5227_v14 }
 0x103   : > { %1271 = vmatprep.mubr.f32.mxu1 %v5828_v46  ;;  %1569 = vmatpush2.msra.mxu1 %v446_v27  ;;  %v408_v27 = vld [vmem:[#allocation9 + $0x290] sm:$0xff]  ;;  %v5867_v26 = vsel %vm581_vm2, %v559_v29, %v577_v0  ;;  %v614_v25 = vsel %vm581_vm2, %v577_v0, %v559_v29  ;;  %v560_v0 = vrot.slane %v5795_v58, 1 }
 0x104   : > { %1047 = vmatmul.mubr.f32.gmra.mxu0 %v5782_v21  ;;  %1570 = vmatprep.subr.mxu1 %v8293_v1  ;;  %v543_v21 = vsel %vm508_vm0, %v504_v10, %v486_v13  ;;  %v5889_v29 = vsel %vm734_vm3, %v798_v47, %v614_v25  ;;  %v441_v25 = vld [vmem:[#allocation9 + $0x398] sm:$0xff] }
 0x105   : > { %1051 = vmatprep.mubr.f32.mxu0 %v5749_v31  ;;  %1571 = vmatpush2.msra.mxu1 %v445_v37  ;;  %v5875_v37 = vsel %vm508_vm0, %v485_v62, %v503_v5  ;;  %v692_v31 = vrot.slane %v5841_v34, %v5206_v63  ;;  %v407_v62 = vld [vmem:[#allocation9 + $0x288] sm:$0xff] }
 0x106   : > { %1272 = vmatmul.mubr.f32.gmra.mxu1 %v5849_v53  ;;  %1355 = vmatprep.subr.mxu0 %v8293_v1  ;;  %v443_v53 = vld [vmem:[#allocation9 + $0x3a8] sm:$0xff] }
 0x107   : > { %1276 = vmatprep.mubr.f32.mxu1 %v5856_v6  ;;  %1572 = vmatprep.subr.mxu1 %v8293_v1  ;;  %v5896_v5 = vsel %vm619_vm1, %v692_v31, %v543_v21  ;;  %v802_v21 = vrot.slane %v5798_v12, %v5227_v14  ;;  %v5913_v31 = vsel %vm508_vm0, %v486_v13, %v504_v10  ;;  %v439_v10 = vld [vmem:[#allocation9 + $0x388] sm:$0xff] }
 0x108   : > { %1052 = vmatmul.mubr.f32.gmra.mxu0 %v5811_v41  ;;  %1573 = vmatpush2.msra.mxu1 %v444_v61  ;;  %v578_v61 = vrot.slane %v5798_v12, 1 }
 0x109   : > { %1056 = vmatprep.mubr.f32.mxu0 %v5752_v51  ;;  %1356 = vmatpush2.msra.mxu0 %v408_v27  ;;  %v442_v27 = vld [vmem:[#allocation9 + $0x3a0] sm:$0xff] }
 0x10a   : > { %1277 = vmatmul.mubr.f32.gmra.mxu1 %v5867_v26  ;;  %1574 = vmatprep.subr.mxu1 %v8293_v1  ;;  %v615_v47 = vsel %vm581_vm2, %v578_v61, %v560_v0 }
 0x10b   : > { %1281 = vmatprep.mubr.f32.mxu1 %v5875_v37  ;;  %1575 = vmatpush2.msra.mxu1 %v443_v53  ;;  %v5905_v53 = vsel %vm581_vm2, %v560_v0, %v578_v61  ;;  %v5924_v13 = vsel %vm734_vm3, %v802_v21, %v615_v47  ;;  %v469_v0 = vld [vmem:[#allocation9 + $0x478] sm:$0xff]  ;;  %v438_v61 = vld [vmem:[#allocation9 + $0x380] sm:$0xff]  ;;  %v4794_v21 = vld [vmem:[%s5125_s30 + $0x10] sm:$0xff] }
 0x10c   : > { %1057 = vmatmul.mubr.f32.gmra.mxu0 %v5828_v46  ;;  %1357 = vmatprep.subr.mxu0 %v8293_v1  ;;  %v468_v47 = vld [vmem:[#allocation9 + $0x470] sm:$0xff] }
 0x10d   : > { %1061 = vmatprep.mubr.f32.mxu0 %v5795_v58  ;;  %1576 = vmatprep.subr.mxu1 %v8293_v1 }
 0x10e   : > { %1282 = vmatmul.mubr.f32.gmra.mxu1 %v5889_v29  ;;  %1358 = vmatpush2.msra.mxu0 %v407_v62  ;;  %v440_v62 = vld [vmem:[#allocation9 + $0x390] sm:$0xff] }
 0x10f   : > { %1286 = vmatprep.mubr.f32.mxu1 %v5896_v5  ;;  %1577 = vmatpush2.msra.mxu1 %v442_v27  ;;  %v406_v27 = vld [vmem:[#allocation9 + $0x280] sm:$0xff] }
 0x110   : > { %1062 = vmatmul.mubr.f32.gmra.mxu0 %v5856_v6  ;;  %1578 = vmatprep.subr.mxu1 %v8293_v1 }
 0x111   : > { %1066 = vmatprep.mubr.f32.mxu0 %v5798_v12  ;;  %1579 = vmatpush2.msra.mxu1 %v441_v25  ;;  %v4793_v25 = vld [vmem:[%s5125_s30] sm:$0xff] }
 0x112   : > { %1287 = vmatmul.mubr.f32.gmra.mxu1 %v5905_v53  ;;  %1359 = vmatprep.subr.mxu0 %v8293_v1 }
 0x113   : > { %1291 = vmatprep.mubr.f32.mxu1 %v5913_v31  ;;  %1580 = vmatprep.subr.mxu1 %v8293_v1 }
 0x114   : > { %1067 = vmatmul.mubr.f32.gmra.mxu0 %v5875_v37  ;;  %1581 = vmatpush2.msra.mxu1 %v440_v62  ;;  %v4795_v62 = vld [vmem:[%s5125_s30 + $0x18] sm:$0xff] }
 0x115   : > { %1360 = vmatpush2.msra.mxu0 %v406_v27  ;;  %1582 = vmatprep.subr.mxu1 %v8293_v1  ;;  %v4796_v27 = vld [vmem:[%s5125_s30 + $0x8] sm:$0xff] }
 0x116   : > { %1292 = vmatmul.mubr.f32.gmra.mxu1 %v5924_v13  ;;  %1361 = vmatprep.mubr.f32.mxu0 %v5289_v39  ;;  %v467_v39 = vld [vmem:[#allocation9 + $0x468] sm:$0xff] }
 0x117   : > { %1583 = vmatpush2.msra.mxu1 %v439_v10  ;;  %4557 = vmatprep.subr.mxu0 %v469_v0  ;;  %v466_v10 = vld [vmem:[#allocation9 + $0x460] sm:$0xff] }
 0x118   : > { %1362 = vmatmul.mubr.f32.vlgmr.msra.gmra.mxu0 %v4793_v25  ;;  %1584 = vmatprep.subr.mxu1 %v8293_v1  ;;  %v463_v25 = vld [vmem:[#allocation9 + $0x448] sm:$0xff] }
 0x119   : > { %1585 = vmatpush2.msra.mxu1 %v438_v61  ;;  %1586 = vmatprep.mubr.f32.mxu1 %v4794_v21  ;;  %v4797_v61 = vld [vmem:[%s5125_s30 + $0x20] sm:$0xff] }
 0x11a   : > { %4558 = vmatpush3.msra.mxu0 %v469_v0  ;;  %1587 = vmatmul.mubr.f32.vlgmr.msra.gmra.mxu1 %v5241_v20  ;;  %v465_v20 = vld [vmem:[#allocation9 + $0x458] sm:$0xff]  ;;  %v4798_v0 = vld [vmem:[%s5125_s30 + $0x28] sm:$0xff] }
 0x11b   : > { %1366 = vmatprep.mubr.f32.mxu0 %v5312_v48  ;;  %1591 = vmatprep.mubr.f32.mxu1 %v4795_v62  ;;  %v464_v48 = vld [vmem:[#allocation9 + $0x450] sm:$0xff] }
 0x11c   : > { %1367 = vmatmul.mubr.f32.gmra.mxu0 %v4796_v27  ;;  %4559 = vmatprep.subr.mxu0 %v468_v47  ;;  %v457_v27 = vld [vmem:[#allocation9 + $0x418] sm:$0xff] }
 0x11d   : > { %1371 = vmatprep.mubr.f32.mxu0 %v5250_v23  ;;  %4560 = vmatpush3.msra.mxu0 %v468_v47  ;;  %v461_v47 = vld [vmem:[#allocation9 + $0x438] sm:$0xff] }
 0x11e   : > { %1592 = vmatmul.mubr.f32.gmra.mxu1 %v5263_v28  ;;  %4561 = vmatprep.subr.mxu0 %v467_v39  ;;  %v462_v28 = vld [vmem:[#allocation9 + $0x440] sm:$0xff] }
 0x11f   : > { %1596 = vmatprep.mubr.f32.mxu1 %v4797_v61  ;;  %4562 = vmatpush3.msra.mxu0 %v467_v39  ;;  %v459_v39 = vld [vmem:[#allocation9 + $0x428] sm:$0xff] }
 0x120   : > { %1372 = vmatmul.mubr.f32.gmra.mxu0 %v4794_v21  ;;  %4563 = vmatprep.subr.mxu0 %v466_v10  ;;  %v4799_v21 = vld [vmem:[%s5125_s30 + $0x30] sm:$0xff] }
 0x121   : > { %1376 = vmatprep.mubr.f32.mxu0 %v5275_v32  ;;  %4564 = vmatpush3.msra.mxu0 %v466_v10  ;;  %v4801_v10 = vld [vmem:[%s5125_s30 + $0x48] sm:$0xff] }
 0x122   : > { %1597 = vmatmul.mubr.f32.gmra.mxu1 %v5316_v49  ;;  %4565 = vmatprep.subr.mxu0 %v465_v20  ;;  %v460_v49 = vld [vmem:[#allocation9 + $0x430] sm:$0xff] }
 0x123   : > { %1601 = vmatprep.mubr.f32.mxu1 %v4798_v0  ;;  %4566 = vmatpush3.msra.mxu0 %v465_v20 }
 0x124   : > { %1377 = vmatmul.mubr.f32.gmra.mxu0 %v4795_v62  ;;  %4567 = vmatprep.subr.mxu0 %v464_v48  ;;  %v4800_v62 = vld [vmem:[%s5125_s30 + $0x38] sm:$0xff] }
 0x125   : > { %1381 = vmatprep.mubr.f32.mxu0 %v5361_v7  ;;  %4568 = vmatpush3.msra.mxu0 %v464_v48  ;;  %v8318_v48 = vld [vmem:[#allocation20_spill] sm:$0xff] }
 0x126   : > { %1602 = vmatmul.mubr.f32.gmra.mxu1 %v5328_v55  ;;  %4569 = vmatprep.subr.mxu0 %v463_v25  ;;  %v458_v55 = vld [vmem:[#allocation9 + $0x420] sm:$0xff] }
 0x127   : > { %1606 = vmatprep.mubr.f32.mxu1 %v4799_v21  ;;  %4570 = vmatpush3.msra.mxu0 %v463_v25  ;;  %v8319_v25 = vld [vmem:[#allocation32_spill] sm:$0xff] }
 0x128   : > { %1382 = vmatmul.mubr.f32.gmra.mxu0 %v4797_v61  ;;  %4571 = vmatprep.subr.mxu0 %v462_v28  ;;  %v455_v61 = vld [vmem:[#allocation9 + $0x408] sm:$0xff] }
 0x129   : > { %1386 = vmatprep.mubr.f32.mxu0 %v5389_v18  ;;  %4572 = vmatpush3.msra.mxu0 %v462_v28 }
 0x12a   : > { %1607 = vmatmul.mubr.f32.gmra.mxu1 %v5350_v59  ;;  %4573 = vmatprep.subr.mxu0 %v461_v47  ;;  %v456_v59 = vld [vmem:[#allocation9 + $0x410] sm:$0xff] }
 0x12b   : > { %1611 = vmatprep.mubr.f32.mxu1 %v4800_v62  ;;  %4574 = vmatpush3.msra.mxu0 %v461_v47  ;;  %v8320_v47 = vld [vmem:[#allocation28_spill] sm:$0xff] }
 0x12c   : > { %1387 = vmatmul.mubr.f32.gmra.mxu0 %v4798_v0  ;;  %4575 = vmatprep.subr.mxu0 %v460_v49 }
 0x12d   : > { %1391 = vmatprep.mubr.f32.mxu0 %v5407_v30  ;;  %4576 = vmatpush3.msra.mxu0 %v460_v49 }
 0x12e   : > { %1612 = vmatmul.mubr.f32.gmra.mxu1 %v5368_v9  ;;  %4577 = vmatprep.subr.mxu0 %v459_v39  ;;  %v4802_v9 = vld [vmem:[%s5125_s30 + $0x40] sm:$0xff] }
 0x12f   : > { %1616 = vmatprep.mubr.f32.mxu1 %v5338_v60  ;;  %4578 = vmatpush3.msra.mxu0 %v459_v39  ;;  %v454_v60 = vld [vmem:[#allocation9 + $0x400] sm:$0xff] }
 0x130   : > { %1392 = vmatmul.mubr.f32.gmra.mxu0 %v4799_v21  ;;  %4579 = vmatprep.subr.mxu0 %v458_v55 }
 0x131   : > { %1396 = vmatprep.mubr.f32.mxu0 %v5435_v42  ;;  %4580 = vmatpush3.msra.mxu0 %v458_v55 }
 0x132   : > { %1617 = vmatmul.mubr.f32.gmra.mxu1 %v5396_v24  ;;  %4581 = vmatprep.subr.mxu0 %v457_v27  ;;  %v4803_v24 = vld [vmem:[%s5125_s30 + $0x58] sm:$0xff] }
 0x133   : > { %1621 = vmatprep.mubr.f32.mxu1 %v4801_v10  ;;  %4582 = vmatpush3.msra.mxu0 %v457_v27  ;;  %v8322_v27 = vld [vmem:[#allocation36_spill] sm:$0xff] }
 0x134   : > { %1397 = vmatmul.mubr.f32.gmra.mxu0 %v4800_v62  ;;  %4583 = vmatprep.subr.mxu0 %v456_v59  ;;  %v8321_v62 = vld [vmem:[#allocation23_spill] sm:$0xff] }
 0x135   : > { %1401 = vmatprep.mubr.f32.mxu0 %v5453_v52  ;;  %4584 = vmatpush3.msra.mxu0 %v456_v59 }
 0x136   : > { %1622 = vmatmul.mubr.f32.gmra.mxu1 %v5414_v33  ;;  %4585 = vmatprep.subr.mxu0 %v455_v61  ;;  %v8311_v33 = vld [vmem:[#allocation21_spill] sm:$0xff] }
 0x137   : > { %1626 = vmatprep.mubr.f32.mxu1 %v5380_v15  ;;  %4586 = vmatpush3.msra.mxu0 %v455_v61 }
 0x138   : > { %1402 = vmatmul.mubr.f32.gmra.mxu0 %v4802_v9  ;;  %4587 = vmatprep.subr.mxu0 %v454_v60 }
 0x139   : > { %1406 = vmatprep.mubr.f32.mxu0 %v5481_v4  ;;  %4588 = vmatpush3.msra.mxu0 %v454_v60  ;;  %v8323_v60 = vld [vmem:[#allocation24_spill] sm:$0xff] }
 0x13a   : > { %1627 = vmatmul.mubr.f32.gmra.mxu1 %v5442_v45  ;;  %2852 = vmatprep.subr.mxu1 %v8293_v1  ;;  %v8313_v45 = vld [vmem:[#allocation27_spill] sm:$0xff] }
 0x13b   : > { %1631 = vmatprep.mubr.f32.mxu1 %v5383_v16  ;;  %3077 = vmatprep.subr.mxu0 %v8293_v1  ;;  %v8310_v16 = vld [vmem:[#allocation25_spill] sm:$0xff] }
 0x13c   : > { %1407 = vmatmul.mubr.f32.gmra.mxu0 %v4801_v10 }
 0x13d   : > { %1411 = vmatprep.mubr.f32.mxu0 %v5499_v17 }
 0x13e   : > { %1632 = vmatmul.mubr.f32.gmra.mxu1 %v5461_v56  ;;  %v8314_v56 = vld [vmem:[#allocation22_spill] sm:$0xff] }
 0x13f   : > { %1636 = vmatprep.mubr.f32.mxu1 %v5426_v38 }
 0x140   : > { %1412 = vmatmul.mubr.f32.gmra.mxu0 %v5380_v15  ;;  %v8309_v15 = vld [vmem:[#allocation17_spill] sm:$0xff] }
 0x141   : > { %1416 = vmatprep.mubr.f32.mxu0 %v5527_v36 }
 0x142   : > { %1637 = vmatmul.mubr.f32.gmra.mxu1 %v5488_v8 }
 0x143   : > { %1641 = vmatprep.mubr.f32.mxu1 %v5429_v40 }
 0x144   : > { %1417 = vmatmul.mubr.f32.gmra.mxu0 %v4803_v24 }
 0x145   : > { %1421 = vmatprep.mubr.f32.mxu0 %v5545_v50 }
 0x146   : > { %1642 = vmatmul.mubr.f32.gmra.mxu1 %v5506_v22  ;;  %v8316_v22 = vld [vmem:[#allocation31_spill] sm:$0xff] }
 0x147   : > { %1646 = vmatprep.mubr.f32.mxu1 %v5472_v2 }
 0x148   : > { %1422 = vmatmul.mubr.f32.gmra.mxu0 %v5426_v38  ;;  %v8312_v38 = vld [vmem:[#allocation18_spill] sm:$0xff] }
 0x149   : > { %1426 = vmatprep.mubr.f32.mxu0 %v5573_v11 }
 0x14a   : > { %1647 = vmatmul.mubr.f32.gmra.mxu1 %v5535_v43 }
 0x14b   : > { %1651 = vmatprep.mubr.f32.mxu1 %v5475_v3 }
 0x14c   : > { %1427 = vmatmul.mubr.f32.gmra.mxu0 %v5429_v40  ;;  %v8315_v40 = vld [vmem:[#allocation19_spill] sm:$0xff] }
 0x14d   : > { %1431 = vmatprep.mubr.f32.mxu0 %v5591_v35 }
 0x14e   : > { %1652 = vmatmul.mubr.f32.gmra.mxu1 %v5552_v57  ;;  %v8317_v57 = vld [vmem:[#allocation26_spill] sm:$0xff] }
 0x14f   : > { %1656 = vmatprep.mubr.f32.mxu1 %v8309_v15 }
 0x150   : > { %1432 = vmatmul.mubr.f32.gmra.mxu0 %v5472_v2 }
 0x151   : > { %1436 = vmatprep.mubr.f32.mxu0 %v8310_v16 }
 0x152   : > { %1657 = vmatmul.mubr.f32.gmra.mxu1 %v8311_v33 }
 0x153   : > { %1661 = vmatprep.mubr.f32.mxu1 %v8312_v38 }
 0x154   : > { %1437 = vmatmul.mubr.f32.gmra.mxu0 %v5475_v3 }
 0x155   : > { %1441 = vmatprep.mubr.f32.mxu0 %v8313_v45 }
 0x156   : > { %1662 = vmatmul.mubr.f32.gmra.mxu1 %v8314_v56  ;;  %v8325_v56 = vld [vmem:[#allocation33_spill] sm:$0xff] }
 0x157   : > { %1666 = vmatprep.mubr.f32.mxu1 %v8315_v40 }
 0x158   : > { %v913_v8 = vpop.f32.mrf.mxu0  ;;  %1442 = vmatmul.mubr.f32.gmra.mxu0 %v8309_v15  ;;  %v8324_v15 = vld [vmem:[#allocation38_spill] sm:$0xff] }
 0x159   : > { %1446 = vmatprep.mubr.f32.mxu0 %v8316_v22 }
 0x15a   : > { %v1138_v2 = vpop.f32.mrf.mxu1  ;;  %v915_v43 = vpop.f32.mrf.mxu0  ;;  %1667 = vmatmul.mubr.f32.gmra.mxu1 %v8317_v57 }
 0x15b   : > { %v5994_v20 = vadd.f32 %v1138_v2, %v913_v8  ;;  %1671 = vmatprep.mubr.f32.mxu1 %v8318_v48  ;;  %v8326_v8 = vld [vmem:[#allocation29_spill] sm:$0xff] }
 0x15c   : > { %v1140_v3 = vpop.f32.mrf.mxu1  ;;  %v918_v0 = vpop.f32.mrf.mxu0  ;;  %1447 = vmatmul.mubr.f32.gmra.mxu0 %v8312_v38  ;;  %v8327_v43 = vld [vmem:[#allocation41_spill] sm:$0xff] }
 0x15d   : > { %1451 = vmatprep.mubr.f32.mxu0 %v8319_v25 }
 0x15e   : > { %v1143_v28 = vpop.f32.mrf.mxu1  ;;  %v920_v21 = vpop.f32.mrf.mxu0  ;;  %1672 = vmatmul.mubr.f32.gmra.mxu1 %v8320_v47 }
 0x15f   : > { %v6000_v49 = vadd.f32 %v1143_v28, %v918_v0  ;;  %1676 = vmatprep.mubr.f32.mxu1 %v8321_v62  ;;  %v8328_v0 = vld [vmem:[#allocation37_spill] sm:$0xff]  ;;  %v8329_v28 = vld [vmem:[#allocation30_spill] sm:$0xff] }
 0x160   : > { %v1145_v39 = vpop.f32.mrf.mxu1  ;;  %v923_v55 = vpop.f32.mrf.mxu0  ;;  %1452 = vmatmul.mubr.f32.gmra.mxu0 %v8315_v40 }
 0x161   : > { %1456 = vmatprep.mubr.f32.mxu0 %v8322_v27  ;;  %v8330_v39 = vld [vmem:[#allocation43_spill] sm:$0xff] }
 0x162   : > { %v1148_v59 = vpop.f32.mrf.mxu1  ;;  %v925_v10 = vpop.f32.mrf.mxu0  ;;  %1677 = vmatmul.mubr.f32.gmra.mxu1 %v5673_v44 }
 0x163   : > { %v6006_v61 = vadd.f32 %v1148_v59, %v923_v55  ;;  %1681 = vmatprep.mubr.f32.mxu1 %v8323_v60  ;;  %v8331_v10 = vld [vmem:[#allocation39_spill] sm:$0xff] }
 0x164   : > { %v1150_v9 = vpop.f32.mrf.mxu1  ;;  %v928_v24 = vpop.f32.mrf.mxu0  ;;  %1457 = vmatmul.mubr.f32.gmra.mxu0 %v8318_v48 }
 0x165   : > { %1461 = vmatprep.mubr.f32.mxu0 %v8324_v15  ;;  %v8332_v9 = vld [vmem:[#allocation34_spill] sm:$0xff] }
 0x166   : > { %v1153_v33 = vpop.f32.mrf.mxu1  ;;  %v930_v38 = vpop.f32.mrf.mxu0  ;;  %1682 = vmatmul.mubr.f32.gmra.mxu1 %v8325_v56 }
 0x167   : > { %v6012_v40 = vadd.f32 %v1153_v33, %v928_v24  ;;  %1686 = vmatprep.mubr.f32.mxu1 %v8326_v8  ;;  %v8333_v38 = vld [vmem:[#allocation45_spill] sm:$0xff] }
 0x168   : > { %v1155_v2 = vpop.f32.mrf.mxu1  ;;  %v933_v44 = vpop.f32.mrf.mxu0  ;;  %1462 = vmatmul.mubr.f32.gmra.mxu0 %v8321_v62 }
 0x169   : > { %1466 = vmatprep.mubr.f32.mxu0 %v8327_v43 }
 0x16a   : > { %v1158_v57 = vpop.f32.mrf.mxu1  ;;  %v935_v3 = vpop.f32.mrf.mxu0  ;;  %1687 = vmatmul.mubr.f32.gmra.mxu1 %v8328_v0 }
 0x16b   : > { %v6018_v48 = vadd.f32 %v1158_v57, %v933_v44  ;;  %1691 = vmatprep.mubr.f32.mxu1 %v8329_v28  ;;  %v8334_v44 = vld [vmem:[#allocation42_spill] sm:$0xff]  ;;  %v8335_v57 = vld [vmem:[#allocation35_spill] sm:$0xff] }
 0x16c   : > { %v1160_v21 = vpop.f32.mrf.mxu1  ;;  %v938_v47 = vpop.f32.mrf.mxu0  ;;  %1467 = vmatmul.mubr.f32.gmra.mxu0 %v8323_v60 }
 0x16d   : > { %1471 = vmatprep.mubr.f32.mxu0 %v8330_v39  ;;  %v8336_v21 = vld [vmem:[#allocation46_spill] sm:$0xff] }
 0x16e   : > { %v1163_v55 = vpop.f32.mrf.mxu1  ;;  %v940_v59 = vpop.f32.mrf.mxu0  ;;  %1692 = vmatmul.mubr.f32.gmra.mxu1 %v8331_v10  ;;  %v8338_v10 = vld [vmem:[#allocation40_spill] sm:$0xff] }
 0x16f   : > { %v6024_v62 = vadd.f32 %v1163_v55, %v938_v47  ;;  %1696 = vmatprep.mubr.f32.mxu1 %v8332_v9  ;;  %v8337_v59 = vld [vmem:[#allocation44_spill] sm:$0xff] }
 0x170   : > { %v1165_v24 = vpop.f32.mrf.mxu1  ;;  %v943_v33 = vpop.f32.mrf.mxu0  ;;  %1472 = vmatmul.mubr.f32.gmra.mxu0 %v8326_v8 }
 0x171   : > { %1476 = vmatprep.mubr.f32.mxu0 %v8333_v38 }
 0x172   : > { %v1168_v56 = vpop.f32.mrf.mxu1  ;;  %v945_v2 = vpop.f32.mrf.mxu0  ;;  %1697 = vmatmul.mubr.f32.gmra.mxu1 %v8334_v44 }
 0x173   : > { %v6030_v60 = vadd.f32 %v1168_v56, %v943_v33  ;;  %1701 = vmatprep.mubr.f32.mxu1 %v8335_v57  ;;  %v8339_v33 = vld [vmem:[#allocation48_spill] sm:$0xff] }
 0x174   : > { %v1170_v3 = vpop.f32.mrf.mxu1  ;;  %v948_v0 = vpop.f32.mrf.mxu0  ;;  %1477 = vmatmul.mubr.f32.gmra.mxu0 %v8329_v28 }
 0x175   : > { %1481 = vmatprep.mubr.f32.mxu0 %v8336_v21 }
 0x176   : > { %v1173_v47 = vpop.f32.mrf.mxu1  ;;  %v950_v55 = vpop.f32.mrf.mxu0  ;;  %1702 = vmatmul.mubr.f32.gmra.mxu1 %v8337_v59 }
 0x177   : > { %v6036_v8 = vadd.f32 %v1173_v47, %v948_v0  ;;  %1706 = vmatprep.mubr.f32.mxu1 %v8338_v10 }
 0x178   : > { %v1175_v24 = vpop.f32.mrf.mxu1  ;;  %v953_v2 = vpop.f32.mrf.mxu0  ;;  %1482 = vmatmul.mubr.f32.gmra.mxu0 %v8332_v9 }
 0x179   : > { %1486 = vmatprep.mubr.f32.mxu0 %v8339_v33 }
 0x17a   : > { %v1178_v56 = vpop.f32.mrf.mxu1  ;;  %v955_v44 = vpop.f32.mrf.mxu0  ;;  %1707 = vmatmul.mubr.f32.gmra.mxu1 %v5811_v41 }
 0x17b   : > { %v6042_v28 = vadd.f32 %v1178_v56, %v953_v2  ;;  %1711 = vmatprep.mubr.f32.mxu1 %v5752_v51 }
 0x17c   : > { %v1180_v3 = vpop.f32.mrf.mxu1  ;;  %v958_v55 = vpop.f32.mrf.mxu0  ;;  %1487 = vmatmul.mubr.f32.gmra.mxu0 %v8335_v57 }
 0x17d   : > { %1491 = vmatprep.mubr.f32.mxu0 %v5867_v26 }
 0x17e   : > { %v1183_v0 = vpop.f32.mrf.mxu1  ;;  %v960_v47 = vpop.f32.mrf.mxu0  ;;  %1712 = vmatmul.mubr.f32.gmra.mxu1 %v5828_v46 }
 0x17f   : > { %v6048_v9 = vadd.f32 %v1183_v0, %v958_v55  ;;  %1716 = vmatprep.mubr.f32.mxu1 %v5795_v58  ;;  %v8340_v55 = vld [vmem:[#allocation47_spill] sm:$0xff] }
 0x180   : > { %v1185_v59 = vpop.f32.mrf.mxu1  ;;  %v963_v41 = vpop.f32.mrf.mxu0  ;;  %1492 = vmatmul.mubr.f32.gmra.mxu0 %v8338_v10  ;;  %v561_v10 = vrot.slane %v5841_v34, 1  ;;  %v579_v0 = vrot.slane %v8340_v55, 1 }
 0x181   : > { %1496 = vmatprep.mubr.f32.mxu0 %v5889_v29 }
 0x182   : > { %v1188_v24 = vpop.f32.mrf.mxu1  ;;  %v965_v2 = vpop.f32.mrf.mxu0  ;;  %1717 = vmatmul.mubr.f32.gmra.mxu1 %v5856_v6 }
 0x183   : > { %v6054_v57 = vadd.f32 %v1188_v24, %v963_v41  ;;  %1721 = vmatprep.mubr.f32.mxu1 %v5798_v12  ;;  %v6070_v2 = vsel %vm581_vm2, %v561_v10, %v579_v0 }
 0x184   : > { %v1190_v56 = vpop.f32.mrf.mxu1  ;;  %v968_v46 = vpop.f32.mrf.mxu0  ;;  %1497 = vmatmul.mubr.f32.gmra.mxu0 %v5752_v51 }
 0x185   : > { %1501 = vmatprep.mubr.f32.mxu0 %v5905_v53  ;;  %v806_v56 = vrot.slane %v8340_v55, %v5227_v14 }
 0x186   : > { %v1193_v44 = vpop.f32.mrf.mxu1  ;;  %v970_v3 = vpop.f32.mrf.mxu0  ;;  %1722 = vmatmul.mubr.f32.gmra.mxu1 %v5875_v37 }
 0x187   : > { %v6062_v47 = vadd.f32 %v1193_v44, %v968_v46  ;;  %1726 = vmatprep.mubr.f32.mxu1 %v5841_v34  ;;  %v616_v44 = vsel %vm581_vm2, %v579_v0, %v561_v10 }
 0x188   : > { %v1195_v59 = vpop.f32.mrf.mxu1  ;;  %v973_v41 = vpop.f32.mrf.mxu0  ;;  %1502 = vmatmul.mubr.f32.gmra.mxu0 %v5795_v58  ;;  %v6084_v14 = vsel %vm734_vm3, %v806_v56, %v616_v44 }
 0x189   : > { %1506 = vmatprep.mubr.f32.mxu0 %v5924_v13 }
 0x18a   : > { %v1198_v51 = vpop.f32.mrf.mxu1  ;;  %v975_v24 = vpop.f32.mrf.mxu0  ;;  %1727 = vmatmul.mubr.f32.gmra.mxu1 %v5896_v5 }
 0x18b   : > { %v6074_v46 = vadd.f32 %v1198_v51, %v973_v41  ;;  %1731 = vmatprep.mubr.f32.mxu1 %v8340_v55 }
 0x18c   : > { %v1200_v3 = vpop.f32.mrf.mxu1  ;;  %v978_v59 = vpop.f32.mrf.mxu0  ;;  %1507 = vmatmul.mubr.f32.gmra.mxu0 %v5798_v12 }
 0x18d   : > { %1511 = vmatprep.mubr.f32.mxu0 %v6070_v2 }
 0x18e   : > { %v1203_v5 = vpop.f32.mrf.mxu1  ;;  %v980_v24 = vpop.f32.mrf.mxu0  ;;  %1732 = vmatmul.mubr.f32.gmra.mxu1 %v5913_v31 }
 0x18f   : > { %v6086_v41 = vadd.f32 %v1203_v5, %v978_v59  ;;  %1736 = vmatprep.mubr.f32.mxu1 %v5795_v58 }
 0x190   : > { %v1205_v51 = vpop.f32.mrf.mxu1  ;;  %v983_v10 = vpop.f32.mrf.mxu0  ;;  %1512 = vmatmul.mubr.f32.gmra.mxu0 %v5841_v34 }
 0x191   : > { %1516 = vmatprep.mubr.f32.mxu0 %v6084_v14 }
 0x192   : > { %v1208_v0 = vpop.f32.mrf.mxu1  ;;  %v985_v3 = vpop.f32.mrf.mxu0  ;;  %1737 = vmatmul.mubr.f32.gmra.mxu1 %v5856_v6 }
 0x193   : > { %v6092_v24 = vadd.f32 %v1208_v0, %v983_v10  ;;  %1741 = vmatprep.mubr.f32.mxu1 %v5798_v12 }
 0x194   : > { %v1210_v31 = vpop.f32.mrf.mxu1  ;;  %v988_v56 = vpop.f32.mrf.mxu0  ;;  %1517 = vmatmul.mubr.f32.gmra.mxu0 %v8340_v55 }
 0x195   : > { %4589 = vmatprep.mubr.f32.mxu0 %v5250_v23 }
 0x196   : > { %v1213_v58 = vpop.f32.mrf.mxu1  ;;  %v990_v44 = vpop.f32.mrf.mxu0  ;;  %1742 = vmatmul.mubr.f32.gmra.mxu1 %v5875_v37 }
 0x197   : > { %v6098_v34 = vadd.f32 %v1213_v58, %v988_v56 }
 0x198   : > { %v1215_v59 = vpop.f32.mrf.mxu1  ;;  %v993_v5 = vpop.f32.mrf.mxu0  ;;  %4590 = vmatmul.mubr.f32.vlgmr.msra.gmra.mxu0 %v5275_v32 }
 0x199   : > { %4592 = vmatprep.mubr.f32.mxu0 %v5361_v7 }
 0x19a   : > { %v1218_v6 = vpop.f32.mrf.mxu1  ;;  %v995_v12 = vpop.f32.mrf.mxu0 }
 0x19b   : > { %v6102_v51 = vadd.f32 %v1218_v6, %v993_v5 }
 0x19c   : > { %v1220_v10 = vpop.f32.mrf.mxu1  ;;  %v998_v55 = vpop.f32.mrf.mxu0  ;;  %4593 = vmatmul.mubr.f32.gmra.mxu0 %v5389_v18 }
 0x19d   : > { %4595 = vmatprep.mubr.f32.mxu0 %v5407_v30 }
 0x19e   : > { %v1223_v23 = vpop.f32.mrf.mxu1  ;;  %v1000_v37 = vpop.f32.mrf.mxu0 }
 0x19f   : > { %v6106_v0 = vadd.f32 %v1223_v23, %v998_v55 }
 0x1a0   : > { %v1225_v3 = vpop.f32.mrf.mxu1  ;;  %v1003_v31 = vpop.f32.mrf.mxu0  ;;  %4596 = vmatmul.mubr.f32.gmra.mxu0 %v5435_v42 }
 0x1a1   : > { %4598 = vmatprep.mubr.f32.mxu0 %v5453_v52 }
 0x1a2   : > { %v1228_v32 = vpop.f32.mrf.mxu1  ;;  %v1005_v7 = vpop.f32.mrf.mxu0 }
 0x1a3   : > { %v6110_v56 = vadd.f32 %v1228_v32, %v1003_v31 }
 0x1a4   : > { %v1230_v58 = vpop.f32.mrf.mxu1  ;;  %v1008_v44 = vpop.f32.mrf.mxu0  ;;  %4599 = vmatmul.mubr.f32.gmra.mxu0 %v5481_v4 }
 0x1a5   : > { %4601 = vmatprep.mubr.f32.mxu0 %v5499_v17 }
 0x1a6   : > { %v1233_v18 = vpop.f32.mrf.mxu1  ;;  %v1010_v30 = vpop.f32.mrf.mxu0 }
 0x1a7   : > { %v6114_v59 = vadd.f32 %v1233_v18, %v1008_v44 }
 0x1a8   : > { %v1235_v5 = vpop.f32.mrf.mxu1  ;;  %v1013_v6 = vpop.f32.mrf.mxu0  ;;  %4602 = vmatmul.mubr.f32.gmra.mxu0 %v5527_v36 }
 0x1a9   : > { %4604 = vmatprep.mubr.f32.mxu0 %v5545_v50 }
 0x1aa   : > { %v1238_v42 = vpop.f32.mrf.mxu1  ;;  %v1015_v52 = vpop.f32.mrf.mxu0 }
 0x1ab   : > { %v6118_v12 = vadd.f32 %v1238_v42, %v1013_v6 }
 0x1ac   : > { %v1240_v10 = vpop.f32.mrf.mxu1  ;;  %v1018_v55 = vpop.f32.mrf.mxu0  ;;  %4605 = vmatmul.mubr.f32.gmra.mxu0 %v5573_v11 }
 0x1ad   : > { %4607 = vmatprep.mubr.f32.mxu0 %v5591_v35 }
 0x1ae   : > { %v1243_v4 = vpop.f32.mrf.mxu1  ;;  %v1020_v17 = vpop.f32.mrf.mxu0 }
 0x1af   : > { %v6122_v23 = vadd.f32 %v1243_v4, %v1018_v55 }
 0x1b0   : > { %v1245_v37 = vpop.f32.mrf.mxu1  ;;  %v1023_v3 = vpop.f32.mrf.mxu0  ;;  %4608 = vmatmul.mubr.f32.gmra.mxu0 %v8310_v16 }
 0x1b1   : > { %4610 = vmatprep.mubr.f32.mxu0 %v8313_v45 }
 0x1b2   : > { %v1248_v36 = vpop.f32.mrf.mxu1  ;;  %v1025_v50 = vpop.f32.mrf.mxu0 }
 0x1b3   : > { %v6126_v31 = vadd.f32 %v1248_v36, %v1023_v3 }
 0x1b4   : > { %v1250_v32 = vpop.f32.mrf.mxu1  ;;  %v1028_v7 = vpop.f32.mrf.mxu0  ;;  %4611 = vmatmul.mubr.f32.gmra.mxu0 %v8316_v22 }
 0x1b5   : > { %4613 = vmatprep.mubr.f32.mxu0 %v8319_v25 }
 0x1b6   : > { %v1253_v11 = vpop.f32.mrf.mxu1  ;;  %v1030_v35 = vpop.f32.mrf.mxu0 }
 0x1b7   : > { %v6130_v58 = vadd.f32 %v1253_v11, %v1028_v7 }
 0x1b8   : > { %v1255_v44 = vpop.f32.mrf.mxu1  ;;  %v1033_v18 = vpop.f32.mrf.mxu0  ;;  %4614 = vmatmul.mubr.f32.gmra.mxu0 %v8322_v27 }
 0x1b9   : > { %4616 = vmatprep.mubr.f32.mxu0 %v8324_v15 }
 0x1ba   : > { %v1258_v16 = vpop.f32.mrf.mxu1  ;;  %v1035_v45 = vpop.f32.mrf.mxu0 }
 0x1bb   : > { %v6134_v30 = vadd.f32 %v1258_v16, %v1033_v18 }
 0x1bc   : > { %v1260_v5 = vpop.f32.mrf.mxu1  ;;  %v1038_v6 = vpop.f32.mrf.mxu0  ;;  %4617 = vmatmul.mubr.f32.gmra.mxu0 %v8327_v43 }
 0x1bd   : > { %4619 = vmatprep.mubr.f32.mxu0 %v8330_v39 }
 0x1be   : > { %v1263_v22 = vpop.f32.mrf.mxu1  ;;  %v1040_v25 = vpop.f32.mrf.mxu0 }
 0x1bf   : > { %v6138_v42 = vadd.f32 %v1263_v22, %v1038_v6 }
 0x1c0   : > { %v1265_v52 = vpop.f32.mrf.mxu1  ;;  %v1043_v10 = vpop.f32.mrf.mxu0  ;;  %4620 = vmatmul.mubr.f32.gmra.mxu0 %v8333_v38 }
 0x1c1   : > { %4622 = vmatprep.mubr.f32.mxu0 %v8336_v21 }
 0x1c2   : > { %v1268_v27 = vpop.f32.mrf.mxu1  ;;  %v1045_v15 = vpop.f32.mrf.mxu0 }
 0x1c3   : > { %v6142_v55 = vadd.f32 %v1268_v27, %v1043_v10 }
 0x1c4   : > { %v1270_v4 = vpop.f32.mrf.mxu1  ;;  %v1048_v17 = vpop.f32.mrf.mxu0  ;;  %4623 = vmatmul.mubr.f32.gmra.mxu0 %v8339_v33 }
 0x1c5   : > { %4625 = vmatprep.mubr.f32.mxu0 %v5867_v26 }
 0x1c6   : > { %v1273_v43 = vpop.f32.mrf.mxu1  ;;  %v1050_v39 = vpop.f32.mrf.mxu0 }
 0x1c7   : > { %v6146_v37 = vadd.f32 %v1273_v43, %v1048_v17 }
 0x1c8   : > { %v1275_v3 = vpop.f32.mrf.mxu1  ;;  %v1053_v36 = vpop.f32.mrf.mxu0  ;;  %4626 = vmatmul.mubr.f32.gmra.mxu0 %v5889_v29 }
 0x1c9   : > { %4628 = vmatprep.mubr.f32.mxu0 %v5905_v53 }
 0x1ca   : > { %v1278_v38 = vpop.f32.mrf.mxu1  ;;  %v1055_v21 = vpop.f32.mrf.mxu0 }
 0x1cb   : > { %v6150_v50 = vadd.f32 %v1278_v38, %v1053_v36  ;;  %v2362_v36 = vld [vmem:[#allocation11 + $0x70] sm:$0xff] }
 0x1cc   : > { %v1280_v32 = vpop.f32.mrf.mxu1  ;;  %v1058_v7 = vpop.f32.mrf.mxu0  ;;  %4629 = vmatmul.mubr.f32.gmra.mxu0 %v5924_v13 }
 0x1cd   : > { %4631 = vmatprep.mubr.f32.mxu0 %v6070_v2 }
 0x1ce   : > { %v1283_v26 = vpop.f32.mrf.mxu1  ;;  %v1060_v33 = vpop.f32.mrf.mxu0 }
 0x1cf   : > { %v6154_v11 = vadd.f32 %v1283_v26, %v1058_v7  ;;  %v2361_v33 = vld [vmem:[#allocation11 + $0x68] sm:$0xff] }
 0x1d0   : > { %v1285_v35 = vpop.f32.mrf.mxu1  ;;  %v1063_v44 = vpop.f32.mrf.mxu0  ;;  %4632 = vmatmul.mubr.f32.gmra.mxu0 %v6084_v14 }
 0x1d1   : > { %4634 = vmatprep.mubr.f32.mxu0 %v5905_v53  ;;  %v2363_v53 = vld [vmem:[#allocation11 + $0x78] sm:$0xff] }
 0x1d2   : > { %v1288_v29 = vpop.f32.mrf.mxu1  ;;  %v1065_v18 = vpop.f32.mrf.mxu0  ;;  %2853 = vmatpush1.msra.mxu1 %v2363_v53 }
 0x1d3   : > { %v6158_v16 = vadd.f32 %v1288_v29, %v1063_v44  ;;  %2854 = vmatprep.subr.mxu1 %v8293_v1 }
 0x1d4   : > { %v1290_v45 = vpop.f32.mrf.mxu1  ;;  %v1068_v5 = vpop.f32.mrf.mxu0  ;;  %4635 = vmatmul.mubr.f32.gmra.mxu0 %v5924_v13  ;;  %2855 = vmatpush1.msra.mxu1 %v2362_v36 }
 0x1d5   : > { %2856 = vmatprep.subr.mxu1 %v8293_v1 }
 0x1d6   : > { %v1293_v6 = vpop.f32.mrf.mxu1  ;;  %v1070_v2 = vpop.f32.mrf.mxu0  ;;  %2857 = vmatpush1.msra.mxu1 %v2361_v33 }
 0x1d7   : > { %v6161_v22 = vadd.f32 %v1293_v6, %v1068_v5  ;;  %2858 = vmatprep.subr.mxu1 %v8293_v1  ;;  %v2360_v5 = vld [vmem:[#allocation11 + $0x60] sm:$0xff] }
 0x1d8   : > { %v1295_v25 = vpop.f32.mrf.mxu1  ;;  %v1363_v52 = vpop.f32.mrf.mxu0  ;;  %2859 = vmatpush1.msra.mxu1 %v2360_v5 }
 0x1d9   : > { %v1364_v10 = vadd.f32 %v1363_v52, %v5994_v20  ;;  %2860 = vmatprep.subr.mxu1 %v8293_v1 }
 0x1da   : > { %v1365_v27 = vpop.f32.mrf.mxu0  ;;  %v1588_v14 = vpop.f32.mrf.mxu1 }
 0x1db   : > { %v6164_v15 = vadd.f32 %v1588_v14, %v1364_v10  ;;  %v2359_v27 = vld [vmem:[#allocation11 + $0x58] sm:$0xff] }
 0x1dc   : > { %v1368_v4 = vpop.f32.mrf.mxu0  ;;  %v1590_v17 = vpop.f32.mrf.mxu1  ;;  %2861 = vmatpush1.msra.mxu1 %v2359_v27 }
 0x1dd   : > { %v1369_v43 = vadd.f32 %v1368_v4, %v6000_v49  ;;  %2862 = vmatprep.subr.mxu1 %v8293_v1 }
 0x1de   : > { %v1370_v13 = vpop.f32.mrf.mxu0  ;;  %v1593_v39 = vpop.f32.mrf.mxu1 }
 0x1df   : > { %v6168_v3 = vadd.f32 %v1593_v39, %v1369_v43  ;;  %v2358_v13 = vld [vmem:[#allocation11 + $0x50] sm:$0xff] }
 0x1e0   : > { %v1373_v38 = vpop.f32.mrf.mxu0  ;;  %v1595_v21 = vpop.f32.mrf.mxu1  ;;  %2863 = vmatpush1.msra.mxu1 %v2358_v13 }
 0x1e1   : > { %v1374_v20 = vadd.f32 %v1373_v38, %v6006_v61  ;;  %2864 = vmatprep.subr.mxu1 %v8293_v1 }
 0x1e2   : > { %v1375_v32 = vpop.f32.mrf.mxu0  ;;  %v1598_v7 = vpop.f32.mrf.mxu1 }
 0x1e3   : > { %v6172_v26 = vadd.f32 %v1598_v7, %v1374_v20  ;;  %v2357_v32 = vld [vmem:[#allocation11 + $0x48] sm:$0xff] }
 0x1e4   : > { %v1378_v49 = vpop.f32.mrf.mxu0  ;;  %v1600_v35 = vpop.f32.mrf.mxu1  ;;  %2865 = vmatpush1.msra.mxu1 %v2357_v32 }
 0x1e5   : > { %v1379_v44 = vadd.f32 %v1378_v49, %v6012_v40  ;;  %2866 = vmatprep.subr.mxu1 %v8293_v1 }
 0x1e6   : > { %v1380_v29 = vpop.f32.mrf.mxu0  ;;  %v1603_v18 = vpop.f32.mrf.mxu1 }
 0x1e7   : > { %v6176_v45 = vadd.f32 %v1603_v18, %v1379_v44  ;;  %v2356_v29 = vld [vmem:[#allocation11 + $0x40] sm:$0xff] }
 0x1e8   : > { %v1383_v61 = vpop.f32.mrf.mxu0  ;;  %v1605_v6 = vpop.f32.mrf.mxu1  ;;  %2867 = vmatpush1.msra.mxu1 %v2356_v29 }
 0x1e9   : > { %v1384_v2 = vadd.f32 %v1383_v61, %v6018_v48  ;;  %2868 = vmatprep.subr.mxu1 %v8293_v1 }
 0x1ea   : > { %v1385_v25 = vpop.f32.mrf.mxu0  ;;  %v1608_v52 = vpop.f32.mrf.mxu1 }
 0x1eb   : > { %v6180_v10 = vadd.f32 %v1608_v52, %v1384_v2  ;;  %v2355_v25 = vld [vmem:[#allocation11 + $0x38] sm:$0xff] }
 0x1ec   : > { %v1388_v40 = vpop.f32.mrf.mxu0  ;;  %v1610_v14 = vpop.f32.mrf.mxu1  ;;  %2869 = vmatpush1.msra.mxu1 %v2355_v25 }
 0x1ed   : > { %v1389_v53 = vadd.f32 %v1388_v40, %v6024_v62  ;;  %2870 = vmatprep.subr.mxu1 %v8293_v1 }
 0x1ee   : > { %v1390_v4 = vpop.f32.mrf.mxu0  ;;  %v1613_v17 = vpop.f32.mrf.mxu1 }
 0x1ef   : > { %v6184_v43 = vadd.f32 %v1613_v17, %v1389_v53  ;;  %v2354_v4 = vld [vmem:[#allocation11 + $0x30] sm:$0xff] }
 0x1f0   : > { %v1393_v48 = vpop.f32.mrf.mxu0  ;;  %v1615_v39 = vpop.f32.mrf.mxu1  ;;  %2871 = vmatpush1.msra.mxu1 %v2354_v4 }
 0x1f1   : > { %v1394_v36 = vadd.f32 %v1393_v48, %v6030_v60  ;;  %2872 = vmatprep.subr.mxu1 %v8293_v1 }
 0x1f2   : > { %v1395_v38 = vpop.f32.mrf.mxu0  ;;  %v1618_v21 = vpop.f32.mrf.mxu1 }
 0x1f3   : > { %v6188_v20 = vadd.f32 %v1618_v21, %v1394_v36  ;;  %v2353_v38 = vld [vmem:[#allocation11 + $0x28] sm:$0xff] }
 0x1f4   : > { %v1398_v62 = vpop.f32.mrf.mxu0  ;;  %v1620_v7 = vpop.f32.mrf.mxu1  ;;  %2873 = vmatpush1.msra.mxu1 %v2353_v38 }
 0x1f5   : > { %v1399_v33 = vadd.f32 %v1398_v62, %v6036_v8  ;;  %2874 = vmatprep.subr.mxu1 %v8293_v1 }
 0x1f6   : > { %v1400_v49 = vpop.f32.mrf.mxu0  ;;  %v1623_v35 = vpop.f32.mrf.mxu1 }
 0x1f7   : > { %v6192_v44 = vadd.f32 %v1623_v35, %v1399_v33  ;;  %v2352_v49 = vld [vmem:[#allocation11 + $0x20] sm:$0xff] }
 0x1f8   : > { %v1403_v60 = vpop.f32.mrf.mxu0  ;;  %v1625_v18 = vpop.f32.mrf.mxu1  ;;  %2875 = vmatpush1.msra.mxu1 %v2352_v49 }
 0x1f9   : > { %v1404_v5 = vadd.f32 %v1403_v60, %v6042_v28  ;;  %2876 = vmatprep.subr.mxu1 %v8293_v1 }
 0x1fa   : > { %v1405_v61 = vpop.f32.mrf.mxu0  ;;  %v1628_v6 = vpop.f32.mrf.mxu1 }
 0x1fb   : > { %v6196_v2 = vadd.f32 %v1628_v6, %v1404_v5  ;;  %v2351_v61 = vld [vmem:[#allocation11 + $0x18] sm:$0xff] }
 0x1fc   : > { %v1408_v8 = vpop.f32.mrf.mxu0  ;;  %v1630_v52 = vpop.f32.mrf.mxu1  ;;  %2877 = vmatpush1.msra.mxu1 %v2351_v61 }
 0x1fd   : > { %v1409_v27 = vadd.f32 %v1408_v8, %v6048_v9  ;;  %2878 = vmatprep.subr.mxu1 %v8293_v1 }
 0x1fe   : > { %v1410_v40 = vpop.f32.mrf.mxu0  ;;  %v1633_v14 = vpop.f32.mrf.mxu1 }
 0x1ff   : > { %v6200_v53 = vadd.f32 %v1633_v14, %v1409_v27  ;;  %v2350_v40 = vld [vmem:[#allocation11 + $0x10] sm:$0xff] }
 0x200   : > { %v1413_v28 = vpop.f32.mrf.mxu0  ;;  %v1635_v17 = vpop.f32.mrf.mxu1  ;;  %2879 = vmatpush1.msra.mxu1 %v2350_v40 }
 0x201   : > { %v1414_v13 = vadd.f32 %v1413_v28, %v6054_v57  ;;  %2880 = vmatprep.subr.mxu1 %v8293_v1 }
 0x202   : > { %v1415_v48 = vpop.f32.mrf.mxu0  ;;  %v1638_v39 = vpop.f32.mrf.mxu1 }
 0x203   : > { %v6204_v36 = vadd.f32 %v1638_v39, %v1414_v13  ;;  %v2349_v48 = vld [vmem:[#allocation11 + $0x8] sm:$0xff] }
 0x204   : > { %v1418_v9 = vpop.f32.mrf.mxu0  ;;  %v1640_v21 = vpop.f32.mrf.mxu1  ;;  %2881 = vmatpush1.msra.mxu1 %v2349_v48 }
 0x205   : > { %v1419_v32 = vadd.f32 %v1418_v9, %v6062_v47  ;;  %2882 = vmatprep.subr.mxu1 %v8293_v1 }
 0x206   : > { %v1420_v62 = vpop.f32.mrf.mxu0  ;;  %v1643_v7 = vpop.f32.mrf.mxu1 }
 0x207   : > { %v6208_v33 = vadd.f32 %v1643_v7, %v1419_v32  ;;  %v2348_v62 = vld [vmem:[#allocation11] sm:$0xff] }
 0x208   : > { %v1423_v57 = vpop.f32.mrf.mxu0  ;;  %v1645_v35 = vpop.f32.mrf.mxu1  ;;  %2883 = vmatpush1.msra.mxu1 %v2348_v62 }
 0x209   : > { %v1424_v29 = vadd.f32 %v1423_v57, %v6074_v46  ;;  %2884 = vmatprep.subr.mxu1 %v8293_v1 }
 0x20a   : > { %v1425_v60 = vpop.f32.mrf.mxu0  ;;  %v1648_v18 = vpop.f32.mrf.mxu1 }
 0x20b   : > { %v6212_v5 = vadd.f32 %v1648_v18, %v1424_v29 }
 0x20c   : > { %v1428_v47 = vpop.f32.mrf.mxu0  ;;  %v1650_v6 = vpop.f32.mrf.mxu1 }
 0x20d   : > { %v1429_v25 = vadd.f32 %v1428_v47, %v6086_v41 }
 0x20e   : > { %v1430_v8 = vpop.f32.mrf.mxu0  ;;  %v1653_v52 = vpop.f32.mrf.mxu1 }
 0x20f   : > { %v6216_v27 = vadd.f32 %v1653_v52, %v1429_v25 }
 0x210   : > { %v1433_v46 = vpop.f32.mrf.mxu0  ;;  %v1655_v14 = vpop.f32.mrf.mxu1 }
 0x211   : > { %v1434_v4 = vadd.f32 %v1433_v46, %v6092_v24 }
 0x212   : > { %v1435_v28 = vpop.f32.mrf.mxu0  ;;  %v1658_v17 = vpop.f32.mrf.mxu1 }
 0x213   : > { %v6220_v13 = vadd.f32 %v1658_v17, %v1434_v4 }
 0x214   : > { %v1438_v41 = vpop.f32.mrf.mxu0  ;;  %v1660_v39 = vpop.f32.mrf.mxu1 }
 0x215   : > { %v1439_v38 = vadd.f32 %v1438_v41, %v6098_v34 }
 0x216   : > { %v1440_v9 = vpop.f32.mrf.mxu0  ;;  %v1663_v21 = vpop.f32.mrf.mxu1 }
 0x217   : > { %v6224_v32 = vadd.f32 %v1663_v21, %v1439_v38 }
 0x218   : > { %v1443_v24 = vpop.f32.mrf.mxu0  ;;  %v1665_v7 = vpop.f32.mrf.mxu1 }
 0x219   : > { %v1444_v49 = vadd.f32 %v1443_v24, %v6102_v51  ;;  %v2395_v7 = vld [vmem:[#allocation11 + $0x178] sm:$0xff] }
 0x21a   : > { %v1445_v57 = vpop.f32.mrf.mxu0  ;;  %v1668_v35 = vpop.f32.mrf.mxu1  ;;  %3078 = vmatpush1.msra.mxu0 %v2395_v7 }
 0x21b   : > { %v6228_v29 = vadd.f32 %v1668_v35, %v1444_v49  ;;  %3079 = vmatprep.subr.mxu0 %v8293_v1  ;;  %v2394_v35 = vld [vmem:[#allocation11 + $0x170] sm:$0xff] }
 0x21c   : > { %v1448_v60 = vpop.f32.mrf.mxu0  ;;  %v1670_v34 = vpop.f32.mrf.mxu1  ;;  %3080 = vmatpush1.msra.mxu0 %v2394_v35 }
 0x21d   : > { %v1449_v18 = vadd.f32 %v1448_v60, %v6106_v0  ;;  %3081 = vmatprep.subr.mxu0 %v8293_v1 }
 0x21e   : > { %v1450_v61 = vpop.f32.mrf.mxu0  ;;  %v1673_v47 = vpop.f32.mrf.mxu1 }
 0x21f   : > { %v6231_v6 = vadd.f32 %v1673_v47, %v1449_v18  ;;  %v2393_v18 = vld [vmem:[#allocation11 + $0x168] sm:$0xff] }
 0x220   : > { %v1453_v25 = vpop.f32.mrf.mxu0  ;;  %v1675_v8 = vpop.f32.mrf.mxu1  ;;  %3082 = vmatpush1.msra.mxu0 %v2393_v18 }
 0x221   : > { %v1454_v52 = vadd.f32 %v1453_v25, %v6110_v56  ;;  %3083 = vmatprep.subr.mxu0 %v8293_v1 }
 0x222   : > { %v1455_v40 = vpop.f32.mrf.mxu0  ;;  %v1678_v51 = vpop.f32.mrf.mxu1 }
 0x223   : > { %v6234_v46 = vadd.f32 %v1678_v51, %v1454_v52  ;;  %v2391_v51 = vld [vmem:[#allocation11 + $0x158] sm:$0xff] }
 0x224   : > { %v1458_v14 = vpop.f32.mrf.mxu0  ;;  %v1680_v4 = vpop.f32.mrf.mxu1 }
 0x225   : > { %v1459_v28 = vadd.f32 %v1458_v14, %v6114_v59 }
 0x226   : > { %v1460_v17 = vpop.f32.mrf.mxu0  ;;  %v1683_v48 = vpop.f32.mrf.mxu1 }
 0x227   : > { %v6237_v41 = vadd.f32 %v1683_v48, %v1459_v28 }
 0x228   : > { %v1463_v0 = vpop.f32.mrf.mxu0  ;;  %v1685_v39 = vpop.f32.mrf.mxu1 }
 0x229   : > { %v1464_v38 = vadd.f32 %v1463_v0, %v6118_v12  ;;  %v2389_v39 = vld [vmem:[#allocation11 + $0x148] sm:$0xff] }
 0x22a   : > { %v1465_v9 = vpop.f32.mrf.mxu0  ;;  %v1688_v21 = vpop.f32.mrf.mxu1 }
 0x22b   : > { %v6240_v62 = vadd.f32 %v1688_v21, %v1464_v38 }
 0x22c   : > { %v1468_v56 = vpop.f32.mrf.mxu0  ;;  %v1690_v24 = vpop.f32.mrf.mxu1 }
 0x22d   : > { %v1469_v49 = vadd.f32 %v1468_v56, %v6122_v23  ;;  %v2392_v23 = vld [vmem:[#allocation11 + $0x160] sm:$0xff] }
 0x22e   : > { %v1470_v57 = vpop.f32.mrf.mxu0  ;;  %v1693_v59 = vpop.f32.mrf.mxu1  ;;  %3084 = vmatpush1.msra.mxu0 %v2392_v23 }
 0x22f   : > { %v6244_v60 = vadd.f32 %v1693_v59, %v1469_v49  ;;  %3085 = vmatprep.subr.mxu0 %v8293_v1  ;;  %v2387_v49 = vld [vmem:[#allocation11 + $0x138] sm:$0xff] }
 0x230   : > { %v1473_v34 = vpop.f32.mrf.mxu0  ;;  %v1695_v12 = vpop.f32.mrf.mxu1  ;;  %3086 = vmatpush1.msra.mxu0 %v2391_v51 }
 0x231   : > { %v1474_v61 = vadd.f32 %v1473_v34, %v6126_v31  ;;  %3087 = vmatprep.subr.mxu0 %v8293_v1  ;;  %v2390_v31 = vld [vmem:[#allocation11 + $0x150] sm:$0xff] }
 0x232   : > { %v1475_v47 = vpop.f32.mrf.mxu0  ;;  %v1698_v25 = vpop.f32.mrf.mxu1  ;;  %3088 = vmatpush1.msra.mxu0 %v2390_v31 }
 0x233   : > { %v6249_v8 = vadd.f32 %v1698_v25, %v1474_v61  ;;  %3089 = vmatprep.subr.mxu0 %v8293_v1  ;;  %v2385_v61 = vld [vmem:[#allocation11 + $0x128] sm:$0xff] }
 0x234   : > { %v1478_v52 = vpop.f32.mrf.mxu0  ;;  %v1700_v40 = vpop.f32.mrf.mxu1  ;;  %3090 = vmatpush1.msra.mxu0 %v2389_v39 }
 0x235   : > { %v1479_v14 = vadd.f32 %v1478_v52, %v6130_v58  ;;  %3091 = vmatprep.subr.mxu0 %v8293_v1  ;;  %v2388_v58 = vld [vmem:[#allocation11 + $0x140] sm:$0xff] }
 0x236   : > { %v1480_v4 = vpop.f32.mrf.mxu0  ;;  %v1703_v28 = vpop.f32.mrf.mxu1  ;;  %3092 = vmatpush1.msra.mxu0 %v2388_v58 }
 0x237   : > { %v6254_v17 = vadd.f32 %v1703_v28, %v1479_v14  ;;  %3093 = vmatprep.subr.mxu0 %v8293_v1  ;;  %v2383_v14 = vld [vmem:[#allocation11 + $0x118] sm:$0xff] }
 0x238   : > { %v1483_v48 = vpop.f32.mrf.mxu0  ;;  %v1705_v0 = vpop.f32.mrf.mxu1  ;;  %3094 = vmatpush1.msra.mxu0 %v2387_v49 }
 0x239   : > { %v1484_v38 = vadd.f32 %v1483_v48, %v6134_v30  ;;  %3095 = vmatprep.subr.mxu0 %v8293_v1  ;;  %v2386_v30 = vld [vmem:[#allocation11 + $0x130] sm:$0xff] }
 0x23a   : > { %v1485_v9 = vpop.f32.mrf.mxu0  ;;  %v1708_v21 = vpop.f32.mrf.mxu1  ;;  %3096 = vmatpush1.msra.mxu0 %v2386_v30 }
 0x23b   : > { %v6259_v56 = vadd.f32 %v1708_v21, %v1484_v38  ;;  %3097 = vmatprep.subr.mxu0 %v8293_v1  ;;  %v2381_v38 = vld [vmem:[#allocation11 + $0x108] sm:$0xff] }
 0x23c   : > { %v1488_v24 = vpop.f32.mrf.mxu0  ;;  %v1710_v7 = vpop.f32.mrf.mxu1  ;;  %3098 = vmatpush1.msra.mxu0 %v2385_v61 }
 0x23d   : > { %v1489_v57 = vadd.f32 %v1488_v24, %v6138_v42  ;;  %3099 = vmatprep.subr.mxu0 %v8293_v1  ;;  %v2384_v42 = vld [vmem:[#allocation11 + $0x120] sm:$0xff]  ;;  %v2379_v7 = vld [vmem:[#allocation11 + $0xf8] sm:$0xff] }
 0x23e   : > { %v1490_v59 = vpop.f32.mrf.mxu0  ;;  %v1713_v35 = vpop.f32.mrf.mxu1  ;;  %3100 = vmatpush1.msra.mxu0 %v2384_v42  ;;  %2885 = vmatpush2.msra.mxu1 %v2379_v7  ;;  %v2373_v7 = vld [vmem:[#allocation11 + $0xc8] sm:$0xff] }
 0x23f   : > { %v6264_v34 = vadd.f32 %v1713_v35, %v1489_v57  ;;  %3101 = vmatprep.subr.mxu0 %v8293_v1  ;;  %v2411_v59 = vld [vmem:[#allocation11 + $0x1f8] sm:$0xff]  ;;  %2886 = vmatprep.subr.mxu1 %v8293_v1 }
 0x240   : > { %v1493_v12 = vpop.f32.mrf.mxu0  ;;  %v1715_v18 = vpop.f32.mrf.mxu1  ;;  %3102 = vmatpush1.msra.mxu0 %v2383_v14 }
 0x241   : > { %v1494_v47 = vadd.f32 %v1493_v12, %v6142_v55  ;;  %3103 = vmatprep.subr.mxu0 %v8293_v1  ;;  %v2382_v55 = vld [vmem:[#allocation11 + $0x110] sm:$0xff] }
 0x242   : > { %v1495_v25 = vpop.f32.mrf.mxu0  ;;  %v1718_v23 = vpop.f32.mrf.mxu1  ;;  %3104 = vmatpush1.msra.mxu0 %v2382_v55  ;;  %v2410_v18 = vld [vmem:[#allocation11 + $0x1f0] sm:$0xff] }
 0x243   : > { %v6269_v52 = vadd.f32 %v1718_v23, %v1494_v47  ;;  %3105 = vmatprep.subr.mxu0 %v8293_v1  ;;  %v2377_v47 = vld [vmem:[#allocation11 + $0xe8] sm:$0xff] }
 0x244   : > { %v1498_v40 = vpop.f32.mrf.mxu0  ;;  %v1720_v51 = vpop.f32.mrf.mxu1  ;;  %3106 = vmatpush1.msra.mxu0 %v2381_v38  ;;  %v2374_v38 = vld [vmem:[#allocation11 + $0xd0] sm:$0xff] }
 0x245   : > { %v1499_v4 = vadd.f32 %v1498_v40, %v6146_v37  ;;  %3107 = vmatprep.subr.mxu0 %v8293_v1  ;;  %v2380_v37 = vld [vmem:[#allocation11 + $0x100] sm:$0xff] }
 0x246   : > { %v1500_v28 = vpop.f32.mrf.mxu0  ;;  %v1723_v31 = vpop.f32.mrf.mxu1  ;;  %3108 = vmatpush1.msra.mxu0 %v2380_v37  ;;  %v2376_v40 = vld [vmem:[#allocation11 + $0xe0] sm:$0xff] }
 0x247   : > { %v6274_v48 = vadd.f32 %v1723_v31, %v1499_v4  ;;  %3109 = vmatprep.subr.mxu0 %v8293_v1  ;;  %v2408_v4 = vld [vmem:[#allocation11 + $0x1e0] sm:$0xff]  ;;  %v2375_v31 = vld [vmem:[#allocation11 + $0xd8] sm:$0xff] }
 0x248   : > { %v1503_v0 = vpop.f32.mrf.mxu0  ;;  %v1725_v39 = vpop.f32.mrf.mxu1  ;;  %3110 = vmatpush2.msra.mxu0 %v2411_v59  ;;  %v2372_v59 = vld [vmem:[#allocation11 + $0xc0] sm:$0xff] }
 0x249   : > { %v1504_v9 = vadd.f32 %v1503_v0, %v6150_v50  ;;  %v2378_v50 = vld [vmem:[#allocation11 + $0xf0] sm:$0xff]  ;;  %3111 = vmatprep.subr.mxu0 %v8293_v1 }
 0x24a   : > { %v1505_v21 = vpop.f32.mrf.mxu0  ;;  %v1728_v58 = vpop.f32.mrf.mxu1  ;;  %2887 = vmatpush2.msra.mxu1 %v2378_v50  ;;  %3112 = vmatpush2.msra.mxu0 %v2410_v18  ;;  %v2371_v18 = vld [vmem:[#allocation11 + $0xb8] sm:$0xff] }
 0x24b   : > { %v6279_v24 = vadd.f32 %v1728_v58, %v1504_v9  ;;  %2888 = vmatprep.subr.mxu1 %v8293_v1  ;;  %3113 = vmatprep.subr.mxu0 %v8293_v1  ;;  %v2406_v58 = vld [vmem:[#allocation11 + $0x1d0] sm:$0xff] }
 0x24c   : > { %v1508_v49 = vpop.f32.mrf.mxu0  ;;  %v1730_v57 = vpop.f32.mrf.mxu1  ;;  %2889 = vmatpush2.msra.mxu1 %v2377_v47 }
 0x24d   : > { %v1509_v35 = vadd.f32 %v1508_v49, %v6154_v11  ;;  %v2409_v11 = vld [vmem:[#allocation11 + $0x1e8] sm:$0xff]  ;;  %2890 = vmatprep.subr.mxu1 %v8293_v1 }
 0x24e   : > { %v1510_v30 = vpop.f32.mrf.mxu0  ;;  %v1733_v12 = vpop.f32.mrf.mxu1  ;;  %3114 = vmatpush2.msra.mxu0 %v2409_v11  ;;  %2891 = vmatpush2.msra.mxu1 %v2376_v40 }
 0x24f   : > { %v6285_v61 = vadd.f32 %v1733_v12, %v1509_v35  ;;  %3115 = vmatprep.subr.mxu0 %v8293_v1  ;;  %2892 = vmatprep.subr.mxu1 %v8293_v1  ;;  %v2404_v30 = vld [vmem:[#allocation11 + $0x1c0] sm:$0xff] }
 0x250   : > { %v1513_v25 = vpop.f32.mrf.mxu0  ;;  %v1735_v23 = vpop.f32.mrf.mxu1  ;;  %3116 = vmatpush2.msra.mxu0 %v2408_v4  ;;  %2893 = vmatpush2.msra.mxu1 %v2375_v31  ;;  %v2369_v4 = vld [vmem:[#allocation11 + $0xa8] sm:$0xff] }
 0x251   : > { %v1514_v42 = vadd.f32 %v1513_v25, %v6158_v16  ;;  %3117 = vmatprep.subr.mxu0 %v8293_v1  ;;  %v2407_v16 = vld [vmem:[#allocation11 + $0x1d8] sm:$0xff]  ;;  %2894 = vmatprep.subr.mxu1 %v8293_v1  ;;  %v2370_v23 = vld [vmem:[#allocation11 + $0xb0] sm:$0xff] }
 0x252   : > { %v1515_v51 = vpop.f32.mrf.mxu0  ;;  %v1738_v14 = vpop.f32.mrf.mxu1  ;;  %3118 = vmatpush2.msra.mxu0 %v2407_v16  ;;  %2895 = vmatpush2.msra.mxu1 %v2374_v38  ;;  %v2403_v25 = vld [vmem:[#allocation11 + $0x1b8] sm:$0xff] }
 0x253   : > { %v6292_v28 = vadd.f32 %v1738_v14, %v1514_v42  ;;  %3119 = vmatprep.subr.mxu0 %v8293_v1  ;;  %2896 = vmatprep.subr.mxu1 %v8293_v1  ;;  %v2402_v42 = vld [vmem:[#allocation11 + $0x1b0] sm:$0xff] }
 0x254   : > { %v1518_v55 = vpop.f32.mrf.mxu0  ;;  %v1740_v0 = vpop.f32.mrf.mxu1  ;;  %3120 = vmatpush2.msra.mxu0 %v2406_v58  ;;  %2897 = vmatpush2.msra.mxu1 %v2373_v7 }
 0x255   : > { %v1519_v39 = vadd.f32 %v1518_v55, %v6161_v22  ;;  %3121 = vmatprep.subr.mxu0 %v8293_v1  ;;  %v2405_v22 = vld [vmem:[#allocation11 + $0x1c8] sm:$0xff]  ;;  %2898 = vmatprep.subr.mxu1 %v8293_v1 }
 0x256   : > { %v1520_v9 = vpop.f32.mrf.mxu0  ;;  %v1743_v21 = vpop.f32.mrf.mxu1  ;;  %3122 = vmatpush2.msra.mxu0 %v2405_v22  ;;  %2899 = vmatpush2.msra.mxu1 %v2372_v59  ;;  %v2401_v55 = vld [vmem:[#allocation11 + $0x1a8] sm:$0xff] }
 0x257   : > { %v6299_v37 = vadd.f32 %v1743_v21, %v1519_v39  ;;  %3123 = vmatprep.subr.mxu0 %v8293_v1  ;;  %2900 = vmatprep.subr.mxu1 %v8293_v1  ;;  %v2400_v9 = vld [vmem:[#allocation11 + $0x1a0] sm:$0xff] }
 0x258   : > { %v4591_v49 = vpop.f32.mrf.mxu0  ;;  %v1745_v57 = vpop.f32.mrf.mxu1  ;;  %3124 = vmatpush2.msra.mxu0 %v2404_v30  ;;  %2901 = vmatpush2.msra.mxu1 %v2371_v18  ;;  %v2366_v30 = vld [vmem:[#allocation11 + $0x90] sm:$0xff]  ;;  %v2365_v18 = vld [vmem:[#allocation11 + $0x88] sm:$0xff] }
 0x259   : > { %v6305_v35 = vadd.f32 %v4591_v49, %v6168_v3  ;;  %3125 = vmatprep.subr.mxu0 %v8293_v1  ;;  %2902 = vmatprep.subr.mxu1 %v8293_v1  ;;  %v2367_v57 = vld [vmem:[#allocation11 + $0x98] sm:$0xff] }
 0x25a   : > { %v1813_v50 = vpop.f32.mrf.mxu0  ;;  %3126 = vmatpush2.msra.mxu0 %v2403_v25  ;;  %2903 = vmatpush2.msra.mxu1 %v2370_v23 }
 0x25b   : > { %v6309_v12 = vadd.f32 %v1813_v50, %v6164_v15  ;;  %v2047_v15 = vmul.f32 %v6305_v35, %v6305_v35  ;;  %3127 = vmatprep.subr.mxu0 %v8293_v1  ;;  %2904 = vmatprep.subr.mxu1 %v8293_v1 }
 0x25c   : > { %v4594_v47 = vpop.f32.mrf.mxu0  ;;  %3128 = vmatpush2.msra.mxu0 %v2402_v42  ;;  %2905 = vmatpush2.msra.mxu1 %v2369_v4  ;;  %v2398_v42 = vld [vmem:[#allocation11 + $0x190] sm:$0xff]  ;;  %v2364_v4 = vld [vmem:[#allocation11 + $0x80] sm:$0xff] }
 0x25d   : > { %v2046_v3 = vmul.f32 %v6309_v12, %v6309_v12  ;;  %v2006_v40 = vadd.f32 %v6305_v35, %v6309_v12  ;;  %v6322_v51 = vadd.f32 %v4594_v47, %v6176_v45  ;;  %3129 = vmatprep.subr.mxu0 %v8293_v1  ;;  %2906 = vmatprep.subr.mxu1 %v8293_v1  ;;  %v2368_v45 = vld [vmem:[#allocation11 + $0xa0] sm:$0xff] }
 0x25e   : > { %v1823_v11 = vpop.f32.mrf.mxu0  ;;  %3130 = vmatpush2.msra.mxu0 %v2401_v55  ;;  %2907 = vmatpush2.msra.mxu1 %v2368_v45 }
 0x25f   : > { %v6325_v14 = vadd.f32 %v1823_v11, %v6172_v26  ;;  %v2078_v0 = vadd.f32 %v2047_v15, %v2046_v3  ;;  %3131 = vmatprep.subr.mxu0 %v8293_v1  ;;  %v2049_v21 = vmul.f32 %v6322_v51, %v6322_v51  ;;  %2908 = vmatprep.subr.mxu1 %v8293_v1 }
 0x260   : > { %v4597_v31 = vpop.f32.mrf.mxu0  ;;  %2909 = vmatpush2.msra.mxu1 %v2367_v57  ;;  %3132 = vmatpush2.msra.mxu0 %v2400_v9 }
 0x261   : > { %v2007_v16 = vadd.f32 %v2006_v40, %v6325_v14  ;;  %v2048_v39 = vmul.f32 %v6325_v14, %v6325_v14  ;;  %v6334_v26 = vadd.f32 %v4597_v31, %v6184_v43  ;;  %2910 = vmatprep.subr.mxu1 %v8293_v1  ;;  %3133 = vmatprep.subr.mxu0 %v8293_v1 }
 0x262   : > { %v1833_v38 = vpop.f32.mrf.mxu0  ;;  %2911 = vmatpush2.msra.mxu1 %v2366_v30 }
 0x263   : > { %v2079_v58 = vadd.f32 %v2078_v0, %v2048_v39  ;;  %v6340_v7 = vadd.f32 %v1833_v38, %v6180_v10  ;;  %v2008_v49 = vadd.f32 %v2007_v16, %v6322_v51  ;;  %v2399_v10 = vld [vmem:[#allocation11 + $0x198] sm:$0xff]  ;;  %v2051_v47 = vmul.f32 %v6334_v26, %v6334_v26  ;;  %2912 = vmatprep.subr.mxu1 %v8293_v1  ;;  %v2397_v16 = vld [vmem:[#allocation11 + $0x188] sm:$0xff] }
 0x264   : > { %v4600_v22 = vpop.f32.mrf.mxu0  ;;  %2913 = vmatpush2.msra.mxu1 %v2365_v18  ;;  %3134 = vmatpush2.msra.mxu0 %v2399_v10 }
 0x265   : > { %v2009_v43 = vadd.f32 %v2008_v49, %v6340_v7  ;;  %v2050_v59 = vmul.f32 %v6340_v7, %v6340_v7  ;;  %v2080_v50 = vadd.f32 %v2079_v58, %v2049_v21  ;;  %v6352_v23 = vadd.f32 %v4600_v22, %v6192_v44  ;;  %3135 = vmatprep.subr.mxu0 %v8293_v1 }
 0x266   : > { %v1843_v25 = vpop.f32.mrf.mxu0  ;;  %2914 = vmatprep.subr.mxu1 %v8293_v1  ;;  %3136 = vmatpush2.msra.mxu0 %v2398_v42 }
 0x267   : > { %v2081_v3 = vadd.f32 %v2080_v50, %v2050_v59  ;;  %v6355_v15 = vadd.f32 %v1843_v25, %v6188_v20  ;;  %v2010_v11 = vadd.f32 %v2009_v43, %v6334_v26  ;;  %v2053_v39 = vmul.f32 %v6352_v23, %v6352_v23  ;;  %2915 = vmatpush2.msra.mxu1 %v2364_v4 }
 0x268   : > { %v4603_v40 = vpop.f32.mrf.mxu0  ;;  %3137 = vmatprep.subr.mxu0 %v8293_v1  ;;  %3302 = vmatprep.subr.mxu1 %v8293_v1 }
 0x269   : > { %v2011_v31 = vadd.f32 %v2010_v11, %v6355_v15  ;;  %v2052_v55 = vmul.f32 %v6355_v15, %v6355_v15  ;;  %v2082_v0 = vadd.f32 %v2081_v3, %v2051_v47  ;;  %v6364_v20 = vadd.f32 %v4603_v40, %v6200_v53  ;;  %v2396_v53 = vld [vmem:[#allocation11 + $0x180] sm:$0xff]  ;;  %3138 = vmatpush2.msra.mxu0 %v2397_v16 }
 0x26a   : > { %v1853_v44 = vpop.f32.mrf.mxu0  ;;  %3139 = vmatprep.subr.mxu0 %v8293_v1 }
 0x26b   : > { %v2083_v45 = vadd.f32 %v2082_v0, %v2052_v55  ;;  %v6370_v38 = vadd.f32 %v1853_v44, %v6196_v2  ;;  %v2012_v9 = vadd.f32 %v2011_v31, %v6352_v23  ;;  %v2055_v2 = vmul.f32 %v6364_v20, %v6364_v20  ;;  %3140 = vmatpush2.msra.mxu0 %v2396_v53 }
 0x26c   : > { %v4606_v21 = vpop.f32.mrf.mxu0  ;;  %3527 = vmatprep.subr.mxu0 %v8293_v1 }
 0x26d   : > { %v2013_v58 = vadd.f32 %v2012_v9, %v6370_v38  ;;  %v2054_v49 = vmul.f32 %v6370_v38, %v6370_v38  ;;  %v2084_v57 = vadd.f32 %v2083_v45, %v2053_v39  ;;  %v6382_v59 = vadd.f32 %v4606_v21, %v6208_v33 }
 0x26e   : > { %v1863_v22 = vpop.f32.mrf.mxu0 }
 0x26f   : > { %v2085_v43 = vadd.f32 %v2084_v57, %v2054_v49  ;;  %v6385_v50 = vadd.f32 %v1863_v22, %v6204_v36  ;;  %v2014_v30 = vadd.f32 %v2013_v58, %v6364_v20  ;;  %v2057_v36 = vmul.f32 %v6382_v59, %v6382_v59 }
 0x270   : > { %v4609_v18 = vpop.f32.mrf.mxu0 }
 0x271   : > { %v2015_v10 = vadd.f32 %v2014_v30, %v6385_v50  ;;  %v2056_v47 = vmul.f32 %v6385_v50, %v6385_v50  ;;  %v2086_v25 = vadd.f32 %v2085_v43, %v2055_v2  ;;  %v6393_v3 = vadd.f32 %v4609_v18, %v6216_v27 }
 0x272   : > { %v1873_v33 = vpop.f32.mrf.mxu0 }
 0x273   : > { %v2087_v11 = vadd.f32 %v2086_v25, %v2056_v47  ;;  %v6398_v42 = vadd.f32 %v1873_v33, %v6212_v5  ;;  %v2016_v40 = vadd.f32 %v2015_v10, %v6382_v59  ;;  %v2059_v27 = vmul.f32 %v6393_v3, %v6393_v3 }
 0x274   : > { %v4612_v4 = vpop.f32.mrf.mxu0 }
 0x275   : > { %v2017_v31 = vadd.f32 %v2016_v40, %v6398_v42  ;;  %v2058_v55 = vmul.f32 %v6398_v42, %v6398_v42  ;;  %v2088_v0 = vadd.f32 %v2087_v11, %v2057_v36  ;;  %v6407_v39 = vadd.f32 %v4612_v4, %v6224_v32 }
 0x276   : > { %v1883_v44 = vpop.f32.mrf.mxu0 }
 0x277   : > { %v2089_v16 = vadd.f32 %v2088_v0, %v2058_v55  ;;  %v6410_v5 = vadd.f32 %v1883_v44, %v6220_v13  ;;  %v2018_v45 = vadd.f32 %v2017_v31, %v6393_v3  ;;  %v2061_v32 = vmul.f32 %v6407_v39, %v6407_v39 }
 0x278   : > { %v4615_v9 = vpop.f32.mrf.mxu0 }
 0x279   : > { %v2019_v21 = vadd.f32 %v2018_v45, %v6410_v5  ;;  %v2060_v53 = vmul.f32 %v6410_v5, %v6410_v5  ;;  %v2090_v58 = vadd.f32 %v2089_v16, %v2059_v27  ;;  %v6417_v49 = vadd.f32 %v4615_v9, %v6231_v6 }
 0x27a   : > { %v1893_v57 = vpop.f32.mrf.mxu0 }
 0x27b   : > { %v2091_v2 = vadd.f32 %v2090_v58, %v2060_v53  ;;  %v6422_v13 = vadd.f32 %v1893_v57, %v6228_v29  ;;  %v2020_v22 = vadd.f32 %v2019_v21, %v6407_v39  ;;  %v2063_v6 = vmul.f32 %v6417_v49, %v6417_v49 }
 0x27c   : > { %v4618_v43 = vpop.f32.mrf.mxu0 }
 0x27d   : > { %v2021_v30 = vadd.f32 %v2020_v22, %v6422_v13  ;;  %v2062_v18 = vmul.f32 %v6422_v13, %v6422_v13  ;;  %v2092_v10 = vadd.f32 %v2091_v2, %v2061_v32  ;;  %v6431_v33 = vadd.f32 %v4618_v43, %v6237_v41 }
 0x27e   : > { %v1903_v47 = vpop.f32.mrf.mxu0 }
 0x27f   : > { %v2093_v25 = vadd.f32 %v2092_v10, %v2062_v18  ;;  %v6434_v29 = vadd.f32 %v1903_v47, %v6234_v46  ;;  %v2022_v36 = vadd.f32 %v2021_v30, %v6417_v49  ;;  %v2065_v41 = vmul.f32 %v6431_v33, %v6431_v33 }
 0x280   : > { %v4621_v11 = vpop.f32.mrf.mxu0 }
 0x281   : > { %v2023_v40 = vadd.f32 %v2022_v36, %v6434_v29  ;;  %v2064_v4 = vmul.f32 %v6434_v29, %v6434_v29  ;;  %v2094_v31 = vadd.f32 %v2093_v25, %v2063_v6  ;;  %v6441_v55 = vadd.f32 %v4621_v11, %v6244_v60 }
 0x282   : > { %v1913_v0 = vpop.f32.mrf.mxu0 }
 0x283   : > { %v2095_v27 = vadd.f32 %v2094_v31, %v2064_v4  ;;  %v6446_v46 = vadd.f32 %v1913_v0, %v6240_v62  ;;  %v2024_v44 = vadd.f32 %v2023_v40, %v6431_v33  ;;  %v2067_v60 = vmul.f32 %v6441_v55, %v6441_v55 }
 0x284   : > { %v4624_v16 = vpop.f32.mrf.mxu0 }
 0x285   : > { %v2025_v45 = vadd.f32 %v2024_v44, %v6446_v46  ;;  %v2066_v9 = vmul.f32 %v6446_v46, %v6446_v46  ;;  %v2096_v21 = vadd.f32 %v2095_v27, %v2065_v41  ;;  %v6455_v57 = vadd.f32 %v4624_v16, %v6254_v17 }
 0x286   : > { %v1923_v53 = vpop.f32.mrf.mxu0 }
 0x287   : > { %v2097_v58 = vadd.f32 %v2096_v21, %v2066_v9  ;;  %v6458_v62 = vadd.f32 %v1923_v53, %v6249_v8  ;;  %v2026_v32 = vadd.f32 %v2025_v45, %v6441_v55  ;;  %v2069_v17 = vmul.f32 %v6455_v57, %v6455_v57 }
 0x288   : > { %v4627_v2 = vpop.f32.mrf.mxu0 }
 0x289   : > { %v2027_v22 = vadd.f32 %v2026_v32, %v6458_v62  ;;  %v2068_v43 = vmul.f32 %v6458_v62, %v6458_v62  ;;  %v2098_v30 = vadd.f32 %v2097_v58, %v2067_v60  ;;  %v6465_v18 = vadd.f32 %v4627_v2, %v6264_v34 }
 0x28a   : > { %v1933_v10 = vpop.f32.mrf.mxu0 }
 0x28b   : > { %v2099_v6 = vadd.f32 %v2098_v30, %v2068_v43  ;;  %v6470_v8 = vadd.f32 %v1933_v10, %v6259_v56  ;;  %v2028_v47 = vadd.f32 %v2027_v22, %v6455_v57  ;;  %v2071_v34 = vmul.f32 %v6465_v18, %v6465_v18 }
 0x28c   : > { %v4630_v25 = vpop.f32.mrf.mxu0 }
 0x28d   : > { %v2029_v36 = vadd.f32 %v2028_v47, %v6470_v8  ;;  %v2070_v11 = vmul.f32 %v6470_v8, %v6470_v8  ;;  %v2100_v40 = vadd.f32 %v2099_v6, %v2069_v17  ;;  %v6479_v0 = vadd.f32 %v4630_v25, %v6274_v48 }
 0x28e   : > { %v1943_v4 = vpop.f32.mrf.mxu0 }
 0x28f   : > { %v2101_v31 = vadd.f32 %v2100_v40, %v2070_v11  ;;  %v6482_v56 = vadd.f32 %v1943_v4, %v6269_v52  ;;  %v2030_v41 = vadd.f32 %v2029_v36, %v6465_v18  ;;  %v2073_v48 = vmul.f32 %v6479_v0, %v6479_v0 }
 0x290   : > { %v4633_v27 = vpop.f32.mrf.mxu0 }
 0x291   : > { %v2031_v44 = vadd.f32 %v2030_v41, %v6482_v56  ;;  %v2072_v16 = vmul.f32 %v6482_v56, %v6482_v56  ;;  %v2102_v45 = vadd.f32 %v2101_v31, %v2071_v34  ;;  %v6489_v9 = vadd.f32 %v4633_v27, %v6285_v61 }
 0x292   : > { %v1953_v21 = vpop.f32.mrf.mxu0 }
 0x293   : > { %v2103_v60 = vadd.f32 %v2102_v45, %v2072_v16  ;;  %v1954_v52 = vadd.f32 %v1953_v21, %v6279_v24  ;;  %v2032_v53 = vadd.f32 %v2031_v44, %v6479_v0  ;;  %v2075_v43 = vmul.f32 %v6489_v9, %v6489_v9 }
 0x294   : > { %v4636_v58 = vpop.f32.mrf.mxu0 }
 0x295   : > { %v2033_v32 = vadd.f32 %v2032_v53, %v1954_v52  ;;  %v2074_v2 = vmul.f32 %v1954_v52, %v1954_v52  ;;  %v2104_v22 = vadd.f32 %v2103_v60, %v2073_v48  ;;  %v1969_v61 = vadd.f32 %v4636_v58, %v6299_v37  ;;  %v2005_v48 = vld [vmem:[#allocation4] sm:$0x1]  ;;  %v2045_v53 = vld [vmem:[#allocation5] sm:$0x1] }
 0x296   : > { %v1963_v30 = vpop.f32.mrf.mxu0 }
 0x297   : > { %v2105_v10 = vadd.f32 %v2104_v22, %v2074_v2  ;;  %v1964_v17 = vadd.f32 %v1963_v30, %v6292_v28  ;;  %v2034_v6 = vadd.f32 %v2033_v32, %v6489_v9  ;;  %v2077_v36 = vmul.f32 %v1969_v61, %v1969_v61 }
 0x299   : > { %v2035_v47 = vadd.f32 %v2034_v6, %v1964_v17  ;;  %v2076_v25 = vmul.f32 %v1964_v17, %v1964_v17  ;;  %v2106_v24 = vadd.f32 %v2105_v10, %v2075_v43 }
 0x29b   : > { %v2036_v11 = vadd.f32 %v2035_v47, %v1969_v61  ;;  %v2107_v40 = vadd.f32 %v2106_v24, %v2076_v25 }
 0x29d   : > { %v2037_v34 = vrot.slane %v2036_v11, 4  ;;  %v2108_v4 = vadd.f32 %v2107_v40, %v2077_v36  ;;  %v6503_v36 = vsub.s32 0, %v5187_v54 }
 0x29f   : > { %v2038_v31 = vadd.f32 %v2037_v34, %v2036_v11  ;;  %v2109_v41 = vrot.slane %v2108_v4, 4  ;;  %8341 = vst [vmem:[#allocation17_spill] sm:$0xff] %v6503_v36 }
 0x2a1   : > { %v2039_v27 = vrot.slane %v2038_v31, 2  ;;  %v2110_v44 = vadd.f32 %v2109_v41, %v2108_v4 }
 0x2a3   : > { %v2040_v16 = vadd.f32 %v2039_v27, %v2038_v31  ;;  %v2111_v45 = vrot.slane %v2110_v44, 2 }
 0x2a5   : > { %v2041_v21 = vrot.slane %v2040_v16, 1  ;;  %v2112_v37 = vadd.f32 %v2111_v45, %v2110_v44 }
 0x2a7   : > { %v2042_v28 = vadd.f32 %v2041_v21, %v2040_v16  ;;  %v2113_v60 = vrot.slane %v2112_v37, 1 }
 0x2a9   : > { %v2043_v58 = vadd.f32 %v2042_v28, %v2005_v48  ;;  %v2114_v32 = vadd.f32 %v2113_v60, %v2112_v37  ;;  %v2426_v60 = vld [vmem:[#allocation11 + $0x270] sm:$0xff] }
 0x2ab   : > { %2044 = vst [vmem:[#allocation4] sm:$0x1] %v2043_v58  ;;  %v2115_v2 = vadd.f32 %v2114_v32, %v2045_v53  ;;  %v2427_v32 = vld [vmem:[#allocation11 + $0x278] sm:$0xff] }
 0x2ad   : > { %2116 = vst [vmem:[#allocation5] sm:$0x1] %v2115_v2 }
 0x2b2   : > { %v2117_v22 = vld [vmem:[#allocation4] sm:$0x1] }
 0x2b3   : > { %v2118_v43 = vmul.f32 0.00390625, %v2117_v22  ;;  %2310 = vst [vmem:[#allocation4] sm:$0x1] %v8293_v1 }
 0x2b4   : > { %v2119_v30 = vld [vmem:[#allocation5] sm:$0x1] }
 0x2b5   : > { %v2120_v10 = vmul.f32 0.00390625, %v2119_v30  ;;  %v2121_v6 = vmul.f32 %v2118_v43, %v2118_v43  ;;  %2311 = vst [vmem:[#allocation5] sm:$0x1] %v8293_v1 }
 0x2b7   : > { %v2122_v47 = vsub.f32 %v2120_v10, %v2121_v6 }
 0x2b9   : > { %v2123_v25 = vmax.f32 %v2122_v47, 0.0 }
 0x2bb   : > { %v2124_v24 = vadd.f32 1e-05, %v2123_v25 }
 0x2bd   : > { %4789 = vrsqrt.f32 %v2124_v24 }
 0x2ca   : > { %v4790_v11 = vpop.eup %4789 }
 0x2cb   : > { %v2126_v40 = vmul.f32 %v4790_v11, %v2118_v43  ;;  %v6506_v34 = vrot.slane %v4790_v11, %v6503_v36 }
 0x2cd   : > { %v6509_v4 = vmul.f32 %v6506_v34, %v1964_v17  ;;  %v6512_v31 = vrot.slane %v2126_v40, %v6503_v36  ;;  %v2165_v27 = vmul.f32 %v6506_v34, %v6309_v12  ;;  %v2167_v44 = vmul.f32 %v6506_v34, %v6325_v14 }
 0x2ce   : > { %v6522_v16 = vmul.f32 %v6506_v34, %v6422_v13  ;;  %v6525_v45 = vmul.f32 %v6506_v34, %v1954_v52  ;;  %v6528_v17 = vmul.f32 %v6506_v34, %v1969_v61  ;;  %v6532_v21 = vmul.f32 %v6506_v34, %v6417_v49 }
 0x2cf   : > { %v6536_v12 = vmul.f32 %v6506_v34, %v6434_v29  ;;  %v6540_v14 = vmul.f32 %v6506_v34, %v6431_v33  ;;  %v6544_v13 = vmul.f32 %v6506_v34, %v6446_v46  ;;  %v6548_v52 = vmul.f32 %v6506_v34, %v6441_v55 }
 0x2d0   : > { %v6552_v49 = vmul.f32 %v6506_v34, %v6458_v62  ;;  %v6556_v29 = vmul.f32 %v6506_v34, %v6455_v57  ;;  %v6560_v33 = vmul.f32 %v6506_v34, %v6470_v8  ;;  %v2166_v46 = vmul.f32 %v6506_v34, %v6305_v35 }
 0x2d1   : > { %v6566_v61 = vmul.f32 %v6506_v34, %v6465_v18  ;;  %v6570_v55 = vmul.f32 %v6506_v34, %v6482_v56  ;;  %v6574_v62 = vmul.f32 %v6506_v34, %v6479_v0  ;;  %v2168_v57 = vmul.f32 %v6506_v34, %v6322_v51  ;;  %v2414_v56 = vld [vmem:[#allocation11 + $0x210] sm:$0xff] }
 0x2d2   : > { %v6580_v8 = vmul.f32 %v6506_v34, %v6489_v9  ;;  %v2205_v35 = vsub.f32 %v2167_v44, %v6512_v31  ;;  %v2203_v10 = vsub.f32 %v2165_v27, %v6512_v31  ;;  %v2204_v6 = vsub.f32 %v2166_v46, %v6512_v31 }
 0x2d3   : > { %v2206_v22 = vsub.f32 %v2168_v57, %v6512_v31  ;;  %v2169_v40 = vmul.f32 %v6506_v34, %v6340_v7  ;;  %v2170_v44 = vmul.f32 %v6506_v34, %v6334_v26  ;;  %v2171_v53 = vmul.f32 %v6506_v34, %v6355_v15 }
 0x2d4   : > { %v6616_v47 = vmax.f32 %v2205_v35, 0.0  ;;  %v6621_v24 = vmax.f32 %v2203_v10, 0.0  ;;  %v6623_v11 = vmax.f32 %v2204_v6, 0.0  ;;  %v2172_v28 = vmul.f32 %v6506_v34, %v6352_v23 }
 0x2d5   : > { %v6619_v25 = vmax.f32 %v2206_v22, 0.0  ;;  %v2207_v30 = vsub.f32 %v2169_v40, %v6512_v31  ;;  %v2208_v41 = vsub.f32 %v2170_v44, %v6512_v31  ;;  %v8342_v44 = vld [vmem:[#allocation16_spill] sm:$0xff]  ;;  %v2178_v18 = vmul.f32 %v6506_v34, %v6393_v3 }
 0x2d6   : > { %2916 = vmatprep.mubr.f32.mxu1 %v6616_v47  ;;  %v2492_v27 = vrot.slane %v6616_v47, 7  ;;  %v2639_v57 = vrot.slane %v6616_v47, %v5206_v63  ;;  %v2493_v35 = vrot.slane %v6621_v24, 7  ;;  %v2511_v22 = vrot.slane %v6623_v11, 7 }
 0x2d7   : > { %v2510_v46 = vrot.slane %v6619_v25, 7  ;;  %v2643_v10 = vrot.slane %v6621_v24, %v5206_v63  ;;  %v2564_v6 = vrot.slane %v6616_v47, 1  ;;  %v2582_v26 = vrot.slane %v6619_v25, 1 }
 0x2d8   : > { %v2547_v2 = vsel %vm508_vm0, %v2511_v22, %v2493_v35  ;;  %v6668_v48 = vmax.f32 %v2207_v30, 0.0  ;;  %v6670_v9 = vmax.f32 %v2208_v41, 0.0  ;;  %v2565_v41 = vrot.slane %v6621_v24, 1 }
 0x2d9   : > { %v2546_v7 = vsel %vm508_vm0, %v2510_v46, %v2492_v27  ;;  %v2710_v58 = vsel %vm619_vm1, %v2643_v10, %v2547_v2  ;;  %v6655_v40 = vsel %vm581_vm2, %v2564_v6, %v2582_v26  ;;  %v2529_v2 = vsel %vm508_vm0, %v2493_v35, %v2511_v22 }
 0x2da   : > { %v6645_v43 = vsel %vm619_vm1, %v2639_v57, %v2546_v7  ;;  %3141 = vmatprep.mubr.f32.mxu0 %v2710_v58  ;;  %v2747_v57 = vrot.slane %v6619_v25, %v8342_v44  ;;  %v2459_v7 = vld [vmem:[#allocation11 + $0x378] sm:$0xff]  ;;  %v2618_v10 = vsel %vm581_vm2, %v2582_v26, %v2564_v6  ;;  %v6674_v15 = vsel %vm508_vm0, %v2492_v27, %v2510_v46  ;;  %v2424_v27 = vld [vmem:[#allocation11 + $0x260] sm:$0xff] }
 0x2db   : > { %2917 = vmatmul.mubr.f32.vlgmr.msra.gmra.mxu1 %v6645_v43  ;;  %3142 = vmatmul.mubr.f32.vlgmr.msra.gmra.mxu0 %v6655_v40  ;;  %v2583_v30 = vrot.slane %v6623_v11, 1  ;;  %v2209_v46 = vsub.f32 %v2171_v53, %v6512_v31  ;;  %v2210_v35 = vsub.f32 %v2172_v28, %v6512_v31  ;;  %v2495_v22 = vrot.slane %v6668_v48, 7  ;;  %v2423_v6 = vld [vmem:[#allocation11 + $0x258] sm:$0xff] }
 0x2dc   : > { %2921 = vmatprep.mubr.f32.mxu1 %v6619_v25  ;;  %3303 = vmatpush1.msra.mxu1 %v2427_v32  ;;  %v2425_v32 = vld [vmem:[#allocation11 + $0x268] sm:$0xff]  ;;  %v6681_v23 = vsel %vm734_vm3, %v2747_v57, %v2618_v10  ;;  %v2751_v28 = vrot.slane %v6623_v11, %v8342_v44  ;;  %v2173_v53 = vmul.f32 %v6506_v34, %v6370_v38 }
 0x2dd   : > { %3146 = vmatprep.mubr.f32.mxu0 %v2529_v2  ;;  %3304 = vmatprep.subr.mxu1 %v8293_v1  ;;  %v6696_v26 = vsel %vm581_vm2, %v2565_v41, %v2583_v30  ;;  %v2651_v57 = vrot.slane %v6668_v48, %v5206_v63  ;;  %v2174_v10 = vmul.f32 %v6506_v34, %v6364_v20 }
 0x2de   : > { %3528 = vmatpush1.msra.mxu0 %v2459_v7  ;;  %3305 = vmatpush1.msra.mxu1 %v2426_v60  ;;  %v2513_v60 = vrot.slane %v6670_v9, 7  ;;  %v2422_v7 = vld [vmem:[#allocation11 + $0x250] sm:$0xff] }
 0x2df   : > { %2922 = vmatmul.mubr.f32.gmra.mxu1 %v6674_v15  ;;  %3147 = vmatmul.mubr.f32.gmra.mxu0 %v6681_v23 }
 0x2e0   : > { %2926 = vmatprep.mubr.f32.mxu1 %v6621_v24  ;;  %3306 = vmatprep.subr.mxu1 %v8293_v1  ;;  %v2549_v38 = vsel %vm508_vm0, %v2513_v60, %v2495_v22 }
 0x2e1   : > { %3151 = vmatprep.mubr.f32.mxu0 %v6645_v43  ;;  %3307 = vmatpush1.msra.mxu1 %v2425_v32  ;;  %v6710_v32 = vmax.f32 %v2209_v46, 0.0  ;;  %v6726_v20 = vsel %vm619_vm1, %v2651_v57, %v2549_v38  ;;  %v2420_v46 = vld [vmem:[#allocation11 + $0x240] sm:$0xff]  ;;  %v6742_v57 = vsel %vm508_vm0, %v2495_v22, %v2513_v60  ;;  %v2176_v38 = vmul.f32 %v6506_v34, %v6382_v59  ;;  %v2417_v22 = vld [vmem:[#allocation11 + $0x228] sm:$0xff] }
 0x2e2   : > { %3308 = vmatprep.subr.mxu1 %v8293_v1  ;;  %8343 = vst [vmem:[#allocation25_spill] sm:$0xff] %v6742_v57  ;;  %v2567_v60 = vrot.slane %v6668_v48, 1  ;;  %v2585_v59 = vrot.slane %v6670_v9, 1  ;;  %3529 = vmatprep.subr.mxu0 %v8293_v1 }
 0x2e3   : > { %2927 = vmatmul.mubr.f32.gmra.mxu1 %v2710_v58  ;;  %3152 = vmatmul.mubr.f32.gmra.mxu0 %v6696_v26  ;;  %v2619_v58 = vsel %vm581_vm2, %v2583_v30, %v2565_v41  ;;  %v2421_v41 = vld [vmem:[#allocation11 + $0x248] sm:$0xff]  ;;  %v2214_v51 = vsub.f32 %v2176_v38, %v6512_v31  ;;  %v2759_v38 = vrot.slane %v6670_v9, %v8342_v44 }
 0x2e4   : > { %2931 = vmatprep.mubr.f32.mxu1 %v6623_v11  ;;  %3309 = vmatpush1.msra.mxu1 %v2424_v27  ;;  %v6712_v27 = vmax.f32 %v2210_v35, 0.0  ;;  %v6721_v30 = vsel %vm734_vm3, %v2751_v28, %v2619_v58  ;;  %v2212_v35 = vsub.f32 %v2174_v10, %v6512_v31  ;;  %v2419_v58 = vld [vmem:[#allocation11 + $0x238] sm:$0xff]  ;;  %v2418_v10 = vld [vmem:[#allocation11 + $0x230] sm:$0xff] }
 0x2e5   : > { %3310 = vmatprep.subr.mxu1 %v8293_v1  ;;  %3156 = vmatprep.mubr.f32.mxu0 %v6674_v15 }
 0x2e6   : > { %3311 = vmatpush1.msra.mxu1 %v2423_v6  ;;  %v2496_v6 = vrot.slane %v6710_v32, 7  ;;  %v2514_v28 = vrot.slane %v6712_v27, 7 }
 0x2e7   : > { %2932 = vmatmul.mubr.f32.gmra.mxu1 %v2529_v2  ;;  %3312 = vmatprep.subr.mxu1 %v8293_v1  ;;  %v2211_v2 = vsub.f32 %v2173_v53, %v6512_v31  ;;  %v2175_v53 = vmul.f32 %v6506_v34, %v6385_v50 }
 0x2e8   : > { %2936 = vmatprep.mubr.f32.mxu1 %v6616_v47  ;;  %3313 = vmatpush1.msra.mxu1 %v2422_v7  ;;  %v2655_v7 = vrot.slane %v6710_v32, %v5206_v63  ;;  %v2550_v50 = vsel %vm508_vm0, %v2514_v28, %v2496_v6 }
 0x2e9   : > { %3157 = vmatmul.mubr.f32.gmra.mxu0 %v6721_v30  ;;  %3314 = vmatprep.subr.mxu1 %v8293_v1 }
 0x2ea   : > { %3161 = vmatprep.mubr.f32.mxu0 %v6726_v20  ;;  %3315 = vmatpush1.msra.mxu1 %v2421_v41  ;;  %v6749_v41 = vmax.f32 %v2211_v2, 0.0  ;;  %v6764_v2 = vsel %vm619_vm1, %v2655_v7, %v2550_v50  ;;  %v2415_v7 = vld [vmem:[#allocation11 + $0x218] sm:$0xff]  ;;  %v6786_v50 = vsel %vm508_vm0, %v2496_v6, %v2514_v28  ;;  %v2413_v28 = vld [vmem:[#allocation11 + $0x208] sm:$0xff] }
 0x2eb   : > { %2937 = vmatmul.mubr.f32.gmra.mxu1 %v6645_v43  ;;  %3316 = vmatprep.subr.mxu1 %v8293_v1  ;;  %8345 = vst [vmem:[#allocation18_spill] sm:$0xff] %v6764_v2  ;;  %8346 = vst [vmem:[#allocation27_spill] sm:$0xff] %v6786_v50 }
 0x2ec   : > { %2941 = vmatprep.mubr.f32.mxu1 %v6619_v25  ;;  %3317 = vmatpush1.msra.mxu1 %v2420_v46  ;;  %v6751_v46 = vmax.f32 %v2212_v35, 0.0  ;;  %v2416_v35 = vld [vmem:[#allocation11 + $0x220] sm:$0xff]  ;;  %v2497_v0 = vrot.slane %v6749_v41, 7 }
 0x2ed   : > { %3162 = vmatmul.mubr.f32.gmra.mxu0 %v6655_v40  ;;  %3318 = vmatprep.subr.mxu1 %v8293_v1 }
 0x2ee   : > { %8344 = vst [vmem:[#allocation21_spill] sm:$0xff] %v6751_v46  ;;  %3166 = vmatprep.mubr.f32.mxu0 %v6742_v57  ;;  %3319 = vmatpush1.msra.mxu1 %v2419_v58  ;;  %v2213_v58 = vsub.f32 %v2175_v53, %v6512_v31  ;;  %v2515_v37 = vrot.slane %v6751_v46, 7  ;;  %v6779_v53 = vsel %vm581_vm2, %v2567_v60, %v2585_v59 }
 0x2ef   : > { %2942 = vmatmul.mubr.f32.gmra.mxu1 %v6674_v15  ;;  %3320 = vmatprep.subr.mxu1 %v8293_v1 }
 0x2f0   : > { %2946 = vmatprep.mubr.f32.mxu1 %v6668_v48  ;;  %3321 = vmatpush1.msra.mxu1 %v2418_v10  ;;  %v2177_v10 = vmul.f32 %v6506_v34, %v6398_v42  ;;  %v2659_v42 = vrot.slane %v6749_v41, %v5206_v63  ;;  %v6795_v36 = vmax.f32 %v2213_v58, 0.0  ;;  %v2551_v6 = vsel %vm508_vm0, %v2515_v37, %v2497_v0  ;;  %v2412_v58 = vld [vmem:[#allocation11 + $0x200] sm:$0xff] }
 0x2f1   : > { %3167 = vmatmul.mubr.f32.gmra.mxu0 %v6681_v23  ;;  %3322 = vmatprep.subr.mxu1 %v8293_v1 }
 0x2f2   : > { %3171 = vmatprep.mubr.f32.mxu0 %v6764_v2  ;;  %3323 = vmatpush1.msra.mxu1 %v2417_v22  ;;  %v2621_v22 = vsel %vm581_vm2, %v2585_v59, %v2567_v60  ;;  %8347 = vst [vmem:[#allocation22_spill] sm:$0xff] %v6795_v36  ;;  %v2586_v60 = vrot.slane %v6712_v27, 1  ;;  %v6814_v59 = vsel %vm619_vm1, %v2659_v42, %v2551_v6 }
 0x2f3   : > { %2947 = vmatmul.mubr.f32.gmra.mxu1 %v6726_v20  ;;  %3324 = vmatprep.subr.mxu1 %v8293_v1  ;;  %v6807_v3 = vsel %vm734_vm3, %v2759_v38, %v2621_v22  ;;  %8350 = vst [vmem:[#allocation26_spill] sm:$0xff] %v6814_v59  ;;  %v2498_v38 = vrot.slane %v6795_v36, 7  ;;  %v2179_v42 = vmul.f32 %v6506_v34, %v6410_v5 }
 0x2f4   : > { %2951 = vmatprep.mubr.f32.mxu1 %v6670_v9  ;;  %3325 = vmatpush1.msra.mxu1 %v2416_v35  ;;  %v6797_v35 = vmax.f32 %v2214_v51, 0.0  ;;  %8349 = vst [vmem:[#allocation31_spill] sm:$0xff] %v6807_v3  ;;  %v2568_v51 = vrot.slane %v6710_v32, 1  ;;  %v6836_v6 = vsel %vm508_vm0, %v2497_v0, %v2515_v37  ;;  %v2663_v5 = vrot.slane %v6795_v36, %v5206_v63  ;;  %v2442_v0 = vld [vmem:[#allocation11 + $0x2f0] sm:$0xff] }
 0x2f5   : > { %3172 = vmatmul.mubr.f32.gmra.mxu0 %v6779_v53  ;;  %3326 = vmatprep.subr.mxu1 %v8293_v1  ;;  %8351 = vst [vmem:[#allocation20_spill] sm:$0xff] %v6836_v6 }
 0x2f6   : > { %8348 = vst [vmem:[#allocation19_spill] sm:$0xff] %v6797_v35  ;;  %3176 = vmatprep.mubr.f32.mxu0 %v6786_v50  ;;  %3327 = vmatpush1.msra.mxu1 %v2415_v7  ;;  %v2215_v7 = vsub.f32 %v2177_v10, %v6512_v31  ;;  %v2516_v22 = vrot.slane %v6797_v35, 7  ;;  %v2763_v10 = vrot.slane %v6712_v27, %v8342_v44 }
 0x2f7   : > { %2952 = vmatmul.mubr.f32.gmra.mxu1 %v6742_v57  ;;  %3328 = vmatprep.subr.mxu1 %v8293_v1  ;;  %v2216_v57 = vsub.f32 %v2178_v18, %v6512_v31  ;;  %v6829_v18 = vsel %vm581_vm2, %v2568_v51, %v2586_v60 }
 0x2f8   : > { %2956 = vmatprep.mubr.f32.mxu1 %v6710_v32  ;;  %3329 = vmatpush1.msra.mxu1 %v2414_v56  ;;  %v2443_v56 = vld [vmem:[#allocation11 + $0x2f8] sm:$0xff]  ;;  %v2552_v37 = vsel %vm508_vm0, %v2516_v22, %v2498_v38 }
 0x2f9   : > { %3177 = vmatmul.mubr.f32.gmra.mxu0 %v6807_v3  ;;  %3330 = vmatprep.subr.mxu1 %v8293_v1  ;;  %v6845_v3 = vmax.f32 %v2215_v7, 0.0  ;;  %v2457_v7 = vld [vmem:[#allocation11 + $0x368] sm:$0xff] }
 0x2fa   : > { %3181 = vmatprep.mubr.f32.mxu0 %v6814_v59  ;;  %3331 = vmatpush1.msra.mxu1 %v2413_v28  ;;  %v2622_v28 = vsel %vm581_vm2, %v2586_v60, %v2568_v51  ;;  %v2458_v51 = vld [vmem:[#allocation11 + $0x370] sm:$0xff]  ;;  %v6865_v60 = vsel %vm619_vm1, %v2663_v5, %v2552_v37  ;;  %v6884_v37 = vsel %vm508_vm0, %v2498_v38, %v2516_v22  ;;  %v2455_v38 = vld [vmem:[#allocation11 + $0x358] sm:$0xff] }
 0x2fb   : > { %2957 = vmatmul.mubr.f32.gmra.mxu1 %v6764_v2  ;;  %3332 = vmatprep.subr.mxu1 %v8293_v1  ;;  %v2180_v2 = vmul.f32 %v6506_v34, %v6407_v39  ;;  %v6857_v39 = vsel %vm734_vm3, %v2763_v10, %v2622_v28  ;;  %v2569_v34 = vrot.slane %v6749_v41, 1  ;;  %8353 = vst [vmem:[#allocation28_spill] sm:$0xff] %v6865_v60  ;;  %v2499_v10 = vrot.slane %v6845_v3, 7 }
 0x2fc   : > { %2961 = vmatprep.mubr.f32.mxu1 %v6712_v27  ;;  %3333 = vmatpush1.msra.mxu1 %v2412_v58  ;;  %v6847_v58 = vmax.f32 %v2216_v57, 0.0  ;;  %8352 = vst [vmem:[#allocation32_spill] sm:$0xff] %v6857_v39  ;;  %v2587_v57 = vrot.slane %v6751_v46, 1 }
 0x2fd   : > { %3182 = vmatmul.mubr.f32.gmra.mxu0 %v6829_v18  ;;  %3334 = vmatprep.subr.mxu1 %v8293_v1 }
 0x2fe   : > { %3186 = vmatprep.mubr.f32.mxu0 %v6836_v6  ;;  %3335 = vmatpush2.msra.mxu1 %v2443_v56  ;;  %v2217_v56 = vsub.f32 %v2179_v42, %v6512_v31  ;;  %v2517_v28 = vrot.slane %v6847_v58, 7  ;;  %v6877_v5 = vsel %vm581_vm2, %v2569_v34, %v2587_v57  ;;  %v2456_v42 = vld [vmem:[#allocation11 + $0x360] sm:$0xff] }
 0x2ff   : > { %2962 = vmatmul.mubr.f32.gmra.mxu1 %v6786_v50  ;;  %3336 = vmatprep.subr.mxu1 %v8293_v1  ;;  %v2218_v50 = vsub.f32 %v2180_v2, %v6512_v31  ;;  %v2767_v2 = vrot.slane %v6751_v46, %v8342_v44 }
 0x300   : > { %2966 = vmatprep.mubr.f32.mxu1 %v6749_v41  ;;  %3337 = vmatpush2.msra.mxu1 %v2442_v0  ;;  %v2623_v0 = vsel %vm581_vm2, %v2587_v57, %v2569_v34  ;;  %v2588_v34 = vrot.slane %v6797_v35, 1 }
 0x301   : > { %3187 = vmatmul.mubr.f32.gmra.mxu0 %v6857_v39  ;;  %v6891_v39 = vmax.f32 %v2217_v56, 0.0  ;;  %3338 = vmatprep.subr.mxu1 %v8293_v1  ;;  %v6903_v22 = vsel %vm734_vm3, %v2767_v2, %v2623_v0 }
 0x302   : > { %3191 = vmatprep.mubr.f32.mxu0 %v6865_v60  ;;  %3530 = vmatpush1.msra.mxu0 %v2458_v51  ;;  %v2667_v51 = vrot.slane %v6845_v3, %v5206_v63  ;;  %8356 = vst [vmem:[#allocation24_spill] sm:$0xff] %v6903_v22 }
 0x303   : > { %2967 = vmatmul.mubr.f32.gmra.mxu1 %v6814_v59  ;;  %3531 = vmatprep.subr.mxu0 %v8293_v1  ;;  %v2441_v59 = vld [vmem:[#allocation11 + $0x2e8] sm:$0xff]  ;;  %8354 = vst [vmem:[#allocation23_spill] sm:$0xff] %v6891_v39  ;;  %v2500_v56 = vrot.slane %v6891_v39, 7 }
 0x304   : > { %2971 = vmatprep.mubr.f32.mxu1 %v6751_v46  ;;  %3532 = vmatpush1.msra.mxu0 %v2457_v7  ;;  %v6893_v46 = vmax.f32 %v2218_v50, 0.0  ;;  %v2553_v7 = vsel %vm508_vm0, %v2517_v28, %v2499_v10  ;;  %v2570_v50 = vrot.slane %v6795_v36, 1 }
 0x305   : > { %3192 = vmatmul.mubr.f32.gmra.mxu0 %v6877_v5  ;;  %3533 = vmatprep.subr.mxu0 %v8293_v1  ;;  %v6910_v57 = vsel %vm619_vm1, %v2667_v51, %v2553_v7  ;;  %v2771_v51 = vrot.slane %v6797_v35, %v8342_v44  ;;  %v6929_v7 = vsel %vm508_vm0, %v2499_v10, %v2517_v28  ;;  %v2452_v28 = vld [vmem:[#allocation11 + $0x340] sm:$0xff] }
 0x306   : > { %8355 = vst [vmem:[#allocation36_spill] sm:$0xff] %v6893_v46  ;;  %3196 = vmatprep.mubr.f32.mxu0 %v6884_v37  ;;  %3534 = vmatpush1.msra.mxu0 %v2456_v42  ;;  %8357 = vst [vmem:[#allocation38_spill] sm:$0xff] %v6910_v57  ;;  %v2518_v2 = vrot.slane %v6893_v46, 7  ;;  %v2440_v42 = vld [vmem:[#allocation11 + $0x2e0] sm:$0xff]  ;;  %v6921_v0 = vsel %vm581_vm2, %v2570_v50, %v2588_v34 }
 0x307   : > { %2972 = vmatmul.mubr.f32.gmra.mxu1 %v6836_v6  ;;  %3535 = vmatprep.subr.mxu0 %v8293_v1  ;;  %8358 = vst [vmem:[#allocation33_spill] sm:$0xff] %v6921_v0 }
 0x308   : > { %2976 = vmatprep.mubr.f32.mxu1 %v6795_v36  ;;  %3339 = vmatpush2.msra.mxu1 %v2441_v59  ;;  %v2454_v59 = vld [vmem:[#allocation11 + $0x350] sm:$0xff]  ;;  %v8359_v36 = vsub.f32 %v6522_v16, %v6512_v31  ;;  %v2554_v10 = vsel %vm508_vm0, %v2518_v2, %v2500_v56  ;;  %v2571_v16 = vrot.slane %v6845_v3, 1 }
 0x309   : > { %3197 = vmatmul.mubr.f32.gmra.mxu0 %v6903_v22  ;;  %3340 = vmatprep.subr.mxu1 %v8293_v1  ;;  %v2453_v22 = vld [vmem:[#allocation11 + $0x348] sm:$0xff] }
 0x30a   : > { %3201 = vmatprep.mubr.f32.mxu0 %v6910_v57  ;;  %3536 = vmatpush1.msra.mxu0 %v2455_v38  ;;  %v2624_v38 = vsel %vm581_vm2, %v2588_v34, %v2570_v50  ;;  %v2439_v34 = vld [vmem:[#allocation11 + $0x2d8] sm:$0xff] }
 0x30b   : > { %2977 = vmatmul.mubr.f32.gmra.mxu1 %v6865_v60  ;;  %3537 = vmatprep.subr.mxu0 %v8293_v1  ;;  %v2671_v60 = vrot.slane %v6891_v39, %v5206_v63 }
 0x30c   : > { %2981 = vmatprep.mubr.f32.mxu1 %v6797_v35  ;;  %3341 = vmatpush2.msra.mxu1 %v2440_v42  ;;  %v6938_v35 = vmax.f32 %v8359_v36, 0.0  ;;  %v6953_v36 = vsel %vm734_vm3, %v2771_v51, %v2624_v38  ;;  %v6978_v51 = vsel %vm508_vm0, %v2500_v56, %v2518_v2  ;;  %v2438_v2 = vld [vmem:[#allocation11 + $0x2d0] sm:$0xff] }
 0x30d   : > { %3202 = vmatmul.mubr.f32.gmra.mxu0 %v6921_v0  ;;  %v8361_v0 = vsub.f32 %v6532_v21, %v6512_v31  ;;  %v2589_v21 = vrot.slane %v6847_v58, 1  ;;  %v6960_v50 = vsel %vm619_vm1, %v2671_v60, %v2554_v10  ;;  %3342 = vmatprep.subr.mxu1 %v8293_v1 }
 0x30e   : > { %8360 = vst [vmem:[#allocation29_spill] sm:$0xff] %v6938_v35  ;;  %3206 = vmatprep.mubr.f32.mxu0 %v6929_v7  ;;  %3538 = vmatpush1.msra.mxu0 %v2454_v59  ;;  %8363 = vst [vmem:[#allocation37_spill] sm:$0xff] %v6960_v50  ;;  %v2501_v42 = vrot.slane %v6938_v35, 7  ;;  %v2675_v10 = vrot.slane %v6938_v35, %v5206_v63 }
 0x30f   : > { %v6943_v6 = vmax.f32 %v8361_v0, 0.0  ;;  %2982 = vmatmul.mubr.f32.gmra.mxu1 %v6884_v37  ;;  %3539 = vmatprep.subr.mxu0 %v8293_v1  ;;  %v6971_v60 = vsel %vm581_vm2, %v2571_v16, %v2589_v21  ;;  %v2775_v0 = vrot.slane %v6847_v58, %v8342_v44  ;;  %v2625_v38 = vsel %vm581_vm2, %v2589_v21, %v2571_v16  ;;  %v2450_v16 = vld [vmem:[#allocation11 + $0x330] sm:$0xff] }
 0x310   : > { %2986 = vmatprep.mubr.f32.mxu1 %v6845_v3  ;;  %3540 = vmatpush1.msra.mxu0 %v2453_v22  ;;  %v2451_v22 = vld [vmem:[#allocation11 + $0x338] sm:$0xff]  ;;  %8364 = vst [vmem:[#allocation30_spill] sm:$0xff] %v6971_v60  ;;  %v2590_v21 = vrot.slane %v6893_v46, 1 }
 0x311   : > { %8362 = vst [vmem:[#allocation41_spill] sm:$0xff] %v6943_v6  ;;  %3207 = vmatmul.mubr.f32.gmra.mxu0 %v6953_v36  ;;  %3541 = vmatprep.subr.mxu0 %v8293_v1  ;;  %v2519_v59 = vrot.slane %v6943_v6, 7 }
 0x312   : > { %3211 = vmatprep.mubr.f32.mxu0 %v6960_v50  ;;  %3542 = vmatpush1.msra.mxu0 %v2452_v28  ;;  %v8365_v28 = vsub.f32 %v6536_v12, %v6512_v31  ;;  %v7003_v12 = vsel %vm734_vm3, %v2775_v0, %v2625_v38 }
 0x313   : > { %2987 = vmatmul.mubr.f32.gmra.mxu1 %v6910_v57  ;;  %3543 = vmatprep.subr.mxu0 %v8293_v1  ;;  %v2555_v56 = vsel %vm508_vm0, %v2519_v59, %v2501_v42  ;;  %8367 = vst [vmem:[#allocation43_spill] sm:$0xff] %v7003_v12 }
 0x314   : > { %2991 = vmatprep.mubr.f32.mxu1 %v6847_v58  ;;  %3343 = vmatpush2.msra.mxu1 %v2439_v34  ;;  %v6988_v57 = vmax.f32 %v8365_v28, 0.0  ;;  %v8366_v34 = vsub.f32 %v6540_v14, %v6512_v31  ;;  %v2572_v14 = vrot.slane %v6891_v39, 1  ;;  %v2449_v28 = vld [vmem:[#allocation11 + $0x328] sm:$0xff] }
 0x315   : > { %3212 = vmatmul.mubr.f32.gmra.mxu0 %v6971_v60  ;;  %3344 = vmatprep.subr.mxu1 %v8293_v1 }
 0x316   : > { %v6993_v60 = vmax.f32 %v8366_v34, 0.0  ;;  %3216 = vmatprep.mubr.f32.mxu0 %v6978_v51  ;;  %3544 = vmatpush1.msra.mxu0 %v2451_v22  ;;  %v7011_v22 = vsel %vm619_vm1, %v2675_v10, %v2555_v56  ;;  %v2502_v34 = vrot.slane %v6988_v57, 7  ;;  %v7021_v38 = vsel %vm581_vm2, %v2572_v14, %v2590_v21  ;;  %v2448_v56 = vld [vmem:[#allocation11 + $0x320] sm:$0xff] }
 0x317   : > { %2992 = vmatmul.mubr.f32.gmra.mxu1 %v6929_v7  ;;  %3545 = vmatprep.subr.mxu0 %v8293_v1  ;;  %8368 = vst [vmem:[#allocation39_spill] sm:$0xff] %v7011_v22  ;;  %8369 = vst [vmem:[#allocation34_spill] sm:$0xff] %v7021_v38  ;;  %v2779_v10 = vrot.slane %v6893_v46, %v8342_v44 }
 0x318   : > { %2996 = vmatprep.mubr.f32.mxu1 %v6891_v39  ;;  %3345 = vmatpush2.msra.mxu1 %v2438_v2  ;;  %v2520_v0 = vrot.slane %v6993_v60, 7  ;;  %v7028_v2 = vsel %vm508_vm0, %v2501_v42, %v2519_v59  ;;  %v2447_v59 = vld [vmem:[#allocation11 + $0x318] sm:$0xff] }
 0x319   : > { %3217 = vmatmul.mubr.f32.gmra.mxu0 %v7003_v12  ;;  %v2437_v12 = vld [vmem:[#allocation11 + $0x2c8] sm:$0xff]  ;;  %3346 = vmatprep.subr.mxu1 %v8293_v1 }
 0x31a   : > { %3221 = vmatprep.mubr.f32.mxu0 %v7011_v22  ;;  %3546 = vmatpush1.msra.mxu0 %v2450_v16  ;;  %v2626_v16 = vsel %vm581_vm2, %v2590_v21, %v2572_v14  ;;  %v2556_v42 = vsel %vm508_vm0, %v2520_v0, %v2502_v34 }
 0x31b   : > { %2997 = vmatmul.mubr.f32.gmra.mxu1 %v6960_v50  ;;  %3547 = vmatprep.subr.mxu0 %v8293_v1  ;;  %v2679_v50 = vrot.slane %v6988_v57, %v5206_v63 }
 0x31c   : > { %3001 = vmatprep.mubr.f32.mxu1 %v6893_v46  ;;  %3548 = vmatpush1.msra.mxu0 %v2449_v28  ;;  %v8370_v46 = vsub.f32 %v6544_v13, %v6512_v31  ;;  %v7053_v13 = vsel %vm734_vm3, %v2779_v10, %v2626_v16  ;;  %v2436_v10 = vld [vmem:[#allocation11 + $0x2c0] sm:$0xff]  ;;  %v7079_v16 = vsel %vm508_vm0, %v2502_v34, %v2520_v0  ;;  %v2592_v0 = vrot.slane %v6993_v60, 1 }
 0x31d   : > { %3222 = vmatmul.mubr.f32.gmra.mxu0 %v7021_v38  ;;  %3549 = vmatprep.subr.mxu0 %v8293_v1  ;;  %v8372_v38 = vsub.f32 %v6548_v52, %v6512_v31  ;;  %8374 = vst [vmem:[#allocation35_spill] sm:$0xff] %v7053_v13  ;;  %v2573_v52 = vrot.slane %v6938_v35, 1  ;;  %v7060_v14 = vsel %vm619_vm1, %v2679_v50, %v2556_v42 }
 0x31e   : > { %v7038_v28 = vmax.f32 %v8370_v46, 0.0  ;;  %3226 = vmatprep.mubr.f32.mxu0 %v7028_v2  ;;  %3550 = vmatpush1.msra.mxu0 %v2448_v56  ;;  %v2591_v46 = vrot.slane %v6943_v6, 1  ;;  %8375 = vst [vmem:[#allocation46_spill] sm:$0xff] %v7060_v14  ;;  %v2783_v56 = vrot.slane %v6943_v6, %v8342_v44 }
 0x31f   : > { %v7043_v39 = vmax.f32 %v8372_v38, 0.0  ;;  %3002 = vmatmul.mubr.f32.gmra.mxu1 %v6978_v51  ;;  %3551 = vmatprep.subr.mxu0 %v8293_v1 }
 0x320   : > { %8371 = vst [vmem:[#allocation45_spill] sm:$0xff] %v7038_v28  ;;  %3006 = vmatprep.mubr.f32.mxu1 %v6938_v35  ;;  %3347 = vmatpush2.msra.mxu1 %v2437_v12  ;;  %v2503_v21 = vrot.slane %v7038_v28, 7  ;;  %v2446_v12 = vld [vmem:[#allocation11 + $0x310] sm:$0xff]  ;;  %v7071_v50 = vsel %vm581_vm2, %v2573_v52, %v2591_v46  ;;  %v2627_v42 = vsel %vm581_vm2, %v2591_v46, %v2573_v52  ;;  %v2435_v46 = vld [vmem:[#allocation11 + $0x2b8] sm:$0xff] }
 0x321   : > { %8373 = vst [vmem:[#allocation42_spill] sm:$0xff] %v7043_v39  ;;  %3227 = vmatmul.mubr.f32.gmra.mxu0 %v7053_v13  ;;  %v2521_v38 = vrot.slane %v7043_v39, 7  ;;  %8376 = vst [vmem:[#allocation44_spill] sm:$0xff] %v7071_v50  ;;  %3348 = vmatprep.subr.mxu1 %v8293_v1  ;;  %v8377_v13 = vsub.f32 %v6552_v49, %v6512_v31  ;;  %v7103_v49 = vsel %vm734_vm3, %v2783_v56, %v2627_v42 }
 0x322   : > { %3231 = vmatprep.mubr.f32.mxu0 %v7060_v14  ;;  %3552 = vmatpush1.msra.mxu0 %v2447_v59  ;;  %v2683_v59 = vrot.slane %v7038_v28, %v5206_v63  ;;  %v2787_v56 = vrot.slane %v6993_v60, %v8342_v44 }
 0x323   : > { %3007 = vmatmul.mubr.f32.gmra.mxu1 %v7011_v22  ;;  %3553 = vmatprep.subr.mxu0 %v8293_v1  ;;  %v2445_v22 = vld [vmem:[#allocation11 + $0x308] sm:$0xff]  ;;  %v2557_v34 = vsel %vm508_vm0, %v2521_v38, %v2503_v21  ;;  %v7128_v42 = vsel %vm508_vm0, %v2503_v21, %v2521_v38  ;;  %v2434_v38 = vld [vmem:[#allocation11 + $0x2b0] sm:$0xff] }
 0x324   : > { %3011 = vmatprep.mubr.f32.mxu1 %v6943_v6  ;;  %3349 = vmatpush2.msra.mxu1 %v2436_v10  ;;  %v7088_v6 = vmax.f32 %v8377_v13, 0.0  ;;  %v2444_v13 = vld [vmem:[#allocation11 + $0x300] sm:$0xff]  ;;  %v7110_v52 = vsel %vm619_vm1, %v2683_v59, %v2557_v34 }
 0x325   : > { %3232 = vmatmul.mubr.f32.gmra.mxu0 %v7071_v50  ;;  %v8379_v50 = vsub.f32 %v6556_v29, %v6512_v31  ;;  %v2574_v29 = vrot.slane %v6988_v57, 1  ;;  %8381 = vst [vmem:[#allocation47_spill] sm:$0xff] %v7110_v52  ;;  %3350 = vmatprep.subr.mxu1 %v8293_v1 }
 0x326   : > { %8378 = vst [vmem:[#allocation40_spill] sm:$0xff] %v7088_v6  ;;  %3236 = vmatprep.mubr.f32.mxu0 %v7079_v16  ;;  %3554 = vmatpush1.msra.mxu0 %v2446_v12  ;;  %v2504_v10 = vrot.slane %v7088_v6, 7  ;;  %v2687_v34 = vrot.slane %v7088_v6, %v5206_v63 }
 0x327   : > { %v7093_v35 = vmax.f32 %v8379_v50, 0.0  ;;  %3012 = vmatmul.mubr.f32.gmra.mxu1 %v7028_v2  ;;  %3555 = vmatprep.subr.mxu0 %v8293_v1  ;;  %v7121_v50 = vsel %vm581_vm2, %v2574_v29, %v2592_v0  ;;  %v2628_v59 = vsel %vm581_vm2, %v2592_v0, %v2574_v29  ;;  %v2474_v29 = vld [vmem:[#allocation11 + $0x3f0] sm:$0xff]  ;;  %v2593_v0 = vrot.slane %v7043_v39, 1 }
 0x328   : > { %3016 = vmatprep.mubr.f32.mxu1 %v6988_v57  ;;  %3556 = vmatpush1.msra.mxu0 %v2445_v22  ;;  %v2475_v22 = vld [vmem:[#allocation11 + $0x3f8] sm:$0xff]  ;;  %8382 = vst [vmem:[#allocation49_spill] sm:$0xff] %v7121_v50 }
 0x329   : > { %8380 = vst [vmem:[#allocation48_spill] sm:$0xff] %v7093_v35  ;;  %3237 = vmatmul.mubr.f32.gmra.mxu0 %v7103_v49  ;;  %3557 = vmatprep.subr.mxu0 %v8293_v1  ;;  %v2522_v12 = vrot.slane %v7093_v35, 7 }
 0x32a   : > { %3241 = vmatprep.mubr.f32.mxu0 %v7110_v52  ;;  %3558 = vmatpush1.msra.mxu0 %v2444_v13  ;;  %v8383_v13 = vsub.f32 %v6560_v33, %v6512_v31  ;;  %v7153_v33 = vsel %vm734_vm3, %v2787_v56, %v2628_v59 }
 0x32b   : > { %3017 = vmatmul.mubr.f32.gmra.mxu1 %v7060_v14  ;;  %3559 = vmatprep.subr.mxu0 %v8293_v1  ;;  %v2558_v21 = vsel %vm508_vm0, %v2522_v12, %v2504_v10  ;;  %8385 = vst [vmem:[#allocation50_spill] sm:$0xff] %v7153_v33 }
 0x32c   : > { %3021 = vmatprep.mubr.f32.mxu1 %v6993_v60  ;;  %3351 = vmatpush2.msra.mxu1 %v2435_v46  ;;  %v7138_v14 = vmax.f32 %v8383_v13, 0.0  ;;  %v8384_v46 = vsub.f32 %v6566_v61, %v6512_v31  ;;  %v2575_v61 = vrot.slane %v7038_v28, 1  ;;  %v2473_v13 = vld [vmem:[#allocation11 + $0x3e8] sm:$0xff] }
 0x32d   : > { %3242 = vmatmul.mubr.f32.gmra.mxu0 %v7121_v50  ;;  %3352 = vmatprep.subr.mxu1 %v8293_v1 }
 0x32e   : > { %v7143_v50 = vmax.f32 %v8384_v46, 0.0  ;;  %3246 = vmatprep.mubr.f32.mxu0 %v7128_v42  ;;  %3560 = vmatpush2.msra.mxu0 %v2475_v22  ;;  %v7161_v22 = vsel %vm619_vm1, %v2687_v34, %v2558_v21  ;;  %v2505_v46 = vrot.slane %v7138_v14, 7  ;;  %v7171_v59 = vsel %vm581_vm2, %v2575_v61, %v2593_v0  ;;  %v2472_v21 = vld [vmem:[#allocation11 + $0x3e0] sm:$0xff] }
 0x32f   : > { %3022 = vmatmul.mubr.f32.gmra.mxu1 %v7079_v16  ;;  %3561 = vmatprep.subr.mxu0 %v8293_v1  ;;  %8386 = vst [vmem:[#allocation51_spill] sm:$0xff] %v7161_v22  ;;  %8387 = vst [vmem:[#allocation52_spill] sm:$0xff] %v7171_v59  ;;  %v2791_v34 = vrot.slane %v7043_v39, %v8342_v44 }
 0x330   : > { %3026 = vmatprep.mubr.f32.mxu1 %v7038_v28  ;;  %3353 = vmatpush2.msra.mxu1 %v2434_v38  ;;  %v2523_v56 = vrot.slane %v7143_v50, 7  ;;  %v7178_v38 = vsel %vm508_vm0, %v2504_v10, %v2522_v12  ;;  %v2471_v12 = vld [vmem:[#allocation11 + $0x3d8] sm:$0xff] }
 0x331   : > { %3247 = vmatmul.mubr.f32.gmra.mxu0 %v7153_v33  ;;  %v2433_v33 = vld [vmem:[#allocation11 + $0x2a8] sm:$0xff]  ;;  %3354 = vmatprep.subr.mxu1 %v8293_v1 }
 0x332   : > { %3251 = vmatprep.mubr.f32.mxu0 %v7161_v22  ;;  %3562 = vmatpush2.msra.mxu0 %v2474_v29  ;;  %v2629_v29 = vsel %vm581_vm2, %v2593_v0, %v2575_v61  ;;  %v2559_v10 = vsel %vm508_vm0, %v2523_v56, %v2505_v46 }
 0x333   : > { %3027 = vmatmul.mubr.f32.gmra.mxu1 %v7110_v52  ;;  %3563 = vmatprep.subr.mxu0 %v8293_v1  ;;  %v2691_v52 = vrot.slane %v7138_v14, %v5206_v63 }
 0x334   : > { %3031 = vmatprep.mubr.f32.mxu1 %v7043_v39  ;;  %3564 = vmatpush2.msra.mxu0 %v2473_v13  ;;  %v8388_v39 = vsub.f32 %v6570_v55, %v6512_v31  ;;  %v7203_v55 = vsel %vm734_vm3, %v2791_v34, %v2629_v29  ;;  %v2432_v34 = vld [vmem:[#allocation11 + $0x2a0] sm:$0xff]  ;;  %v7229_v29 = vsel %vm508_vm0, %v2505_v46, %v2523_v56  ;;  %v2595_v56 = vrot.slane %v7143_v50, 1 }
 0x335   : > { %3252 = vmatmul.mubr.f32.gmra.mxu0 %v7171_v59  ;;  %3565 = vmatprep.subr.mxu0 %v8293_v1  ;;  %v8389_v59 = vsub.f32 %v6574_v62, %v6512_v31  ;;  %8390 = vst [vmem:[#allocation53_spill] sm:$0xff] %v7203_v55  ;;  %v2576_v62 = vrot.slane %v7088_v6, 1  ;;  %v7210_v61 = vsel %vm619_vm1, %v2691_v52, %v2559_v10 }
 0x336   : > { %v7188_v13 = vmax.f32 %v8388_v39, 0.0  ;;  %3256 = vmatprep.mubr.f32.mxu0 %v7178_v38  ;;  %3566 = vmatpush2.msra.mxu0 %v2472_v21  ;;  %v2594_v39 = vrot.slane %v7093_v35, 1  ;;  %8391 = vst [vmem:[#allocation54_spill] sm:$0xff] %v7210_v61  ;;  %v2795_v21 = vrot.slane %v7093_v35, %v8342_v44 }
 0x337   : > { %v7193_v28 = vmax.f32 %v8389_v59, 0.0  ;;  %3032 = vmatmul.mubr.f32.gmra.mxu1 %v7128_v42  ;;  %3567 = vmatprep.subr.mxu0 %v8293_v1 }
 0x338   : > { %3036 = vmatprep.mubr.f32.mxu1 %v7088_v6  ;;  %3355 = vmatpush2.msra.mxu1 %v2433_v33  ;;  %v2506_v0 = vrot.slane %v7188_v13, 7  ;;  %v2470_v33 = vld [vmem:[#allocation11 + $0x3d0] sm:$0xff]  ;;  %v7221_v52 = vsel %vm581_vm2, %v2576_v62, %v2594_v39  ;;  %v2630_v10 = vsel %vm581_vm2, %v2594_v39, %v2576_v62  ;;  %v2431_v39 = vld [vmem:[#allocation11 + $0x298] sm:$0xff] }
 0x339   : > { %3257 = vmatmul.mubr.f32.gmra.mxu0 %v7203_v55  ;;  %v2524_v59 = vrot.slane %v7193_v28, 7  ;;  %8392 = vst [vmem:[#allocation55_spill] sm:$0xff] %v7221_v52  ;;  %3356 = vmatprep.subr.mxu1 %v8293_v1  ;;  %v8393_v55 = vsub.f32 %v6525_v45, %v6512_v31  ;;  %v7253_v45 = vsel %vm734_vm3, %v2795_v21, %v2630_v10 }
 0x33a   : > { %3261 = vmatprep.mubr.f32.mxu0 %v7210_v61  ;;  %3568 = vmatpush2.msra.mxu0 %v2471_v12  ;;  %v2695_v12 = vrot.slane %v7188_v13, %v5206_v63  ;;  %v2799_v21 = vrot.slane %v7143_v50, %v8342_v44 }
 0x33b   : > { %3037 = vmatmul.mubr.f32.gmra.mxu1 %v7161_v22  ;;  %3569 = vmatprep.subr.mxu0 %v8293_v1  ;;  %v2469_v22 = vld [vmem:[#allocation11 + $0x3c8] sm:$0xff]  ;;  %v2560_v46 = vsel %vm508_vm0, %v2524_v59, %v2506_v0  ;;  %v7278_v10 = vsel %vm508_vm0, %v2506_v0, %v2524_v59  ;;  %v2430_v59 = vld [vmem:[#allocation11 + $0x290] sm:$0xff] }
 0x33c   : > { %3041 = vmatprep.mubr.f32.mxu1 %v7093_v35  ;;  %3357 = vmatpush2.msra.mxu1 %v2432_v34  ;;  %v7238_v35 = vmax.f32 %v8393_v55, 0.0  ;;  %v2468_v55 = vld [vmem:[#allocation11 + $0x3c0] sm:$0xff]  ;;  %v7260_v62 = vsel %vm619_vm1, %v2695_v12, %v2560_v46 }
 0x33d   : > { %3262 = vmatmul.mubr.f32.gmra.mxu0 %v7221_v52  ;;  %v8394_v52 = vsub.f32 %v6580_v8, %v6512_v31  ;;  %v2577_v8 = vrot.slane %v7138_v14, 1  ;;  %3358 = vmatprep.subr.mxu1 %v8293_v1 }
 0x33e   : > { %3266 = vmatprep.mubr.f32.mxu0 %v7229_v29  ;;  %3570 = vmatpush2.msra.mxu0 %v2470_v33  ;;  %v2507_v34 = vrot.slane %v7238_v35, 7  ;;  %v2699_v46 = vrot.slane %v7238_v35, %v5206_v63 }
 0x33f   : > { %v7243_v6 = vmax.f32 %v8394_v52, 0.0  ;;  %3042 = vmatmul.mubr.f32.gmra.mxu1 %v7178_v38  ;;  %3571 = vmatprep.subr.mxu0 %v8293_v1  ;;  %v7271_v52 = vsel %vm581_vm2, %v2577_v8, %v2595_v56  ;;  %v2631_v12 = vsel %vm581_vm2, %v2595_v56, %v2577_v8  ;;  %v2466_v8 = vld [vmem:[#allocation11 + $0x3b0] sm:$0xff] }
 0x340   : > { %3046 = vmatprep.mubr.f32.mxu1 %v7138_v14  ;;  %3572 = vmatpush2.msra.mxu0 %v2469_v22  ;;  %v2467_v22 = vld [vmem:[#allocation11 + $0x3b8] sm:$0xff]  ;;  %8395 = vst [vmem:[#allocation56_spill] sm:$0xff] %v7271_v52 }
 0x341   : > { %3267 = vmatmul.mubr.f32.gmra.mxu0 %v7253_v45  ;;  %3573 = vmatprep.subr.mxu0 %v8293_v1  ;;  %v2525_v33 = vrot.slane %v7243_v6, 7 }
 0x342   : > { %3271 = vmatprep.mubr.f32.mxu0 %v7260_v62  ;;  %3574 = vmatpush2.msra.mxu0 %v2468_v55  ;;  %v8396_v55 = vsub.f32 %v6509_v4, %v6512_v31  ;;  %v7303_v4 = vsel %vm734_vm3, %v2799_v21, %v2631_v12 }
 0x343   : > { %3047 = vmatmul.mubr.f32.gmra.mxu1 %v7210_v61  ;;  %3575 = vmatprep.subr.mxu0 %v8293_v1  ;;  %v2561_v0 = vsel %vm508_vm0, %v2525_v33, %v2507_v34 }
 0x344   : > { %3051 = vmatprep.mubr.f32.mxu1 %v7143_v50  ;;  %3359 = vmatpush2.msra.mxu1 %v2431_v39  ;;  %v7288_v61 = vmax.f32 %v8396_v55, 0.0  ;;  %v8397_v39 = vsub.f32 %v6528_v17, %v6512_v31  ;;  %v2578_v31 = vrot.slane %v7188_v13, 1  ;;  %v2596_v17 = vrot.slane %v7193_v28, 1 }
 0x345   : > { %3272 = vmatmul.mubr.f32.gmra.mxu0 %v7271_v52  ;;  %3360 = vmatprep.subr.mxu1 %v8293_v1  ;;  %v7311_v56 = vsel %vm619_vm1, %v2699_v46, %v2561_v0  ;;  %v2803_v46 = vrot.slane %v7193_v28, %v8342_v44  ;;  %v7328_v0 = vsel %vm508_vm0, %v2507_v34, %v2525_v33  ;;  %v2463_v34 = vld [vmem:[#allocation11 + $0x398] sm:$0xff] }
 0x346   : > { %v7293_v52 = vmax.f32 %v8397_v39, 0.0  ;;  %3276 = vmatprep.mubr.f32.mxu0 %v7278_v10  ;;  %3576 = vmatpush2.msra.mxu0 %v2467_v22  ;;  %v2465_v22 = vld [vmem:[#allocation11 + $0x3a8] sm:$0xff]  ;;  %v2508_v21 = vrot.slane %v7288_v61, 7  ;;  %v7321_v55 = vsel %vm581_vm2, %v2578_v31, %v2596_v17  ;;  %v2464_v39 = vld [vmem:[#allocation11 + $0x3a0] sm:$0xff] }
 0x347   : > { %3052 = vmatmul.mubr.f32.gmra.mxu1 %v7229_v29  ;;  %3577 = vmatprep.subr.mxu0 %v8293_v1 }
 0x348   : > { %8398 = vst [vmem:[#allocation57_spill] sm:$0xff] %v7293_v52  ;;  %3056 = vmatprep.mubr.f32.mxu1 %v7188_v13  ;;  %3361 = vmatpush2.msra.mxu1 %v2430_v59  ;;  %v2526_v12 = vrot.slane %v7293_v52, 7  ;;  %v2632_v59 = vsel %vm581_vm2, %v2596_v17, %v2578_v31  ;;  %v2429_v52 = vld [vmem:[#allocation11 + $0x288] sm:$0xff]  ;;  %v2597_v31 = vrot.slane %v7243_v6, 1 }
 0x349   : > { %3277 = vmatmul.mubr.f32.gmra.mxu0 %v7303_v4  ;;  %3362 = vmatprep.subr.mxu1 %v8293_v1  ;;  %v7343_v33 = vsel %vm734_vm3, %v2803_v46, %v2632_v59  ;;  %v2462_v46 = vld [vmem:[#allocation11 + $0x390] sm:$0xff]  ;;  %v2807_v59 = vrot.slane %v7243_v6, %v8342_v44 }
 0x34a   : > { %3281 = vmatprep.mubr.f32.mxu0 %v7311_v56  ;;  %3578 = vmatpush2.msra.mxu0 %v2466_v8  ;;  %v2703_v8 = vrot.slane %v7288_v61, %v5206_v63  ;;  %v2579_v63 = vrot.slane %v7238_v35, 1 }
 0x34b   : > { %3057 = vmatmul.mubr.f32.gmra.mxu1 %v7260_v62  ;;  %3579 = vmatprep.subr.mxu0 %v8293_v1 }
 0x34c   : > { %3061 = vmatprep.mubr.f32.mxu1 %v7193_v28  ;;  %3580 = vmatpush2.msra.mxu0 %v2465_v22  ;;  %v2562_v22 = vsel %vm508_vm0, %v2526_v12, %v2508_v21 }
 0x34d   : > { %3282 = vmatmul.mubr.f32.gmra.mxu0 %v7321_v55  ;;  %3581 = vmatprep.subr.mxu0 %v8293_v1  ;;  %v7350_v17 = vsel %vm619_vm1, %v2703_v8, %v2562_v22  ;;  %v7367_v8 = vsel %vm508_vm0, %v2508_v21, %v2526_v12  ;;  %v2633_v22 = vsel %vm581_vm2, %v2597_v31, %v2579_v63  ;;  %v2491_v21 = vld [vmem:[#allocation11 + $0x478] sm:$0xff]  ;;  %v2490_v12 = vld [vmem:[#allocation11 + $0x470] sm:$0xff] }
 0x34e   : > { %3286 = vmatprep.mubr.f32.mxu0 %v7328_v0  ;;  %3582 = vmatpush2.msra.mxu0 %v2464_v39  ;;  %8399 = vst [vmem:[#allocation58_spill] sm:$0xff] %v7350_v17  ;;  %v2428_v39 = vld [vmem:[#allocation11 + $0x280] sm:$0xff]  ;;  %v7376_v44 = vsel %vm734_vm3, %v2807_v59, %v2633_v22  ;;  %v2477_v22 = vld [vmem:[#allocation11 + $0x408] sm:$0xff] }
 0x34f   : > { %3062 = vmatmul.mubr.f32.gmra.mxu1 %v7278_v10  ;;  %3583 = vmatprep.subr.mxu0 %v8293_v1  ;;  %v8404_v59 = vld [vmem:[#allocation32_spill] sm:$0xff] }
 0x350   : > { %3066 = vmatprep.mubr.f32.mxu1 %v7238_v35  ;;  %3363 = vmatpush2.msra.mxu1 %v2429_v52  ;;  %v7359_v52 = vsel %vm581_vm2, %v2579_v63, %v2597_v31  ;;  %v2489_v63 = vld [vmem:[#allocation11 + $0x468] sm:$0xff] }
 0x351   : > { %3287 = vmatmul.mubr.f32.gmra.mxu0 %v7343_v33  ;;  %3364 = vmatprep.subr.mxu1 %v8293_v1  ;;  %v2481_v31 = vld [vmem:[#allocation11 + $0x428] sm:$0xff] }
 0x352   : > { %3291 = vmatprep.mubr.f32.mxu0 %v7350_v17  ;;  %3584 = vmatpush2.msra.mxu0 %v2463_v34  ;;  %v2461_v34 = vld [vmem:[#allocation11 + $0x388] sm:$0xff]  ;;  %v2460_v17 = vld [vmem:[#allocation11 + $0x380] sm:$0xff] }
 0x353   : > { %3067 = vmatmul.mubr.f32.gmra.mxu1 %v7311_v56  ;;  %3585 = vmatprep.subr.mxu0 %v8293_v1 }
 0x354   : > { %3071 = vmatprep.mubr.f32.mxu1 %v7243_v6  ;;  %3365 = vmatpush2.msra.mxu1 %v2428_v39  ;;  %v2479_v39 = vld [vmem:[#allocation11 + $0x418] sm:$0xff] }
 0x355   : > { %3292 = vmatmul.mubr.f32.gmra.mxu0 %v7359_v52  ;;  %4637 = vmatprep.subr.mxu1 %v2491_v21 }
 0x356   : > { %3296 = vmatprep.mubr.f32.mxu0 %v7367_v8  ;;  %3586 = vmatpush2.msra.mxu0 %v2462_v46  ;;  %v2478_v46 = vld [vmem:[#allocation11 + $0x410] sm:$0xff] }
 0x357   : > { %3072 = vmatmul.mubr.f32.gmra.mxu1 %v7328_v0  ;;  %3587 = vmatprep.subr.mxu0 %v8293_v1 }
 0x358   : > { %3366 = vmatprep.mubr.f32.mxu1 %v6696_v26  ;;  %3588 = vmatpush2.msra.mxu0 %v2461_v34  ;;  %v2488_v26 = vld [vmem:[#allocation11 + $0x460] sm:$0xff]  ;;  %v8406_v34 = vld [vmem:[#allocation21_spill] sm:$0xff] }
 0x359   : > { %3297 = vmatmul.mubr.f32.gmra.mxu0 %v7376_v44  ;;  %3589 = vmatprep.subr.mxu0 %v8293_v1  ;;  %v2487_v1 = vld [vmem:[#allocation11 + $0x458] sm:$0xff] }
 0x35a   : > { %3591 = vmatprep.mubr.f32.mxu0 %v6616_v47  ;;  %3590 = vmatpush2.msra.mxu0 %v2460_v17  ;;  %v2480_v17 = vld [vmem:[#allocation11 + $0x420] sm:$0xff] }
 0x35b   : > { %3367 = vmatmul.mubr.f32.vlgmr.msra.gmra.mxu1 %v6621_v24  ;;  %v2486_v24 = vld [vmem:[#allocation11 + $0x450] sm:$0xff] }
 0x35c   : > { %3371 = vmatprep.mubr.f32.mxu1 %v6721_v30  ;;  %4638 = vmatpush3.msra.mxu1 %v2491_v21  ;;  %v2482_v30 = vld [vmem:[#allocation11 + $0x430] sm:$0xff]  ;;  %v2476_v21 = vld [vmem:[#allocation11 + $0x400] sm:$0xff] }
 0x35d   : > { %3592 = vmatmul.mubr.f32.vlgmr.msra.gmra.mxu0 %v6645_v43  ;;  %4639 = vmatprep.subr.mxu1 %v2490_v12  ;;  %v2485_v43 = vld [vmem:[#allocation11 + $0x448] sm:$0xff] }
 0x35e   : > { %3596 = vmatprep.mubr.f32.mxu0 %v6619_v25  ;;  %4640 = vmatpush3.msra.mxu1 %v2490_v12  ;;  %v8407_v12 = vld [vmem:[#allocation20_spill] sm:$0xff] }
 0x35f   : > { %3372 = vmatmul.mubr.f32.gmra.mxu1 %v6623_v11  ;;  %4641 = vmatprep.subr.mxu1 %v2489_v63  ;;  %v2484_v11 = vld [vmem:[#allocation11 + $0x440] sm:$0xff] }
 0x360   : > { %3376 = vmatprep.mubr.f32.mxu1 %v6655_v40  ;;  %4642 = vmatpush3.msra.mxu1 %v2489_v63  ;;  %v8409_v63 = vld [vmem:[#allocation24_spill] sm:$0xff] }
 0x361   : > { %3597 = vmatmul.mubr.f32.gmra.mxu0 %v6674_v15  ;;  %4643 = vmatprep.subr.mxu1 %v2488_v26  ;;  %v2483_v15 = vld [vmem:[#allocation11 + $0x438] sm:$0xff] }
 0x362   : > { %3601 = vmatprep.mubr.f32.mxu0 %v6668_v48  ;;  %4644 = vmatpush3.msra.mxu1 %v2488_v26  ;;  %v8410_v26 = vld [vmem:[#allocation28_spill] sm:$0xff] }
 0x363   : > { %3377 = vmatmul.mubr.f32.gmra.mxu1 %v6616_v47  ;;  %4645 = vmatprep.subr.mxu1 %v2487_v1  ;;  %v8400_v47 = vld [vmem:[#allocation25_spill] sm:$0xff] }
 0x364   : > { %3381 = vmatprep.mubr.f32.mxu1 %v6681_v23  ;;  %4646 = vmatpush3.msra.mxu1 %v2487_v1  ;;  %v8411_v1 = vld [vmem:[#allocation19_spill] sm:$0xff] }
 0x365   : > { %3602 = vmatmul.mubr.f32.gmra.mxu0 %v6726_v20  ;;  %4647 = vmatprep.subr.mxu1 %v2486_v24  ;;  %v8401_v20 = vld [vmem:[#allocation31_spill] sm:$0xff] }
 0x366   : > { %3606 = vmatprep.mubr.f32.mxu0 %v6670_v9  ;;  %4648 = vmatpush3.msra.mxu1 %v2486_v24  ;;  %v8413_v24 = vld [vmem:[#allocation38_spill] sm:$0xff] }
 0x367   : > { %3382 = vmatmul.mubr.f32.gmra.mxu1 %v6619_v25  ;;  %4649 = vmatprep.subr.mxu1 %v2485_v43  ;;  %v8402_v25 = vld [vmem:[#allocation18_spill] sm:$0xff] }
 0x368   : > { %3386 = vmatprep.mubr.f32.mxu1 %v6779_v53  ;;  %4650 = vmatpush3.msra.mxu1 %v2485_v43  ;;  %v8415_v43 = vld [vmem:[#allocation23_spill] sm:$0xff] }
 0x369   : > { %3607 = vmatmul.mubr.f32.gmra.mxu0 %v8400_v47  ;;  %4651 = vmatprep.subr.mxu1 %v2484_v11  ;;  %v8419_v47 = vld [vmem:[#allocation34_spill] sm:$0xff] }
 0x36a   : > { %3611 = vmatprep.mubr.f32.mxu0 %v6710_v32  ;;  %4652 = vmatpush3.msra.mxu1 %v2484_v11  ;;  %v8417_v11 = vld [vmem:[#allocation37_spill] sm:$0xff] }
 0x36b   : > { %3387 = vmatmul.mubr.f32.gmra.mxu1 %v6668_v48  ;;  %4653 = vmatprep.subr.mxu1 %v2483_v15  ;;  %v8403_v48 = vld [vmem:[#allocation27_spill] sm:$0xff] }
 0x36c   : > { %3391 = vmatprep.mubr.f32.mxu1 %v8401_v20  ;;  %4654 = vmatpush3.msra.mxu1 %v2483_v15  ;;  %v8418_v15 = vld [vmem:[#allocation36_spill] sm:$0xff] }
 0x36d   : > { %3612 = vmatmul.mubr.f32.gmra.mxu0 %v8402_v25  ;;  %4655 = vmatprep.subr.mxu1 %v2482_v30  ;;  %v8424_v25 = vld [vmem:[#allocation44_spill] sm:$0xff] }
 0x36e   : > { %3616 = vmatprep.mubr.f32.mxu0 %v6712_v27  ;;  %4656 = vmatpush3.msra.mxu1 %v2482_v30  ;;  %v8420_v30 = vld [vmem:[#allocation29_spill] sm:$0xff] }
 0x36f   : > { %3392 = vmatmul.mubr.f32.gmra.mxu1 %v6670_v9  ;;  %4657 = vmatprep.subr.mxu1 %v2481_v31  ;;  %v8405_v9 = vld [vmem:[#allocation26_spill] sm:$0xff] }
 0x370   : > { %3396 = vmatprep.mubr.f32.mxu1 %v6829_v18  ;;  %4658 = vmatpush3.msra.mxu1 %v2481_v31  ;;  %v8422_v31 = vld [vmem:[#allocation39_spill] sm:$0xff] }
 0x371   : > { %3617 = vmatmul.mubr.f32.gmra.mxu0 %v8403_v48  ;;  %4659 = vmatprep.subr.mxu1 %v2480_v17 }
 0x372   : > { %3621 = vmatprep.mubr.f32.mxu0 %v6749_v41  ;;  %4660 = vmatpush3.msra.mxu1 %v2480_v17  ;;  %v8425_v17 = vld [vmem:[#allocation46_spill] sm:$0xff] }
 0x373   : > { %3397 = vmatmul.mubr.f32.gmra.mxu1 %v6710_v32  ;;  %4661 = vmatprep.subr.mxu1 %v2479_v39  ;;  %v8408_v32 = vld [vmem:[#allocation22_spill] sm:$0xff] }
 0x374   : > { %3401 = vmatprep.mubr.f32.mxu1 %v8404_v59  ;;  %4662 = vmatpush3.msra.mxu1 %v2479_v39 }
 0x375   : > { %3622 = vmatmul.mubr.f32.gmra.mxu0 %v8405_v9  ;;  %4663 = vmatprep.subr.mxu1 %v2478_v46 }
 0x376   : > { %3626 = vmatprep.mubr.f32.mxu0 %v8406_v34  ;;  %4664 = vmatpush3.msra.mxu1 %v2478_v46 }
 0x377   : > { %3402 = vmatmul.mubr.f32.gmra.mxu1 %v6712_v27  ;;  %4665 = vmatprep.subr.mxu1 %v2477_v22  ;;  %v8412_v27 = vld [vmem:[#allocation33_spill] sm:$0xff] }
 0x378   : > { %3406 = vmatprep.mubr.f32.mxu1 %v6877_v5  ;;  %4666 = vmatpush3.msra.mxu1 %v2477_v22 }
 0x379   : > { %3627 = vmatmul.mubr.f32.gmra.mxu0 %v8407_v12  ;;  %4667 = vmatprep.subr.mxu1 %v2476_v21  ;;  %v8427_v12 = vld [vmem:[#allocation45_spill] sm:$0xff] }
 0x37a   : > { %3631 = vmatprep.mubr.f32.mxu0 %v8408_v32  ;;  %4668 = vmatpush3.msra.mxu1 %v2476_v21 }
 0x37b   : > { %3407 = vmatmul.mubr.f32.gmra.mxu1 %v6749_v41  ;;  %v8414_v41 = vld [vmem:[#allocation30_spill] sm:$0xff] }
 0x37c   : > { %3411 = vmatprep.mubr.f32.mxu1 %v8409_v63 }
 0x37d   : > { %3632 = vmatmul.mubr.f32.gmra.mxu0 %v8410_v26 }
 0x37e   : > { %3636 = vmatprep.mubr.f32.mxu0 %v8411_v1 }
 0x37f   : > { %3412 = vmatmul.mubr.f32.gmra.mxu1 %v8406_v34 }
 0x380   : > { %3416 = vmatprep.mubr.f32.mxu1 %v8412_v27 }
 0x381   : > { %3637 = vmatmul.mubr.f32.gmra.mxu0 %v6884_v37  ;;  %v8416_v37 = vld [vmem:[#allocation43_spill] sm:$0xff] }
 0x382   : > { %3641 = vmatprep.mubr.f32.mxu0 %v6845_v3 }
 0x383   : > { %3417 = vmatmul.mubr.f32.gmra.mxu1 %v8408_v32 }
 0x384   : > { %3421 = vmatprep.mubr.f32.mxu1 %v6953_v36 }
 0x385   : > { %3642 = vmatmul.mubr.f32.gmra.mxu0 %v8413_v24 }
 0x386   : > { %3646 = vmatprep.mubr.f32.mxu0 %v6847_v58 }
 0x387   : > { %3422 = vmatmul.mubr.f32.gmra.mxu1 %v8411_v1  ;;  %v8428_v1 = vld [vmem:[#allocation50_spill] sm:$0xff] }
 0x388   : > { %3426 = vmatprep.mubr.f32.mxu1 %v8414_v41 }
 0x389   : > { %3647 = vmatmul.mubr.f32.gmra.mxu0 %v6929_v7  ;;  %v8421_v7 = vld [vmem:[#allocation35_spill] sm:$0xff] }
 0x38a   : > { %3651 = vmatprep.mubr.f32.mxu0 %v8415_v43 }
 0x38b   : > { %3427 = vmatmul.mubr.f32.gmra.mxu1 %v6845_v3  ;;  %v8423_v3 = vld [vmem:[#allocation41_spill] sm:$0xff] }
 0x38c   : > { %3431 = vmatprep.mubr.f32.mxu1 %v8416_v37 }
 0x38d   : > { %3652 = vmatmul.mubr.f32.gmra.mxu0 %v8417_v11 }
 0x38e   : > { %3656 = vmatprep.mubr.f32.mxu0 %v8418_v15 }
 0x38f   : > { %3432 = vmatmul.mubr.f32.gmra.mxu1 %v6847_v58 }
 0x390   : > { %3436 = vmatprep.mubr.f32.mxu1 %v8419_v47 }
 0x391   : > { %3657 = vmatmul.mubr.f32.gmra.mxu0 %v6978_v51 }
 0x392   : > { %3661 = vmatprep.mubr.f32.mxu0 %v8420_v30 }
 0x393   : > { %3437 = vmatmul.mubr.f32.gmra.mxu1 %v8415_v43  ;;  %v8429_v43 = vld [vmem:[#allocation47_spill] sm:$0xff] }
 0x394   : > { %3441 = vmatprep.mubr.f32.mxu1 %v8421_v7 }
 0x395   : > { %3662 = vmatmul.mubr.f32.gmra.mxu0 %v8422_v31 }
 0x396   : > { %3666 = vmatprep.mubr.f32.mxu0 %v8423_v3 }
 0x397   : > { %3442 = vmatmul.mubr.f32.gmra.mxu1 %v8418_v15 }
 0x398   : > { %3446 = vmatprep.mubr.f32.mxu1 %v8424_v25 }
 0x399   : > { %3667 = vmatmul.mubr.f32.gmra.mxu0 %v7028_v2  ;;  %v8426_v2 = vld [vmem:[#allocation49_spill] sm:$0xff] }
 0x39a   : > { %3671 = vmatprep.mubr.f32.mxu0 %v6988_v57 }
 0x39b   : > { %v2918_v58 = vpop.f32.mrf.mxu1  ;;  %3447 = vmatmul.mubr.f32.gmra.mxu1 %v8420_v30  ;;  %v3143_v51 = vpop.f32.mrf.mxu0  ;;  %v8430_v30 = vld [vmem:[#allocation42_spill] sm:$0xff] }
 0x39c   : > { %3451 = vmatprep.mubr.f32.mxu1 %v7103_v49  ;;  %v7449_v48 = vadd.f32 %v3143_v51, %v2918_v58 }
 0x39d   : > { %3672 = vmatmul.mubr.f32.gmra.mxu0 %v8425_v17  ;;  %v2920_v39 = vpop.f32.mrf.mxu1  ;;  %v3145_v46 = vpop.f32.mrf.mxu0  ;;  %v8432_v17 = vld [vmem:[#allocation40_spill] sm:$0xff] }
 0x39e   : > { %3676 = vmatprep.mubr.f32.mxu0 %v6993_v60 }
 0x39f   : > { %v2923_v22 = vpop.f32.mrf.mxu1  ;;  %3452 = vmatmul.mubr.f32.gmra.mxu1 %v8423_v3  ;;  %v3148_v9 = vpop.f32.mrf.mxu0  ;;  %v8431_v3 = vld [vmem:[#allocation52_spill] sm:$0xff] }
 0x3a0   : > { %3456 = vmatprep.mubr.f32.mxu1 %v8426_v2  ;;  %v7455_v21 = vadd.f32 %v3148_v9, %v2923_v22  ;;  %v8433_v22 = vld [vmem:[#allocation53_spill] sm:$0xff] }
 0x3a1   : > { %3677 = vmatmul.mubr.f32.gmra.mxu0 %v7079_v16  ;;  %v2925_v34 = vpop.f32.mrf.mxu1  ;;  %v3150_v32 = vpop.f32.mrf.mxu0 }
 0x3a2   : > { %3681 = vmatprep.mubr.f32.mxu0 %v8427_v12  ;;  %v8434_v34 = vld [vmem:[#allocation51_spill] sm:$0xff] }
 0x3a3   : > { %v2928_v26 = vpop.f32.mrf.mxu1  ;;  %3457 = vmatmul.mubr.f32.gmra.mxu1 %v6988_v57  ;;  %v3153_v24 = vpop.f32.mrf.mxu0 }
 0x3a4   : > { %3461 = vmatprep.mubr.f32.mxu1 %v8428_v1  ;;  %v7461_v15 = vadd.f32 %v3153_v24, %v2928_v26  ;;  %v8435_v26 = vld [vmem:[#allocation48_spill] sm:$0xff] }
 0x3a5   : > { %3682 = vmatmul.mubr.f32.gmra.mxu0 %v8429_v43  ;;  %v2930_v11 = vpop.f32.mrf.mxu1  ;;  %v3155_v16 = vpop.f32.mrf.mxu0  ;;  %v8436_v43 = vld [vmem:[#allocation55_spill] sm:$0xff] }
 0x3a6   : > { %3686 = vmatprep.mubr.f32.mxu0 %v8430_v30 }
 0x3a7   : > { %v2933_v31 = vpop.f32.mrf.mxu1  ;;  %3462 = vmatmul.mubr.f32.gmra.mxu1 %v6993_v60 }
 0x3a8   : > { %3466 = vmatprep.mubr.f32.mxu1 %v8431_v3 }
 0x3a9   : > { %v3158_v58 = vpop.f32.mrf.mxu0  ;;  %3687 = vmatmul.mubr.f32.gmra.mxu0 %v7128_v42  ;;  %v2935_v57 = vpop.f32.mrf.mxu1 }
 0x3aa   : > { %v7467_v51 = vadd.f32 %v3158_v58, %v2933_v31  ;;  %3691 = vmatprep.mubr.f32.mxu0 %v8432_v17 }
 0x3ab   : > { %v3160_v39 = vpop.f32.mrf.mxu0  ;;  %v2938_v46 = vpop.f32.mrf.mxu1  ;;  %3467 = vmatmul.mubr.f32.gmra.mxu1 %v8427_v12 }
 0x3ac   : > { %3471 = vmatprep.mubr.f32.mxu1 %v8433_v22  ;;  %v8437_v39 = vld [vmem:[#allocation54_spill] sm:$0xff] }
 0x3ad   : > { %v3163_v9 = vpop.f32.mrf.mxu0  ;;  %3692 = vmatmul.mubr.f32.gmra.mxu0 %v8434_v34  ;;  %v2940_v60 = vpop.f32.mrf.mxu1  ;;  %v8438_v34 = vld [vmem:[#allocation56_spill] sm:$0xff] }
 0x3ae   : > { %v7473_v32 = vadd.f32 %v3163_v9, %v2938_v46  ;;  %3696 = vmatprep.mubr.f32.mxu0 %v8435_v26 }
 0x3af   : > { %v3165_v42 = vpop.f32.mrf.mxu0  ;;  %v2943_v24 = vpop.f32.mrf.mxu1  ;;  %3472 = vmatmul.mubr.f32.gmra.mxu1 %v8430_v30 }
 0x3b0   : > { %3476 = vmatprep.mubr.f32.mxu1 %v8436_v43 }
 0x3b1   : > { %v3168_v11 = vpop.f32.mrf.mxu0  ;;  %3697 = vmatmul.mubr.f32.gmra.mxu0 %v7178_v38  ;;  %v2945_v12 = vpop.f32.mrf.mxu1 }
 0x3b2   : > { %v7479_v16 = vadd.f32 %v3168_v11, %v2943_v24  ;;  %3701 = vmatprep.mubr.f32.mxu0 %v7138_v14 }
 0x3b3   : > { %v3170_v31 = vpop.f32.mrf.mxu0  ;;  %v2948_v58 = vpop.f32.mrf.mxu1  ;;  %3477 = vmatmul.mubr.f32.gmra.mxu1 %v8432_v17 }
 0x3b4   : > { %3481 = vmatprep.mubr.f32.mxu1 %v7253_v45 }
 0x3b5   : > { %v3173_v57 = vpop.f32.mrf.mxu0  ;;  %3702 = vmatmul.mubr.f32.gmra.mxu0 %v8437_v39  ;;  %v2950_v30 = vpop.f32.mrf.mxu1 }
 0x3b6   : > { %v7485_v46 = vadd.f32 %v3173_v57, %v2948_v58  ;;  %3706 = vmatprep.mubr.f32.mxu0 %v7143_v50 }
 0x3b7   : > { %v3175_v38 = vpop.f32.mrf.mxu0  ;;  %v2953_v9 = vpop.f32.mrf.mxu1  ;;  %3482 = vmatmul.mubr.f32.gmra.mxu1 %v8435_v26 }
 0x3b8   : > { %3486 = vmatprep.mubr.f32.mxu1 %v8438_v34 }
 0x3b9   : > { %v3178_v60 = vpop.f32.mrf.mxu0  ;;  %3707 = vmatmul.mubr.f32.gmra.mxu0 %v7229_v29  ;;  %v2955_v17 = vpop.f32.mrf.mxu1 }
 0x3ba   : > { %v7491_v42 = vadd.f32 %v3178_v60, %v2953_v9  ;;  %3711 = vmatprep.mubr.f32.mxu0 %v7188_v13 }
 0x3bb   : > { %v3180_v24 = vpop.f32.mrf.mxu0  ;;  %v2958_v11 = vpop.f32.mrf.mxu1  ;;  %3487 = vmatmul.mubr.f32.gmra.mxu1 %v7138_v14 }
 0x3bc   : > { %3491 = vmatprep.mubr.f32.mxu1 %v7303_v4 }
 0x3bd   : > { %v3183_v12 = vpop.f32.mrf.mxu0  ;;  %3712 = vmatmul.mubr.f32.gmra.mxu0 %v7260_v62  ;;  %v2960_v26 = vpop.f32.mrf.mxu1 }
 0x3be   : > { %v7497_v31 = vadd.f32 %v3183_v12, %v2958_v11  ;;  %3716 = vmatprep.mubr.f32.mxu0 %v7193_v28  ;;  %v2580_v26 = vrot.slane %v7288_v61, 1 }
 0x3bf   : > { %v3185_v29 = vpop.f32.mrf.mxu0  ;;  %v2963_v58 = vpop.f32.mrf.mxu1  ;;  %3492 = vmatmul.mubr.f32.gmra.mxu1 %v7143_v50 }
 0x3c0   : > { %3496 = vmatprep.mubr.f32.mxu1 %v7321_v55  ;;  %v8439_v29 = vld [vmem:[#allocation57_spill] sm:$0xff] }
 0x3c1   : > { %v3188_v57 = vpop.f32.mrf.mxu0  ;;  %3717 = vmatmul.mubr.f32.gmra.mxu0 %v7278_v10  ;;  %v2965_v14 = vpop.f32.mrf.mxu1 }
 0x3c2   : > { %v7503_v39 = vadd.f32 %v3188_v57, %v2963_v58  ;;  %3721 = vmatprep.mubr.f32.mxu0 %v7238_v35  ;;  %v2598_v58 = vrot.slane %v8439_v29, 1  ;;  %v8440_v57 = vld [vmem:[#allocation58_spill] sm:$0xff] }
 0x3c3   : > { %v3190_v62 = vpop.f32.mrf.mxu0  ;;  %v2968_v30 = vpop.f32.mrf.mxu1  ;;  %3497 = vmatmul.mubr.f32.gmra.mxu1 %v7188_v13 }
 0x3c4   : > { %3501 = vmatprep.mubr.f32.mxu1 %v7343_v33 }
 0x3c5   : > { %v3193_v38 = vpop.f32.mrf.mxu0  ;;  %3722 = vmatmul.mubr.f32.gmra.mxu0 %v7311_v56  ;;  %v2970_v50 = vpop.f32.mrf.mxu1 }
 0x3c6   : > { %v7509_v9 = vadd.f32 %v3193_v38, %v2968_v30  ;;  %3726 = vmatprep.mubr.f32.mxu0 %v7243_v6  ;;  %v7529_v50 = vsel %vm581_vm2, %v2580_v26, %v2598_v58 }
 0x3c7   : > { %v3195_v10 = vpop.f32.mrf.mxu0  ;;  %v2973_v60 = vpop.f32.mrf.mxu1  ;;  %3502 = vmatmul.mubr.f32.gmra.mxu1 %v7193_v28 }
 0x3c8   : > { %3506 = vmatprep.mubr.f32.mxu1 %v7359_v52  ;;  %v8441_v10 = vld [vmem:[#allocation16_spill] sm:$0xff] }
 0x3c9   : > { %v3198_v17 = vpop.f32.mrf.mxu0  ;;  %3727 = vmatmul.mubr.f32.gmra.mxu0 %v7328_v0  ;;  %v2975_v13 = vpop.f32.mrf.mxu1 }
 0x3ca   : > { %v7515_v24 = vadd.f32 %v3198_v17, %v2973_v60  ;;  %3731 = vmatprep.mubr.f32.mxu0 %v7288_v61  ;;  %v2811_v60 = vrot.slane %v8439_v29, %v8441_v10  ;;  %v2634_v17 = vsel %vm581_vm2, %v2598_v58, %v2580_v26 }
 0x3cb   : > { %v3200_v11 = vpop.f32.mrf.mxu0  ;;  %v2978_v12 = vpop.f32.mrf.mxu1  ;;  %3507 = vmatmul.mubr.f32.gmra.mxu1 %v7238_v35 }
 0x3cc   : > { %3511 = vmatprep.mubr.f32.mxu1 %v7376_v44 }
 0x3cd   : > { %v3203_v28 = vpop.f32.mrf.mxu0  ;;  %3732 = vmatmul.mubr.f32.gmra.mxu0 %v8440_v57  ;;  %v2980_v14 = vpop.f32.mrf.mxu1 }
 0x3ce   : > { %v7523_v62 = vadd.f32 %v3203_v28, %v2978_v12  ;;  %3736 = vmatprep.mubr.f32.mxu0 %v8439_v29  ;;  %v7543_v14 = vsel %vm734_vm3, %v2811_v60, %v2634_v17 }
 0x3cf   : > { %v3205_v30 = vpop.f32.mrf.mxu0  ;;  %v2983_v38 = vpop.f32.mrf.mxu1  ;;  %3512 = vmatmul.mubr.f32.gmra.mxu1 %v7243_v6 }
 0x3d0   : > { %3516 = vmatprep.mubr.f32.mxu1 %v7529_v50 }
 0x3d1   : > { %v3208_v13 = vpop.f32.mrf.mxu0  ;;  %3737 = vmatmul.mubr.f32.gmra.mxu0 %v7367_v8  ;;  %v2985_v11 = vpop.f32.mrf.mxu1 }
 0x3d2   : > { %v7537_v12 = vadd.f32 %v3208_v13, %v2983_v38  ;;  %3741 = vmatprep.mubr.f32.mxu0 %v7238_v35 }
 0x3d3   : > { %v3210_v28 = vpop.f32.mrf.mxu0  ;;  %v2988_v57 = vpop.f32.mrf.mxu1  ;;  %3517 = vmatmul.mubr.f32.gmra.mxu1 %v7288_v61 }
 0x3d4   : > { %3521 = vmatprep.mubr.f32.mxu1 %v7543_v14 }
 0x3d5   : > { %v3213_v54 = vpop.f32.mrf.mxu0  ;;  %3742 = vmatmul.mubr.f32.gmra.mxu0 %v7311_v56  ;;  %v2990_v26 = vpop.f32.mrf.mxu1 }
 0x3d6   : > { %v7547_v8 = vadd.f32 %v3213_v54, %v2988_v57  ;;  %3746 = vmatprep.mubr.f32.mxu0 %v7243_v6 }
 0x3d7   : > { %v3215_v58 = vpop.f32.mrf.mxu0  ;;  %v2993_v35 = vpop.f32.mrf.mxu1  ;;  %3522 = vmatmul.mubr.f32.gmra.mxu1 %v8439_v29 }
 0x3d8   : > { %4669 = vmatprep.mubr.f32.mxu1 %v6655_v40 }
 0x3d9   : > { %v3218_v61 = vpop.f32.mrf.mxu0  ;;  %3747 = vmatmul.mubr.f32.gmra.mxu0 %v7328_v0  ;;  %v2995_v19 = vpop.f32.mrf.mxu1 }
 0x3da   : > { %v7553_v30 = vadd.f32 %v3218_v61, %v2993_v35 }
 0x3db   : > { %v3220_v38 = vpop.f32.mrf.mxu0  ;;  %v2998_v10 = vpop.f32.mrf.mxu1  ;;  %4670 = vmatmul.mubr.f32.vlgmr.msra.gmra.mxu1 %v6681_v23 }
 0x3dc   : > { %4672 = vmatprep.mubr.f32.mxu1 %v6779_v53 }
 0x3dd   : > { %v3223_v56 = vpop.f32.mrf.mxu0  ;;  %v3000_v6 = vpop.f32.mrf.mxu1 }
 0x3de   : > { %v7557_v60 = vadd.f32 %v3223_v56, %v2998_v10 }
 0x3df   : > { %v3225_v17 = vpop.f32.mrf.mxu0  ;;  %v3003_v29 = vpop.f32.mrf.mxu1  ;;  %4673 = vmatmul.mubr.f32.gmra.mxu1 %v8401_v20 }
 0x3e0   : > { %4675 = vmatprep.mubr.f32.mxu1 %v6829_v18 }
 0x3e1   : > { %v3228_v40 = vpop.f32.mrf.mxu0  ;;  %v3005_v0 = vpop.f32.mrf.mxu1 }
 0x3e2   : > { %v7561_v13 = vadd.f32 %v3228_v40, %v3003_v29 }
 0x3e3   : > { %v3230_v11 = vpop.f32.mrf.mxu0  ;;  %v3008_v28 = vpop.f32.mrf.mxu1  ;;  %4676 = vmatmul.mubr.f32.gmra.mxu1 %v8404_v59 }
 0x3e4   : > { %4678 = vmatprep.mubr.f32.mxu1 %v6877_v5 }
 0x3e5   : > { %v3233_v23 = vpop.f32.mrf.mxu0  ;;  %v3010_v53 = vpop.f32.mrf.mxu1 }
 0x3e6   : > { %v7565_v57 = vadd.f32 %v3233_v23, %v3008_v28 }
 0x3e7   : > { %v3235_v54 = vpop.f32.mrf.mxu0  ;;  %v3013_v26 = vpop.f32.mrf.mxu1  ;;  %4679 = vmatmul.mubr.f32.gmra.mxu1 %v8409_v63 }
 0x3e8   : > { %4681 = vmatprep.mubr.f32.mxu1 %v8412_v27 }
 0x3e9   : > { %v3238_v18 = vpop.f32.mrf.mxu0  ;;  %v3015_v20 = vpop.f32.mrf.mxu1 }
 0x3ea   : > { %v7569_v58 = vadd.f32 %v3238_v18, %v3013_v26 }
 0x3eb   : > { %v3240_v35 = vpop.f32.mrf.mxu0  ;;  %v3018_v61 = vpop.f32.mrf.mxu1  ;;  %4682 = vmatmul.mubr.f32.gmra.mxu1 %v6953_v36 }
 0x3ec   : > { %4684 = vmatprep.mubr.f32.mxu1 %v8414_v41 }
 0x3ed   : > { %v3243_v5 = vpop.f32.mrf.mxu0  ;;  %v3020_v59 = vpop.f32.mrf.mxu1 }
 0x3ee   : > { %v7573_v19 = vadd.f32 %v3243_v5, %v3018_v61 }
 0x3ef   : > { %v3245_v38 = vpop.f32.mrf.mxu0  ;;  %v3023_v10 = vpop.f32.mrf.mxu1  ;;  %4685 = vmatmul.mubr.f32.gmra.mxu1 %v8416_v37 }
 0x3f0   : > { %4687 = vmatprep.mubr.f32.mxu1 %v8419_v47 }
 0x3f1   : > { %v3248_v63 = vpop.f32.mrf.mxu0  ;;  %v3025_v27 = vpop.f32.mrf.mxu1 }
 0x3f2   : > { %v7577_v56 = vadd.f32 %v3248_v63, %v3023_v10 }
 0x3f3   : > { %v3250_v6 = vpop.f32.mrf.mxu0  ;;  %v3028_v17 = vpop.f32.mrf.mxu1  ;;  %4688 = vmatmul.mubr.f32.gmra.mxu1 %v8421_v7 }
 0x3f4   : > { %4690 = vmatprep.mubr.f32.mxu1 %v8424_v25 }
 0x3f5   : > { %v3253_v36 = vpop.f32.mrf.mxu0  ;;  %v3030_v41 = vpop.f32.mrf.mxu1 }
 0x3f6   : > { %v7581_v29 = vadd.f32 %v3253_v36, %v3028_v17 }
 0x3f7   : > { %v3255_v40 = vpop.f32.mrf.mxu0  ;;  %v3033_v0 = vpop.f32.mrf.mxu1  ;;  %4691 = vmatmul.mubr.f32.gmra.mxu1 %v7103_v49 }
 0x3f8   : > { %4693 = vmatprep.mubr.f32.mxu1 %v8426_v2 }
 0x3f9   : > { %v3258_v37 = vpop.f32.mrf.mxu0  ;;  %v3035_v47 = vpop.f32.mrf.mxu1 }
 0x3fa   : > { %v7585_v11 = vadd.f32 %v3258_v37, %v3033_v0 }
 0x3fb   : > { %v3260_v28 = vpop.f32.mrf.mxu0  ;;  %v3038_v23 = vpop.f32.mrf.mxu1  ;;  %4694 = vmatmul.mubr.f32.gmra.mxu1 %v8428_v1 }
 0x3fc   : > { %4696 = vmatprep.mubr.f32.mxu1 %v8431_v3 }
 0x3fd   : > { %v3263_v7 = vpop.f32.mrf.mxu0  ;;  %v3040_v25 = vpop.f32.mrf.mxu1 }
 0x3fe   : > { %v7589_v53 = vadd.f32 %v3263_v7, %v3038_v23 }
 0x3ff   : > { %v3265_v54 = vpop.f32.mrf.mxu0  ;;  %v3043_v26 = vpop.f32.mrf.mxu1  ;;  %4697 = vmatmul.mubr.f32.gmra.mxu1 %v8433_v22 }
 0x400   : > { %4699 = vmatprep.mubr.f32.mxu1 %v8436_v43 }
 0x401   : > { %v3268_v49 = vpop.f32.mrf.mxu0  ;;  %v3045_v2 = vpop.f32.mrf.mxu1 }
 0x402   : > { %v7593_v18 = vadd.f32 %v3268_v49, %v3043_v26 }
 0x403   : > { %v3270_v20 = vpop.f32.mrf.mxu0  ;;  %v3048_v35 = vpop.f32.mrf.mxu1  ;;  %4700 = vmatmul.mubr.f32.gmra.mxu1 %v7253_v45 }
 0x404   : > { %4702 = vmatprep.mubr.f32.mxu1 %v8438_v34 }
 0x405   : > { %v3273_v1 = vpop.f32.mrf.mxu0  ;;  %v3050_v3 = vpop.f32.mrf.mxu1 }
 0x406   : > { %v7597_v61 = vadd.f32 %v3273_v1, %v3048_v35 }
 0x407   : > { %v3275_v5 = vpop.f32.mrf.mxu0  ;;  %v3053_v59 = vpop.f32.mrf.mxu1  ;;  %4703 = vmatmul.mubr.f32.gmra.mxu1 %v7303_v4 }
 0x408   : > { %4705 = vmatprep.mubr.f32.mxu1 %v7321_v55 }
 0x409   : > { %v3278_v22 = vpop.f32.mrf.mxu0  ;;  %v3055_v43 = vpop.f32.mrf.mxu1 }
 0x40a   : > { %v7601_v38 = vadd.f32 %v3278_v22, %v3053_v59 }
 0x40b   : > { %v3280_v10 = vpop.f32.mrf.mxu0  ;;  %v3058_v63 = vpop.f32.mrf.mxu1  ;;  %4706 = vmatmul.mubr.f32.gmra.mxu1 %v7343_v33 }
 0x40c   : > { %4708 = vmatprep.mubr.f32.mxu1 %v7359_v52 }
 0x40d   : > { %v3283_v45 = vpop.f32.mrf.mxu0  ;;  %v3060_v34 = vpop.f32.mrf.mxu1 }
 0x40e   : > { %v7605_v27 = vadd.f32 %v3283_v45, %v3058_v63 }
 0x40f   : > { %v3285_v6 = vpop.f32.mrf.mxu0  ;;  %v3063_v17 = vpop.f32.mrf.mxu1  ;;  %4709 = vmatmul.mubr.f32.gmra.mxu1 %v7376_v44 }
 0x410   : > { %4711 = vmatprep.mubr.f32.mxu1 %v7529_v50 }
 0x411   : > { %v3288_v4 = vpop.f32.mrf.mxu0  ;;  %v3065_v55 = vpop.f32.mrf.mxu1 }
 0x412   : > { %v7609_v36 = vadd.f32 %v3288_v4, %v3063_v17 }
 0x413   : > { %v3290_v41 = vpop.f32.mrf.mxu0  ;;  %v3068_v40 = vpop.f32.mrf.mxu1  ;;  %4712 = vmatmul.mubr.f32.gmra.mxu1 %v7543_v14 }
 0x414   : > { %4714 = vmatprep.mubr.f32.mxu1 %v7359_v52 }
 0x415   : > { %v3293_v33 = vpop.f32.mrf.mxu0  ;;  %v3070_v0 = vpop.f32.mrf.mxu1 }
 0x416   : > { %v7613_v37 = vadd.f32 %v3293_v33, %v3068_v40 }
 0x417   : > { %v3295_v47 = vpop.f32.mrf.mxu0  ;;  %v3073_v28 = vpop.f32.mrf.mxu1  ;;  %4715 = vmatmul.mubr.f32.gmra.mxu1 %v7376_v44 }
 0x419   : > { %v3298_v23 = vpop.f32.mrf.mxu0  ;;  %v3075_v50 = vpop.f32.mrf.mxu1 }
 0x41a   : > { %v7616_v7 = vadd.f32 %v3298_v23, %v3073_v28 }
 0x41b   : > { %v3300_v25 = vpop.f32.mrf.mxu0  ;;  %v3368_v54 = vpop.f32.mrf.mxu1 }
 0x41c   : > { %v3369_v26 = vadd.f32 %v3368_v54, %v7449_v48 }
 0x41d   : > { %v3593_v49 = vpop.f32.mrf.mxu0  ;;  %v3370_v14 = vpop.f32.mrf.mxu1 }
 0x41e   : > { %v7619_v2 = vadd.f32 %v3593_v49, %v3369_v26 }
 0x41f   : > { %v3595_v52 = vpop.f32.mrf.mxu0  ;;  %v3373_v20 = vpop.f32.mrf.mxu1 }
 0x420   : > { %v3374_v35 = vadd.f32 %v3373_v20, %v7455_v21 }
 0x421   : > { %v3598_v1 = vpop.f32.mrf.mxu0  ;;  %v3375_v3 = vpop.f32.mrf.mxu1 }
 0x422   : > { %v7622_v5 = vadd.f32 %v3598_v1, %v3374_v35 }
 0x423   : > { %v3600_v44 = vpop.f32.mrf.mxu0  ;;  %v3378_v59 = vpop.f32.mrf.mxu1 }
 0x424   : > { %v3379_v22 = vadd.f32 %v3378_v59, %v7461_v15 }
 0x425   : > { %v3603_v43 = vpop.f32.mrf.mxu0  ;;  %v3380_v10 = vpop.f32.mrf.mxu1 }
 0x426   : > { %v7625_v63 = vadd.f32 %v3603_v43, %v3379_v22 }
 0x427   : > { %v3605_v48 = vpop.f32.mrf.mxu0  ;;  %v3383_v45 = vpop.f32.mrf.mxu1 }
 0x428   : > { %v3384_v34 = vadd.f32 %v3383_v45, %v7467_v51 }
 0x429   : > { %v3608_v6 = vpop.f32.mrf.mxu0  ;;  %v3385_v17 = vpop.f32.mrf.mxu1 }
 0x42a   : > { %v7628_v4 = vadd.f32 %v3608_v6, %v3384_v34 }
 0x42b   : > { %v3610_v21 = vpop.f32.mrf.mxu0  ;;  %v3388_v55 = vpop.f32.mrf.mxu1 }
 0x42c   : > { %v3389_v41 = vadd.f32 %v3388_v55, %v7473_v32 }
 0x42d   : > { %v3613_v40 = vpop.f32.mrf.mxu0  ;;  %v3390_v33 = vpop.f32.mrf.mxu1 }
 0x42e   : > { %v7631_v0 = vadd.f32 %v3613_v40, %v3389_v41 }
 0x42f   : > { %v3615_v15 = vpop.f32.mrf.mxu0  ;;  %v3393_v47 = vpop.f32.mrf.mxu1 }
 0x430   : > { %v3394_v28 = vadd.f32 %v3393_v47, %v7479_v16 }
 0x431   : > { %v3618_v23 = vpop.f32.mrf.mxu0  ;;  %v3395_v50 = vpop.f32.mrf.mxu1 }
 0x432   : > { %v7634_v25 = vadd.f32 %v3618_v23, %v3394_v28 }
 0x433   : > { %v3620_v51 = vpop.f32.mrf.mxu0  ;;  %v3398_v54 = vpop.f32.mrf.mxu1 }
 0x434   : > { %v3399_v26 = vadd.f32 %v3398_v54, %v7485_v46 }
 0x435   : > { %v3623_v49 = vpop.f32.mrf.mxu0  ;;  %v3400_v14 = vpop.f32.mrf.mxu1 }
 0x436   : > { %v7637_v52 = vadd.f32 %v3623_v49, %v3399_v26 }
 0x437   : > { %v3625_v32 = vpop.f32.mrf.mxu0  ;;  %v3403_v20 = vpop.f32.mrf.mxu1 }
 0x438   : > { %v3404_v35 = vadd.f32 %v3403_v20, %v7491_v42 }
 0x439   : > { %v3628_v1 = vpop.f32.mrf.mxu0  ;;  %v3405_v3 = vpop.f32.mrf.mxu1 }
 0x43a   : > { %v7640_v44 = vadd.f32 %v3628_v1, %v3404_v35 }
 0x43b   : > { %v3630_v16 = vpop.f32.mrf.mxu0  ;;  %v3408_v59 = vpop.f32.mrf.mxu1 }
 0x43c   : > { %v3409_v22 = vadd.f32 %v3408_v59, %v7497_v31 }
 0x43d   : > { %v3633_v43 = vpop.f32.mrf.mxu0  ;;  %v3410_v10 = vpop.f32.mrf.mxu1 }
 0x43e   : > { %v7643_v48 = vadd.f32 %v3633_v43, %v3409_v22 }
 0x43f   : > { %v3635_v46 = vpop.f32.mrf.mxu0  ;;  %v3413_v45 = vpop.f32.mrf.mxu1 }
 0x440   : > { %v3414_v34 = vadd.f32 %v3413_v45, %v7503_v39 }
 0x441   : > { %v3638_v6 = vpop.f32.mrf.mxu0  ;;  %v3415_v17 = vpop.f32.mrf.mxu1 }
 0x442   : > { %v7646_v21 = vadd.f32 %v3638_v6, %v3414_v34 }
 0x443   : > { %v3640_v42 = vpop.f32.mrf.mxu0  ;;  %v3418_v55 = vpop.f32.mrf.mxu1 }
 0x444   : > { %v3419_v41 = vadd.f32 %v3418_v55, %v7509_v9 }
 0x445   : > { %v3643_v40 = vpop.f32.mrf.mxu0  ;;  %v3420_v33 = vpop.f32.mrf.mxu1 }
 0x446   : > { %v7649_v15 = vadd.f32 %v3643_v40, %v3419_v41 }
 0x447   : > { %v3645_v31 = vpop.f32.mrf.mxu0  ;;  %v3423_v47 = vpop.f32.mrf.mxu1 }
 0x448   : > { %v3424_v28 = vadd.f32 %v3423_v47, %v7515_v24 }
 0x449   : > { %v3648_v23 = vpop.f32.mrf.mxu0  ;;  %v3425_v50 = vpop.f32.mrf.mxu1 }
 0x44a   : > { %v7652_v51 = vadd.f32 %v3648_v23, %v3424_v28 }
 0x44b   : > { %v3650_v39 = vpop.f32.mrf.mxu0  ;;  %v3428_v54 = vpop.f32.mrf.mxu1 }
 0x44c   : > { %v3429_v26 = vadd.f32 %v3428_v54, %v7523_v62 }
 0x44d   : > { %v3653_v49 = vpop.f32.mrf.mxu0  ;;  %v3430_v14 = vpop.f32.mrf.mxu1 }
 0x44e   : > { %v7655_v32 = vadd.f32 %v3653_v49, %v3429_v26 }
 0x44f   : > { %v3655_v9 = vpop.f32.mrf.mxu0  ;;  %v3433_v20 = vpop.f32.mrf.mxu1 }
 0x450   : > { %v3434_v35 = vadd.f32 %v3433_v20, %v7537_v12 }
 0x451   : > { %v3658_v1 = vpop.f32.mrf.mxu0  ;;  %v3435_v3 = vpop.f32.mrf.mxu1 }
 0x452   : > { %v7658_v16 = vadd.f32 %v3658_v1, %v3434_v35 }
 0x453   : > { %v3660_v24 = vpop.f32.mrf.mxu0  ;;  %v3438_v59 = vpop.f32.mrf.mxu1 }
 0x454   : > { %v3439_v22 = vadd.f32 %v3438_v59, %v7547_v8 }
 0x455   : > { %v3663_v43 = vpop.f32.mrf.mxu0  ;;  %v3440_v10 = vpop.f32.mrf.mxu1 }
 0x456   : > { %v7661_v46 = vadd.f32 %v3663_v43, %v3439_v22 }
 0x457   : > { %v3665_v62 = vpop.f32.mrf.mxu0  ;;  %v3443_v45 = vpop.f32.mrf.mxu1 }
 0x458   : > { %v3444_v34 = vadd.f32 %v3443_v45, %v7553_v30 }
 0x459   : > { %v3668_v6 = vpop.f32.mrf.mxu0  ;;  %v3445_v17 = vpop.f32.mrf.mxu1 }
 0x45a   : > { %v7664_v42 = vadd.f32 %v3668_v6, %v3444_v34 }
 0x45b   : > { %v3670_v12 = vpop.f32.mrf.mxu0  ;;  %v3448_v55 = vpop.f32.mrf.mxu1 }
 0x45c   : > { %v3449_v41 = vadd.f32 %v3448_v55, %v7557_v60 }
 0x45d   : > { %v3673_v40 = vpop.f32.mrf.mxu0  ;;  %v3450_v33 = vpop.f32.mrf.mxu1 }
 0x45e   : > { %v7667_v31 = vadd.f32 %v3673_v40, %v3449_v41 }
 0x45f   : > { %v3675_v8 = vpop.f32.mrf.mxu0  ;;  %v3453_v47 = vpop.f32.mrf.mxu1 }
 0x460   : > { %v3454_v28 = vadd.f32 %v3453_v47, %v7561_v13 }
 0x461   : > { %v3678_v23 = vpop.f32.mrf.mxu0  ;;  %v3455_v50 = vpop.f32.mrf.mxu1 }
 0x462   : > { %v7670_v39 = vadd.f32 %v3678_v23, %v3454_v28 }
 0x463   : > { %v3680_v30 = vpop.f32.mrf.mxu0  ;;  %v3458_v54 = vpop.f32.mrf.mxu1 }
 0x464   : > { %v3459_v26 = vadd.f32 %v3458_v54, %v7565_v57 }
 0x465   : > { %v3683_v49 = vpop.f32.mrf.mxu0  ;;  %v3460_v14 = vpop.f32.mrf.mxu1 }
 0x466   : > { %v7673_v9 = vadd.f32 %v3683_v49, %v3459_v26 }
 0x467   : > { %v3685_v60 = vpop.f32.mrf.mxu0  ;;  %v3463_v20 = vpop.f32.mrf.mxu1 }
 0x468   : > { %v3464_v35 = vadd.f32 %v3463_v20, %v7569_v58 }
 0x469   : > { %v3688_v1 = vpop.f32.mrf.mxu0  ;;  %v3465_v3 = vpop.f32.mrf.mxu1 }
 0x46a   : > { %v7676_v24 = vadd.f32 %v3688_v1, %v3464_v35 }
 0x46b   : > { %v3690_v13 = vpop.f32.mrf.mxu0  ;;  %v3468_v59 = vpop.f32.mrf.mxu1 }
 0x46c   : > { %v3469_v22 = vadd.f32 %v3468_v59, %v7573_v19 }
 0x46d   : > { %v3693_v43 = vpop.f32.mrf.mxu0  ;;  %v3470_v10 = vpop.f32.mrf.mxu1 }
 0x46e   : > { %v7679_v62 = vadd.f32 %v3693_v43, %v3469_v22 }
 0x46f   : > { %v3695_v57 = vpop.f32.mrf.mxu0  ;;  %v3473_v45 = vpop.f32.mrf.mxu1 }
 0x470   : > { %v3474_v34 = vadd.f32 %v3473_v45, %v7577_v56 }
 0x471   : > { %v3698_v6 = vpop.f32.mrf.mxu0  ;;  %v3475_v17 = vpop.f32.mrf.mxu1 }
 0x472   : > { %v7682_v12 = vadd.f32 %v3698_v6, %v3474_v34 }
 0x473   : > { %v3700_v58 = vpop.f32.mrf.mxu0  ;;  %v3478_v55 = vpop.f32.mrf.mxu1 }
 0x474   : > { %v3479_v41 = vadd.f32 %v3478_v55, %v7581_v29 }
 0x475   : > { %v3703_v40 = vpop.f32.mrf.mxu0  ;;  %v3480_v33 = vpop.f32.mrf.mxu1 }
 0x476   : > { %v7685_v8 = vadd.f32 %v3703_v40, %v3479_v41 }
 0x477   : > { %v3705_v19 = vpop.f32.mrf.mxu0  ;;  %v3483_v47 = vpop.f32.mrf.mxu1 }
 0x478   : > { %v3484_v28 = vadd.f32 %v3483_v47, %v7585_v11 }
 0x479   : > { %v3708_v23 = vpop.f32.mrf.mxu0  ;;  %v3485_v50 = vpop.f32.mrf.mxu1 }
 0x47a   : > { %v7688_v30 = vadd.f32 %v3708_v23, %v3484_v28 }
 0x47b   : > { %v3710_v56 = vpop.f32.mrf.mxu0  ;;  %v3488_v54 = vpop.f32.mrf.mxu1 }
 0x47c   : > { %v3489_v26 = vadd.f32 %v3488_v54, %v7589_v53 }
 0x47d   : > { %v3713_v49 = vpop.f32.mrf.mxu0  ;;  %v3490_v14 = vpop.f32.mrf.mxu1 }
 0x47e   : > { %v7691_v60 = vadd.f32 %v3713_v49, %v3489_v26 }
 0x47f   : > { %v3715_v29 = vpop.f32.mrf.mxu0  ;;  %v3493_v20 = vpop.f32.mrf.mxu1 }
 0x480   : > { %v3494_v35 = vadd.f32 %v3493_v20, %v7593_v18 }
 0x481   : > { %v3718_v1 = vpop.f32.mrf.mxu0  ;;  %v3495_v3 = vpop.f32.mrf.mxu1 }
 0x482   : > { %v7694_v13 = vadd.f32 %v3718_v1, %v3494_v35 }
 0x483   : > { %v3720_v11 = vpop.f32.mrf.mxu0  ;;  %v3498_v59 = vpop.f32.mrf.mxu1 }
 0x484   : > { %v3499_v22 = vadd.f32 %v3498_v59, %v7597_v61 }
 0x485   : > { %v3723_v43 = vpop.f32.mrf.mxu0  ;;  %v3500_v10 = vpop.f32.mrf.mxu1 }
 0x486   : > { %v7697_v57 = vadd.f32 %v3723_v43, %v3499_v22 }
 0x487   : > { %v3725_v53 = vpop.f32.mrf.mxu0  ;;  %v3503_v45 = vpop.f32.mrf.mxu1 }
 0x488   : > { %v3504_v34 = vadd.f32 %v3503_v45, %v7601_v38 }
 0x489   : > { %v3728_v6 = vpop.f32.mrf.mxu0  ;;  %v3505_v17 = vpop.f32.mrf.mxu1 }
 0x48a   : > { %v7700_v58 = vadd.f32 %v3728_v6, %v3504_v34 }
 0x48b   : > { %v3730_v18 = vpop.f32.mrf.mxu0  ;;  %v3508_v55 = vpop.f32.mrf.mxu1 }
 0x48c   : > { %v3509_v41 = vadd.f32 %v3508_v55, %v7605_v27 }
 0x48d   : > { %v3733_v40 = vpop.f32.mrf.mxu0  ;;  %v3510_v33 = vpop.f32.mrf.mxu1 }
 0x48e   : > { %v7703_v19 = vadd.f32 %v3733_v40, %v3509_v41 }
 0x48f   : > { %v3735_v61 = vpop.f32.mrf.mxu0  ;;  %v3513_v47 = vpop.f32.mrf.mxu1 }
 0x490   : > { %v3514_v28 = vadd.f32 %v3513_v47, %v7609_v36 }
 0x491   : > { %v3738_v23 = vpop.f32.mrf.mxu0  ;;  %v3515_v50 = vpop.f32.mrf.mxu1 }
 0x492   : > { %v7706_v56 = vadd.f32 %v3738_v23, %v3514_v28 }
 0x493   : > { %v3740_v38 = vpop.f32.mrf.mxu0  ;;  %v3518_v54 = vpop.f32.mrf.mxu1 }
 0x494   : > { %v3519_v26 = vadd.f32 %v3518_v54, %v7613_v37 }
 0x495   : > { %v3743_v49 = vpop.f32.mrf.mxu0  ;;  %v3520_v14 = vpop.f32.mrf.mxu1 }
 0x496   : > { %v7709_v29 = vadd.f32 %v3743_v49, %v3519_v26 }
 0x497   : > { %v3745_v27 = vpop.f32.mrf.mxu0  ;;  %v3523_v20 = vpop.f32.mrf.mxu1 }
 0x498   : > { %v3524_v35 = vadd.f32 %v3523_v20, %v7616_v7 }
 0x499   : > { %v3748_v1 = vpop.f32.mrf.mxu0  ;;  %v3525_v3 = vpop.f32.mrf.mxu1 }
 0x49a   : > { %v7712_v11 = vadd.f32 %v3748_v1, %v3524_v35 }
 0x49b   : > { %v3750_v36 = vpop.f32.mrf.mxu0  ;;  %v4671_v59 = vpop.f32.mrf.mxu1 }
 0x49c   : > { %v7715_v43 = vadd.f32 %v4671_v59, %v7622_v5 }
 0x49d   : > { %v3818_v22 = vpop.f32.mrf.mxu1 }
 0x49e   : > { %v7718_v37 = vadd.f32 %v3818_v22, %v7619_v2  ;;  %v4051_v7 = vmul.f32 %v7715_v43, %v7715_v43 }
 0x49f   : > { %v4674_v10 = vpop.f32.mrf.mxu1 }
 0x4a0   : > { %v4050_v53 = vmul.f32 %v7718_v37, %v7718_v37  ;;  %v4010_v34 = vadd.f32 %v7715_v43, %v7718_v37  ;;  %v7727_v6 = vadd.f32 %v4674_v10, %v7628_v4 }
 0x4a1   : > { %v3828_v45 = vpop.f32.mrf.mxu1 }
 0x4a2   : > { %v7730_v5 = vadd.f32 %v3828_v45, %v7625_v63  ;;  %v4082_v2 = vadd.f32 %v4051_v7, %v4050_v53  ;;  %v4053_v33 = vmul.f32 %v7727_v6, %v7727_v6 }
 0x4a3   : > { %v4677_v17 = vpop.f32.mrf.mxu1 }
 0x4a4   : > { %v4011_v18 = vadd.f32 %v4010_v34, %v7730_v5  ;;  %v4052_v55 = vmul.f32 %v7730_v5, %v7730_v5  ;;  %v7736_v41 = vadd.f32 %v4677_v17, %v7634_v25 }
 0x4a5   : > { %v3838_v40 = vpop.f32.mrf.mxu1 }
 0x4a6   : > { %v4083_v61 = vadd.f32 %v4082_v2, %v4052_v55  ;;  %v7741_v4 = vadd.f32 %v3838_v40, %v7631_v0  ;;  %v4012_v63 = vadd.f32 %v4011_v18, %v7727_v6  ;;  %v4055_v25 = vmul.f32 %v7736_v41, %v7736_v41 }
 0x4a7   : > { %v4680_v47 = vpop.f32.mrf.mxu1 }
 0x4a8   : > { %v4013_v28 = vadd.f32 %v4012_v63, %v7741_v4  ;;  %v4054_v23 = vmul.f32 %v7741_v4, %v7741_v4  ;;  %v4084_v50 = vadd.f32 %v4083_v61, %v4053_v33  ;;  %v7750_v26 = vadd.f32 %v4680_v47, %v7640_v44 }
 0x4a9   : > { %v3848_v38 = vpop.f32.mrf.mxu1 }
 0x4aa   : > { %v4085_v54 = vadd.f32 %v4084_v50, %v4054_v23  ;;  %v7753_v0 = vadd.f32 %v3848_v38, %v7637_v52  ;;  %v4014_v49 = vadd.f32 %v4013_v28, %v7736_v41  ;;  %v4057_v44 = vmul.f32 %v7750_v26, %v7750_v26 }
 0x4ab   : > { %v4683_v14 = vpop.f32.mrf.mxu1 }
 0x4ac   : > { %v4015_v27 = vadd.f32 %v4014_v49, %v7753_v0  ;;  %v4056_v20 = vmul.f32 %v7753_v0, %v7753_v0  ;;  %v4086_v35 = vadd.f32 %v4085_v54, %v4055_v25  ;;  %v7760_v1 = vadd.f32 %v4683_v14, %v7646_v21 }
 0x4ad   : > { %v3858_v3 = vpop.f32.mrf.mxu1 }
 0x4ae   : > { %v4087_v36 = vadd.f32 %v4086_v35, %v4056_v20  ;;  %v7765_v52 = vadd.f32 %v3858_v3, %v7643_v48  ;;  %v4016_v59 = vadd.f32 %v4015_v27, %v7750_v26  ;;  %v4059_v21 = vmul.f32 %v7760_v1, %v7760_v1 }
 0x4af   : > { %v4686_v22 = vpop.f32.mrf.mxu1 }
 0x4b0   : > { %v4017_v10 = vadd.f32 %v4016_v59, %v7765_v52  ;;  %v4058_v53 = vmul.f32 %v7765_v52, %v7765_v52  ;;  %v4088_v45 = vadd.f32 %v4087_v36, %v4057_v44  ;;  %v7774_v17 = vadd.f32 %v4686_v22, %v7652_v51 }
 0x4b1   : > { %v3868_v7 = vpop.f32.mrf.mxu1 }
 0x4b2   : > { %v4089_v34 = vadd.f32 %v4088_v45, %v4058_v53  ;;  %v7777_v48 = vadd.f32 %v3868_v7, %v7649_v15  ;;  %v4018_v2 = vadd.f32 %v4017_v10, %v7760_v1  ;;  %v4061_v51 = vmul.f32 %v7774_v17, %v7774_v17 }
 0x4b3   : > { %v4689_v18 = vpop.f32.mrf.mxu1 }
 0x4b4   : > { %v4019_v55 = vadd.f32 %v4018_v2, %v7777_v48  ;;  %v4060_v40 = vmul.f32 %v7777_v48, %v7777_v48  ;;  %v4090_v33 = vadd.f32 %v4089_v34, %v4059_v21  ;;  %v7784_v61 = vadd.f32 %v4689_v18, %v7658_v16 }
 0x4b5   : > { %v3878_v63 = vpop.f32.mrf.mxu1 }
 0x4b6   : > { %v4091_v47 = vadd.f32 %v4090_v33, %v4060_v40  ;;  %v7789_v15 = vadd.f32 %v3878_v63, %v7655_v32  ;;  %v4020_v28 = vadd.f32 %v4019_v55, %v7774_v17  ;;  %v4063_v16 = vmul.f32 %v7784_v61, %v7784_v61 }
 0x4b7   : > { %v4692_v23 = vpop.f32.mrf.mxu1 }
 0x4b8   : > { %v4021_v50 = vadd.f32 %v4020_v28, %v7789_v15  ;;  %v4062_v25 = vmul.f32 %v7789_v15, %v7789_v15  ;;  %v4092_v38 = vadd.f32 %v4091_v47, %v4061_v51  ;;  %v7798_v14 = vadd.f32 %v4692_v23, %v7664_v42 }
 0x4b9   : > { %v3888_v54 = vpop.f32.mrf.mxu1 }
 0x4ba   : > { %v4093_v49 = vadd.f32 %v4092_v38, %v4062_v25  ;;  %v7801_v32 = vadd.f32 %v3888_v54, %v7661_v46  ;;  %v4022_v27 = vadd.f32 %v4021_v50, %v7784_v61  ;;  %v4065_v42 = vmul.f32 %v7798_v14, %v7798_v14 }
 0x4bb   : > { %v4695_v20 = vpop.f32.mrf.mxu1 }
 0x4bc   : > { %v4023_v35 = vadd.f32 %v4022_v27, %v7801_v32  ;;  %v4064_v3 = vmul.f32 %v7801_v32, %v7801_v32  ;;  %v4094_v44 = vadd.f32 %v4093_v49, %v4063_v16  ;;  %v7808_v36 = vadd.f32 %v4695_v20, %v7670_v39 }
 0x4bd   : > { %v3898_v59 = vpop.f32.mrf.mxu1 }
 0x4be   : > { %v4095_v22 = vadd.f32 %v4094_v44, %v4064_v3  ;;  %v7813_v46 = vadd.f32 %v3898_v59, %v7667_v31  ;;  %v4024_v10 = vadd.f32 %v4023_v35, %v7798_v14  ;;  %v4067_v39 = vmul.f32 %v7808_v36, %v7808_v36 }
 0x4bf   : > { %v4698_v53 = vpop.f32.mrf.mxu1 }
 0x4c0   : > { %v4025_v45 = vadd.f32 %v4024_v10, %v7813_v46  ;;  %v4066_v21 = vmul.f32 %v7813_v46, %v7813_v46  ;;  %v4096_v7 = vadd.f32 %v4095_v22, %v4065_v42  ;;  %v7822_v18 = vadd.f32 %v4698_v53, %v7676_v24 }
 0x4c1   : > { %v3908_v34 = vpop.f32.mrf.mxu1 }
 0x4c2   : > { %v4097_v2 = vadd.f32 %v4096_v7, %v4066_v21  ;;  %v7825_v31 = vadd.f32 %v3908_v34, %v7673_v9  ;;  %v4026_v55 = vadd.f32 %v4025_v45, %v7808_v36  ;;  %v4069_v24 = vmul.f32 %v7822_v18, %v7822_v18 }
 0x4c3   : > { %v4701_v40 = vpop.f32.mrf.mxu1 }
 0x4c4   : > { %v4027_v33 = vadd.f32 %v4026_v55, %v7825_v31  ;;  %v4068_v63 = vmul.f32 %v7825_v31, %v7825_v31  ;;  %v4098_v51 = vadd.f32 %v4097_v2, %v4067_v39  ;;  %v7832_v47 = vadd.f32 %v4701_v40, %v7682_v12 }
 0x4c5   : > { %v3918_v28 = vpop.f32.mrf.mxu1 }
 0x4c6   : > { %v4099_v23 = vadd.f32 %v4098_v51, %v4068_v63  ;;  %v7837_v9 = vadd.f32 %v3918_v28, %v7679_v62  ;;  %v4028_v50 = vadd.f32 %v4027_v33, %v7822_v18  ;;  %v4071_v12 = vmul.f32 %v7832_v47, %v7832_v47 }
 0x4c7   : > { %v4704_v25 = vpop.f32.mrf.mxu1 }
 0x4c8   : > { %v4029_v38 = vadd.f32 %v4028_v50, %v7837_v9  ;;  %v4070_v16 = vmul.f32 %v7837_v9, %v7837_v9  ;;  %v4100_v54 = vadd.f32 %v4099_v23, %v4069_v24  ;;  %v7846_v20 = vadd.f32 %v4704_v25, %v7688_v30 }
 0x4c9   : > { %v3928_v49 = vpop.f32.mrf.mxu1 }
 0x4ca   : > { %v4101_v27 = vadd.f32 %v4100_v54, %v4070_v16  ;;  %v7849_v62 = vadd.f32 %v3928_v49, %v7685_v8  ;;  %v4030_v35 = vadd.f32 %v4029_v38, %v7832_v47  ;;  %v4073_v30 = vmul.f32 %v7846_v20, %v7846_v20 }
 0x4cb   : > { %v4707_v3 = vpop.f32.mrf.mxu1 }
 0x4cc   : > { %v4031_v44 = vadd.f32 %v4030_v35, %v7849_v62  ;;  %v4072_v59 = vmul.f32 %v7849_v62, %v7849_v62  ;;  %v4102_v42 = vadd.f32 %v4101_v27, %v4071_v12  ;;  %v7856_v22 = vadd.f32 %v4707_v3, %v7694_v13 }
 0x4cd   : > { %v3938_v10 = vpop.f32.mrf.mxu1 }
 0x4ce   : > { %v4103_v53 = vadd.f32 %v4102_v42, %v4072_v59  ;;  %v7861_v8 = vadd.f32 %v3938_v10, %v7691_v60  ;;  %v4032_v45 = vadd.f32 %v4031_v44, %v7846_v20  ;;  %v4075_v13 = vmul.f32 %v7856_v22, %v7856_v22 }
 0x4cf   : > { %v4710_v21 = vpop.f32.mrf.mxu1 }
 0x4d0   : > { %v4033_v7 = vadd.f32 %v4032_v45, %v7861_v8  ;;  %v4074_v39 = vmul.f32 %v7861_v8, %v7861_v8  ;;  %v4104_v34 = vadd.f32 %v4103_v53, %v4073_v30  ;;  %v7870_v40 = vadd.f32 %v4710_v21, %v7700_v58 }
 0x4d1   : > { %v3948_v2 = vpop.f32.mrf.mxu1 }
 0x4d2   : > { %v4105_v55 = vadd.f32 %v4104_v34, %v4074_v39  ;;  %v7873_v60 = vadd.f32 %v3948_v2, %v7697_v57  ;;  %v4034_v33 = vadd.f32 %v4033_v7, %v7856_v22  ;;  %v4077_v58 = vmul.f32 %v7870_v40, %v7870_v40 }
 0x4d3   : > { %v4713_v63 = vpop.f32.mrf.mxu1 }
 0x4d4   : > { %v4035_v51 = vadd.f32 %v4034_v33, %v7873_v60  ;;  %v4076_v28 = vmul.f32 %v7873_v60, %v7873_v60  ;;  %v4106_v24 = vadd.f32 %v4105_v55, %v4075_v13  ;;  %v7880_v23 = vadd.f32 %v4713_v63, %v7706_v56  ;;  %v4009_v63 = vld [vmem:[#allocation4] sm:$0x1] }
 0x4d5   : > { %v3958_v50 = vpop.f32.mrf.mxu1 }
 0x4d6   : > { %v4107_v25 = vadd.f32 %v4106_v24, %v4076_v28  ;;  %v7885_v57 = vadd.f32 %v3958_v50, %v7703_v19  ;;  %v4036_v38 = vadd.f32 %v4035_v51, %v7870_v40  ;;  %v4079_v56 = vmul.f32 %v7880_v23, %v7880_v23  ;;  %v4049_v24 = vld [vmem:[#allocation5] sm:$0x1] }
 0x4d7   : > { %v4716_v16 = vpop.f32.mrf.mxu1 }
 0x4d8   : > { %v4037_v54 = vadd.f32 %v4036_v38, %v7885_v57  ;;  %v4078_v12 = vmul.f32 %v7885_v57, %v7885_v57  ;;  %v4108_v49 = vadd.f32 %v4107_v25, %v4077_v58  ;;  %v7894_v3 = vadd.f32 %v4716_v16, %v7712_v11 }
 0x4d9   : > { %v3968_v27 = vpop.f32.mrf.mxu1 }
 0x4da   : > { %v4109_v35 = vadd.f32 %v4108_v49, %v4078_v12  ;;  %v3969_v19 = vadd.f32 %v3968_v27, %v7709_v29  ;;  %v4038_v44 = vadd.f32 %v4037_v54, %v7880_v23  ;;  %v4081_v30 = vmul.f32 %v7894_v3, %v7894_v3 }
 0x4dc   : > { %v4039_v59 = vadd.f32 %v4038_v44, %v3969_v19  ;;  %v4080_v42 = vmul.f32 %v3969_v19, %v3969_v19  ;;  %v4110_v10 = vadd.f32 %v4109_v35, %v4079_v56 }
 0x4de   : > { %v4040_v53 = vadd.f32 %v4039_v59, %v7894_v3  ;;  %v4111_v45 = vadd.f32 %v4110_v10, %v4080_v42  ;;  %v8442_v42 = vld [vmem:[#allocation17_spill] sm:$0xff] }
 0x4e0   : > { %v4041_v21 = vrot.slane %v4040_v53, 4  ;;  %v4112_v7 = vadd.f32 %v4111_v45, %v4081_v30  ;;  %v4161_v30 = vld [vmem:[%s5125_s30 + $0xf0] sm:$0xff] }
 0x4e2   : > { %v4042_v39 = vadd.f32 %v4041_v21, %v4040_v53  ;;  %v4113_v34 = vrot.slane %v4112_v7, 4 }
 0x4e4   : > { %v4043_v13 = vrot.slane %v4042_v39, 2  ;;  %v4114_v11 = vadd.f32 %v4113_v34, %v4112_v7 }
 0x4e6   : > { %v4044_v2 = vadd.f32 %v4043_v13, %v4042_v39  ;;  %v4115_v55 = vrot.slane %v4114_v11, 2 }
 0x4e8   : > { %v4045_v29 = vrot.slane %v4044_v2, 1  ;;  %v4116_v33 = vadd.f32 %v4115_v55, %v4114_v11 }
 0x4ea   : > { %v4046_v51 = vadd.f32 %v4045_v29, %v4044_v2  ;;  %v4117_v28 = vrot.slane %v4116_v33, 1  ;;  %v4131_v29 = vld [vmem:[%s5125_s30] sm:$0xff] }
 0x4ec   : > { %v4047_v50 = vadd.f32 %v4046_v51, %v4009_v63  ;;  %v4118_v58 = vadd.f32 %v4117_v28, %v4116_v33  ;;  %v4133_v33 = vld [vmem:[%s5125_s30 + $0x10] sm:$0xff]  ;;  %v4136_v63 = vld [vmem:[%s5125_s30 + $0x28] sm:$0xff] }
 0x4ed   : > { %v4137_v51 = vld [vmem:[%s5125_s30 + $0x30] sm:$0xff] }
 0x4ee   : > { %4048 = vst [vmem:[#allocation4] sm:$0x1] %v4047_v50  ;;  %v4119_v25 = vadd.f32 %v4118_v58, %v4049_v24 }
 0x4f0   : > { %4120 = vst [vmem:[#allocation5] sm:$0x1] %v4119_v25 }
 0x4f5   : > { %v4121_v38 = vld [vmem:[#allocation4] sm:$0x1] }
 0x4f6   : > { %v4122_v16 = vmul.f32 0.00390625, %v4121_v38  ;;  %v4144_v38 = vld [vmem:[%s5125_s30 + $0x68] sm:$0xff] }
 0x4f7   : > { %v4123_v54 = vld [vmem:[#allocation5] sm:$0x1] }
 0x4f8   : > { %v4124_v12 = vmul.f32 0.00390625, %v4123_v54  ;;  %v4125_v49 = vmul.f32 %v4122_v16, %v4122_v16 }
 0x4fa   : > { %v4126_v56 = vsub.f32 %v4124_v12, %v4125_v49 }
 0x4fc   : > { %v4127_v27 = vmax.f32 %v4126_v56, 0.0  ;;  %v4148_v56 = vld [vmem:[%s5125_s30 + $0x88] sm:$0xff] }
 0x4fe   : > { %v4128_v35 = vadd.f32 1e-05, %v4127_v27 }
 0x500   : > { %4791 = vrsqrt.f32 %v4128_v35 }
 0x50d   : > { %v4792_v44 = vpop.eup %4791 }
 0x50e   : > { %v4130_v59 = vmul.f32 %v4792_v44, %v4122_v16  ;;  %v4199_v10 = vrot.slane %v4792_v44, %v8442_v42  ;;  %v4143_v16 = vld [vmem:[%s5125_s30 + $0x60] sm:$0xff]  ;;  %v4149_v44 = vld [vmem:[%s5125_s30 + $0x90] sm:$0xff] }
 0x510   : > { %v4231_v53 = vmul.f32 %v4199_v10, %v3969_v19  ;;  %v7904_v45 = vrot.slane %v4130_v59, %v8442_v42  ;;  %v4201_v21 = vmul.f32 %v4199_v10, %v7718_v37  ;;  %v4202_v7 = vmul.f32 %v4199_v10, %v7715_v43 }
 0x511   : > { %v4203_v39 = vmul.f32 %v4199_v10, %v7730_v5  ;;  %v4204_v34 = vmul.f32 %v4199_v10, %v7727_v6  ;;  %v4205_v13 = vmul.f32 %v4199_v10, %v7741_v4  ;;  %v4206_v11 = vmul.f32 %v4199_v10, %v7736_v41  ;;  %v4132_v41 = vld [vmem:[%s5125_s30 + $0x8] sm:$0xff] }
 0x512   : > { %8443 = vst [vmem:[#allocation25_spill] sm:$0xff] %v7904_v45  ;;  %v4263_v19 = vadd.f32 %v4231_v53, %v4161_v30  ;;  %v4207_v2 = vmul.f32 %v4199_v10, %v7753_v0  ;;  %v4208_v55 = vmul.f32 %v4199_v10, %v7750_v26  ;;  %v4209_v37 = vmul.f32 %v4199_v10, %v7765_v52  ;;  %v4134_v0 = vld [vmem:[%s5125_s30 + $0x18] sm:$0xff]  ;;  %v4152_v53 = vld [vmem:[%s5125_s30 + $0xa8] sm:$0xff] }
 0x513   : > { %v4210_v43 = vmul.f32 %v4199_v10, %v7760_v1  ;;  %v4211_v5 = vmul.f32 %v4199_v10, %v7777_v48  ;;  %v4212_v6 = vmul.f32 %v4199_v10, %v7774_v17  ;;  %v4213_v4 = vmul.f32 %v4199_v10, %v7789_v15  ;;  %v4135_v17 = vld [vmem:[%s5125_s30 + $0x20] sm:$0xff]  ;;  %v4138_v15 = vld [vmem:[%s5125_s30 + $0x38] sm:$0xff] }
 0x514   : > { %v4301_v26 = vsub.f32 %v4263_v19, %v7904_v45  ;;  %v4214_v52 = vmul.f32 %v4199_v10, %v7784_v61  ;;  %v4215_v1 = vmul.f32 %v4199_v10, %v7801_v32  ;;  %v4216_v48 = vmul.f32 %v4199_v10, %v7798_v14  ;;  %v4140_v61 = vld [vmem:[%s5125_s30 + $0x48] sm:$0xff]  ;;  %v4139_v32 = vld [vmem:[%s5125_s30 + $0x40] sm:$0xff]  ;;  %v4142_v14 = vld [vmem:[%s5125_s30 + $0x58] sm:$0xff] }
 0x515   : > { %v4217_v28 = vmul.f32 %v4199_v10, %v7813_v46  ;;  %v4218_v24 = vmul.f32 %v4199_v10, %v7808_v36  ;;  %v4219_v50 = vmul.f32 %v4199_v10, %v7825_v31  ;;  %v4220_v58 = vmul.f32 %v4199_v10, %v7822_v18  ;;  %v4141_v31 = vld [vmem:[%s5125_s30 + $0x50] sm:$0xff]  ;;  %v4154_v19 = vld [vmem:[%s5125_s30 + $0xb8] sm:$0xff]  ;;  %v4155_v45 = vld [vmem:[%s5125_s30 + $0xc0] sm:$0xff] }
 0x516   : > { %4333 = vst [vmem:[%s7940_s18 + $0xf0] sm:$0xff] %v4301_v26  ;;  %v4221_v25 = vmul.f32 %v4199_v10, %v7837_v9  ;;  %v4222_v46 = vmul.f32 %v4199_v10, %v7832_v47  ;;  %v4223_v36 = vmul.f32 %v4199_v10, %v7849_v62  ;;  %v4224_v18 = vmul.f32 %v4199_v10, %v7846_v20  ;;  %v4146_v47 = vld [vmem:[%s5125_s30 + $0x78] sm:$0xff]  ;;  %v4145_v62 = vld [vmem:[%s5125_s30 + $0x70] sm:$0xff] }
 0x517   : > { %v4225_v54 = vmul.f32 %v4199_v10, %v7861_v8  ;;  %v4226_v12 = vmul.f32 %v4199_v10, %v7856_v22  ;;  %v4227_v49 = vmul.f32 %v4199_v10, %v7873_v60  ;;  %v4228_v9 = vmul.f32 %v4199_v10, %v7870_v40  ;;  %v4147_v22 = vld [vmem:[%s5125_s30 + $0x80] sm:$0xff]  ;;  %v4150_v60 = vld [vmem:[%s5125_s30 + $0x98] sm:$0xff] }
 0x518   : > { %v4229_v20 = vmul.f32 %v4199_v10, %v7885_v57  ;;  %v4230_v27 = vmul.f32 %v4199_v10, %v7880_v23  ;;  %v4232_v35 = vmul.f32 %v4199_v10, %v7894_v3  ;;  %v4233_v8 = vadd.f32 %v4201_v21, %v4131_v29  ;;  %v4151_v57 = vld [vmem:[%s5125_s30 + $0xa0] sm:$0xff]  ;;  %v4153_v21 = vld [vmem:[%s5125_s30 + $0xb0] sm:$0xff]  ;;  %v4156_v29 = vld [vmem:[%s5125_s30 + $0xc8] sm:$0xff] }
 0x519   : > { %v4234_v59 = vadd.f32 %v4202_v7, %v4132_v41  ;;  %v4235_v40 = vadd.f32 %v4203_v39, %v4133_v33  ;;  %v4236_v42 = vadd.f32 %v4204_v34, %v4134_v0  ;;  %v4237_v30 = vadd.f32 %v4205_v13, %v4135_v17  ;;  %v4158_v0 = vld [vmem:[%s5125_s30 + $0xd8] sm:$0xff]  ;;  %v4157_v13 = vld [vmem:[%s5125_s30 + $0xd0] sm:$0xff]  ;;  %v4159_v33 = vld [vmem:[%s5125_s30 + $0xe0] sm:$0xff] }
 0x51a   : > { %v4238_v23 = vadd.f32 %v4206_v11, %v4136_v63  ;;  %v4239_v26 = vadd.f32 %v4207_v2, %v4137_v51  ;;  %v4240_v3 = vadd.f32 %v4208_v55, %v4138_v15  ;;  %v4241_v10 = vadd.f32 %v4209_v37, %v4139_v32  ;;  %v4160_v51 = vld [vmem:[%s5125_s30 + $0xe8] sm:$0xff]  ;;  %v4162_v15 = vld [vmem:[%s5125_s30 + $0xf8] sm:$0xff] }
 0x51b   : > { %v4242_v7 = vadd.f32 %v4210_v43, %v4140_v61  ;;  %v4243_v41 = vadd.f32 %v4211_v5, %v4141_v31  ;;  %v4244_v39 = vadd.f32 %v4212_v6, %v4142_v14  ;;  %v4245_v34 = vadd.f32 %v4213_v4, %v4143_v16 }
 0x51c   : > { %v4246_v17 = vadd.f32 %v4214_v52, %v4144_v38  ;;  %v4247_v11 = vadd.f32 %v4215_v1, %v4145_v62  ;;  %v4248_v63 = vadd.f32 %v4216_v48, %v4146_v47  ;;  %v4249_v2 = vadd.f32 %v4217_v28, %v4147_v22 }
 0x51d   : > { %v4250_v55 = vadd.f32 %v4218_v24, %v4148_v56  ;;  %v7974_v32 = vadd.f32 %v4219_v50, %v4149_v44  ;;  %v7976_v37 = vadd.f32 %v4220_v58, %v4150_v60  ;;  %v7978_v43 = vadd.f32 %v4221_v25, %v4151_v57  ;;  %v8444_v58 = vld [vmem:[#allocation25_spill] sm:$0xff] }
 0x51e   : > { %v7980_v61 = vadd.f32 %v4222_v46, %v4152_v53  ;;  %v7982_v5 = vadd.f32 %v4223_v36, %v4153_v21  ;;  %v7984_v6 = vadd.f32 %v4224_v18, %v4154_v19  ;;  %v7986_v4 = vadd.f32 %v4225_v54, %v4155_v45 }
 0x51f   : > { %v7988_v52 = vadd.f32 %v4226_v12, %v4156_v29  ;;  %v7990_v1 = vadd.f32 %v4227_v49, %v4157_v13  ;;  %v7992_v48 = vadd.f32 %v4228_v9, %v4158_v0  ;;  %v7994_v28 = vadd.f32 %v4229_v20, %v4159_v33 }
 0x520   : > { %v7996_v24 = vadd.f32 %v4230_v27, %v4160_v51  ;;  %v7998_v50 = vadd.f32 %v4232_v35, %v4162_v15  ;;  %v4271_v14 = vsub.f32 %v4233_v8, %v8444_v58  ;;  %v4272_v45 = vsub.f32 %v4234_v59, %v8444_v58 }
 0x521   : > { %v4273_v25 = vsub.f32 %v4235_v40, %v8444_v58  ;;  %v4274_v46 = vsub.f32 %v4236_v42, %v8444_v58  ;;  %v4275_v36 = vsub.f32 %v4237_v30, %v8444_v58  ;;  %v4276_v18 = vsub.f32 %v4238_v23, %v8444_v58 }
 0x522   : > { %v4277_v31 = vsub.f32 %v4239_v26, %v8444_v58  ;;  %v4278_v38 = vsub.f32 %v4240_v3, %v8444_v58  ;;  %v4279_v16 = vsub.f32 %v4241_v10, %v8444_v58  ;;  %v4280_v54 = vsub.f32 %v4242_v7, %v8444_v58  ;;  %4303 = vst [vmem:[%s7940_s18] sm:$0xff] %v4271_v14 }
 0x523   : > { %4304 = vst [vmem:[%s7940_s18 + $0x8] sm:$0xff] %v4272_v45  ;;  %v4281_v12 = vsub.f32 %v4243_v41, %v8444_v58  ;;  %v4282_v49 = vsub.f32 %v4244_v39, %v8444_v58  ;;  %v4283_v9 = vsub.f32 %v4245_v34, %v8444_v58  ;;  %v4284_v47 = vsub.f32 %v4246_v17, %v8444_v58 }
 0x524   : > { %4305 = vst [vmem:[%s7940_s18 + $0x10] sm:$0xff] %v4273_v25  ;;  %4306 = vst [vmem:[%s7940_s18 + $0x18] sm:$0xff] %v4274_v46  ;;  %v4285_v62 = vsub.f32 %v4247_v11, %v8444_v58  ;;  %v4286_v56 = vsub.f32 %v4248_v63, %v8444_v58  ;;  %v4287_v20 = vsub.f32 %v4249_v2, %v8444_v58 }
 0x525   : > { %4307 = vst [vmem:[%s7940_s18 + $0x20] sm:$0xff] %v4275_v36  ;;  %4308 = vst [vmem:[%s7940_s18 + $0x28] sm:$0xff] %v4276_v18  ;;  %v4288_v27 = vsub.f32 %v4250_v55, %v8444_v58  ;;  %v4289_v35 = vsub.f32 %v7974_v32, %v8444_v58  ;;  %v4290_v8 = vsub.f32 %v7976_v37, %v8444_v58 }
 0x526   : > { %4309 = vst [vmem:[%s7940_s18 + $0x30] sm:$0xff] %v4277_v31  ;;  %4310 = vst [vmem:[%s7940_s18 + $0x38] sm:$0xff] %v4278_v38  ;;  %v4291_v22 = vsub.f32 %v7978_v43, %v8444_v58  ;;  %v4292_v60 = vsub.f32 %v7980_v61, %v8444_v58  ;;  %v4293_v44 = vsub.f32 %v7982_v5, %v8444_v58 }
 0x527   : > { %4311 = vst [vmem:[%s7940_s18 + $0x40] sm:$0xff] %v4279_v16  ;;  %4312 = vst [vmem:[%s7940_s18 + $0x48] sm:$0xff] %v4280_v54  ;;  %v4294_v59 = vsub.f32 %v7984_v6, %v8444_v58  ;;  %v4295_v40 = vsub.f32 %v7986_v4, %v8444_v58  ;;  %v4296_v42 = vsub.f32 %v7988_v52, %v8444_v58 }
 0x528   : > { %4313 = vst [vmem:[%s7940_s18 + $0x50] sm:$0xff] %v4281_v12  ;;  %4314 = vst [vmem:[%s7940_s18 + $0x58] sm:$0xff] %v4282_v49  ;;  %v4297_v30 = vsub.f32 %v7990_v1, %v8444_v58  ;;  %v4298_v53 = vsub.f32 %v7992_v48, %v8444_v58  ;;  %v4299_v57 = vsub.f32 %v7994_v28, %v8444_v58 }
 0x529   : > { %4315 = vst [vmem:[%s7940_s18 + $0x60] sm:$0xff] %v4283_v9  ;;  %4316 = vst [vmem:[%s7940_s18 + $0x68] sm:$0xff] %v4284_v47  ;;  %v4300_v19 = vsub.f32 %v7996_v24, %v8444_v58  ;;  %v4302_v23 = vsub.f32 %v7998_v50, %v8444_v58 }
 0x52a   : > { %4317 = vst [vmem:[%s7940_s18 + $0x70] sm:$0xff] %v4285_v62  ;;  %4318 = vst [vmem:[%s7940_s18 + $0x78] sm:$0xff] %v4286_v56 }
 0x52b   : > { %4319 = vst [vmem:[%s7940_s18 + $0x80] sm:$0xff] %v4287_v20  ;;  %4320 = vst [vmem:[%s7940_s18 + $0x88] sm:$0xff] %v4288_v27 }
 0x52c   : > { %4321 = vst [vmem:[%s7940_s18 + $0x90] sm:$0xff] %v4289_v35  ;;  %4322 = vst [vmem:[%s7940_s18 + $0x98] sm:$0xff] %v4290_v8 }
 0x52d   : > { %4323 = vst [vmem:[%s7940_s18 + $0xa0] sm:$0xff] %v4291_v22  ;;  %4324 = vst [vmem:[%s7940_s18 + $0xa8] sm:$0xff] %v4292_v60 }
 0x52e   : > { %4325 = vst [vmem:[%s7940_s18 + $0xb0] sm:$0xff] %v4293_v44  ;;  %4326 = vst [vmem:[%s7940_s18 + $0xb8] sm:$0xff] %v4294_v59 }
 0x52f   : > { %4327 = vst [vmem:[%s7940_s18 + $0xc0] sm:$0xff] %v4295_v40  ;;  %4328 = vst [vmem:[%s7940_s18 + $0xc8] sm:$0xff] %v4296_v42 }
 0x530   : > { %4329 = vst [vmem:[%s7940_s18 + $0xd0] sm:$0xff] %v4297_v30  ;;  %4330 = vst [vmem:[%s7940_s18 + $0xd8] sm:$0xff] %v4298_v53 }
 0x531   : > { %4331 = vst [vmem:[%s7940_s18 + $0xe0] sm:$0xff] %v4299_v57  ;;  %4332 = vst [vmem:[%s7940_s18 + $0xe8] sm:$0xff] %v4300_v19 }
 0x532   : > { %4334 = vst [vmem:[%s7940_s18 + $0xf8] sm:$0xff] %v4302_v23 }
 0x533   : > { %4897 = shalt.err (!%p4894_p3)
}
 0x534   : > { %s4898_s17 = scalar_lea.hbm %s8069_s25, 4096  ;;  %s4902_s26 = scalar_lea.hbm %s8128_s3, 8192 }
 0x535   : > { %p4899_p11 = scmp.ne.s32.totalorder %s8069_s25, %s4898_s17  ;;  %p4903_p4 = scmp.lt.s32.totalorder %s8069_s25, %s8128_s3 }
 0x536   : > { %p4904_p6 = scmp.lt.s32.totalorder %s4902_s26, %s4898_s17 }
 0x537   : > { %p4900_p9 = pnand %p4899_p11, %p8445_p2 }
 0x538   : > { %p4905_p8 = por %p4904_p6, %p4903_p4 }
 0x539   : > { %p4901_p1 = pneg %p4900_p9 }
 0x53b   : > { %p4906_p5 = pnand %p4905_p8, %p4901_p1 }
 0x53d   : > { %4909 = shalt.err (!%p4906_p5)
}
 0x53e   : > { %s4961_s30 = smov 128   ;;  %s4962_s18 = smov 8  }
 0x53f   : > { %4727 = dma.vmem_to_hbm [thread:$0]  (%p8445_p2), %s8071_s27, 4096, %s8069_s25, %s4336_s29, %s4961_s30, %s4961_s30, %s4962_s18  }
 0x540 PF: > { %s4364_s20 = sand.u32 1, %s4940_s12   ;;  %p8446_p7 = scmp.ne.s32.totalorder %s8266_s19, 0 }
 0x541   : > { %p8447_p12 = scmp.ge.s32.totalorder %s4952_s15, 2  ;;  %s4365_s16 = scalar_lea.sflag [#allocation8], %s4364_s20 }
 0x543   : > { %p4741_p13 = pnand %p8447_p12, %p8446_p7 }
 0x545   : > { %p4742_p0 = pneg %p4741_p13 }
 0x547   : > { %4935 = dma.done.wait (%p4742_p0), %s4365_s16, 4096  }
 0x548   : > { %4937 = vsyncadd (%p4742_p0), %s4365_s16, 4294963200  ;;  %p17_p10 = scmp.ge.s32.totalorder %s5061_s7, 4   ;;  %s8448_s12 = smov %s4944_s13 }
 0x549   : > { %s8449_s13 = smov %s4948_s14  ;;  %s8450_s14 = smov %s5077_s11 }
 0x54a   : > { %s8451_s15 = smov %s5061_s7  ;;  %19 = sbr.rel (!%p17_p10) target bundleno = 6 (0x6), region = 91 }
 0x54f   :  { %4370 = vsyncpa [#allocation7], 1 }
 0x550   :  { %4372 = vsyncpa [#allocation7 + $0x1], 1 }
 0x551   :  { %4373 = vsyncpa [#allocation10], 1 }
 0x552   :  { %4374 = vsyncpa [#allocation8], 1 }
 0x553   :  { %4376 = vsyncpa [#allocation8 + $0x1], 1 }

</bundles_post_ra>
